<compile_context>
chip_gen: v5e
topology: v5e:2x2
jax: 0.10.0
libtpu: 0.0.40
codegen_flags: <defaults>
</compile_context>

<pallas_src>
import functools
import math

import jax
import jax.numpy as jnp
from jax import lax
from jax.experimental import pallas as pl
from jax.experimental.pallas import tpu as pltpu


# --------------------------------------------------------------------------
# in-kernel math helpers (traced inside the Pallas kernel)
# --------------------------------------------------------------------------

def _rmsnorm(x, g, eps=1e-8):
    # x: (n, d), g: (1, d).  Matches torch: x / clamp(||x|| * d**-0.5, eps) * g
    d = x.shape[-1]
    norm = jnp.sqrt(jnp.sum(x * x, axis=-1, keepdims=True)) * (d ** -0.5)
    inv = 1.0 / jnp.maximum(norm, eps)          # (n, 1) exact divides only
    return x * inv * g


def _erf(x):
    # Abramowitz & Stegun 7.1.26 polynomial (abs err < ~1.5e-7 before the
    # approximate reciprocal).
    # TODO(synk): lax.erf has no guaranteed Mosaic lowering, so exact-GELU's
    # erf is approximated here (rational term uses the EUP reciprocal).
    a1, a2, a3, a4, a5 = (0.254829592, -0.284496736, 1.421413741,
                          -1.453152027, 1.061405429)
    p = 0.3275911
    s = jnp.where(x >= 0, 1.0, -1.0)
    ax = jnp.abs(x)
    t = pl.reciprocal(1.0 + p * ax, approx=True)
    poly = ((((a5 * t + a4) * t + a3) * t + a2) * t + a1) * t
    return s * (1.0 - poly * jnp.exp(-ax * ax))


def _gelu(x):
    # exact (erf-based) GELU, as in torch.nn.GELU()
    return 0.5 * x * (1.0 + _erf(x * 0.7071067811865476))


# --------------------------------------------------------------------------
# fused per-layer kernel: attn(token_shift(x)) + x ; ff(token_shift(.)) + .
# (one grid step = one batch element)
# --------------------------------------------------------------------------

def _layer_kernel(mask_ref, x_ref, ga_ref, wq_ref, wkv_ref, wo_ref,
                  gf_ref, w1_ref, b1_ref, w2_ref, b2_ref, gout_ref, o_ref,
                  *, heads, dim_head, final_norm):
    x = x_ref[0]                                            # (n, d) f32
    n, d = x.shape
    dh = dim_head

    # ---- hoisted masks for token_shift (built once, used twice) -----------
    col = lax.broadcasted_iota(jnp.int32, (n, d), 1)
    row = lax.broadcasted_iota(jnp.int32, (n, d), 0)
    keep_mask = col < (d // 2)                              # first half unchanged
    row0_mask = row == 0

    def token_shift(t):
        # second half of channels shifted down one position; row 0 -> zeros.
        sh = pltpu.roll(t, 1, 0)                            # XLU sublane roll
        sh = jnp.where(row0_mask, 0.0, sh)
        return jnp.where(keep_mask, t, sh)

    # ---- attention sub-layer ----------------------------------------------
    xn = _rmsnorm(token_shift(x), ga_ref[...]).astype(jnp.bfloat16)

    q = jnp.dot(xn, wq_ref[...], preferred_element_type=jnp.float32)    # (n, H*dh)
    kv = jnp.dot(xn, wkv_ref[...], preferred_element_type=jnp.float32)  # (n, 2*dh)
    q = q.astype(jnp.bfloat16)
    k = kv[:, :dh].astype(jnp.bfloat16)                     # single shared kv head
    v = kv[:, dh:].astype(jnp.bfloat16)

    # stack per-head q blocks along the sublane axis -> one batched score matmul
    qf = jnp.concatenate([q[:, h * dh:(h + 1) * dh] for h in range(heads)],
                         axis=0)                            # (H*n, dh) bf16

    sim = lax.dot_general(qf, k, (((1,), (1,)), ((), ())),
                          preferred_element_type=jnp.float32)  # (H*n, n) f32
    sim = sim * (dh ** -0.5) + mask_ref[...]                # alibi + causal (-f32max)
    sim = sim - jnp.max(sim, axis=-1, keepdims=True)
    p = jnp.exp(sim)
    p = p * pl.reciprocal(jnp.sum(p, axis=-1, keepdims=True), approx=True)

    of = jnp.dot(p.astype(jnp.bfloat16), v,
                 preferred_element_type=jnp.float32).astype(jnp.bfloat16)  # (H*n, dh)
    # re-pack per-head outputs along lanes -> one full-width output projection
    oc = jnp.concatenate([of[h * n:(h + 1) * n, :] for h in range(heads)],
                         axis=1)                            # (n, H*dh) bf16
    y = jnp.dot(oc, wo_ref[...], preferred_element_type=jnp.float32)     # (n, d)
    x1 = x + y                                              # residual

    # ---- feed-forward sub-layer --------------------------------------------
    xn2 = _rmsnorm(token_shift(x1), gf_ref[...]).astype(jnp.bfloat16)
    h1 = jnp.dot(xn2, w1_ref[...], preferred_element_type=jnp.float32) + b1_ref[...]
    h1 = _gelu(h1)                                          # f32 elementwise (v5e-safe)
    y2 = jnp.dot(h1.astype(jnp.bfloat16), w2_ref[...],
                 preferred_element_type=jnp.float32) + b2_ref[...]
    out = x1 + y2                                           # residual

    if final_norm:                                          # fold final RMSNorm
        out = _rmsnorm(out, gout_ref[...])
    o_ref[0] = out
    # NOTE: dropout rates are 0.0 (eval semantics) -> identity, omitted.


# --------------------------------------------------------------------------
# pallas_call wrapper
# --------------------------------------------------------------------------

def _full_spec(a):
    zeros = (0,) * a.ndim
    return pl.BlockSpec(a.shape, lambda b: zeros)           # whole array each step


def _layer_block(x, mask, attn_p, ff_p, g_out, *, heads, dim_head, final_norm):
    B, N, D = x.shape
    kernel = functools.partial(_layer_kernel, heads=heads, dim_head=dim_head,
                               final_norm=final_norm)
    xspec = pl.BlockSpec((1, N, D), lambda b: (b, 0, 0))
    in_specs = [_full_spec(mask), xspec,
                _full_spec(attn_p["g"]), _full_spec(attn_p["wq"]),
                _full_spec(attn_p["wkv"]), _full_spec(attn_p["wo"]),
                _full_spec(ff_p["g"]), _full_spec(ff_p["w1"]),
                _full_spec(ff_p["b1"]), _full_spec(ff_p["w2"]),
                _full_spec(ff_p["b2"]), _full_spec(g_out)]
    return pl.pallas_call(
        kernel,
        out_shape=jax.ShapeDtypeStruct((B, N, D), x.dtype),
        grid=(B,),
        in_specs=in_specs,
        out_specs=xspec,
        compiler_params=pltpu.CompilerParams(
            dimension_semantics=("parallel",),
            vmem_limit_bytes=32 * 1024 * 1024),
    )(mask, x, attn_p["g"], attn_p["wq"], attn_p["wkv"], attn_p["wo"],
      ff_p["g"], ff_p["w1"], ff_p["b1"], ff_p["w2"], ff_p["b2"], g_out)


# --------------------------------------------------------------------------
# Alibi bias + causal mask (precomputed host-side), parameter init, forward
# --------------------------------------------------------------------------

def _alibi_slopes(heads):
    def pow2_slopes(n):
        start = 2 ** (-2 ** (-(math.log2(n) - 3)))
        return [start * start ** i for i in range(n)]
    if math.log2(heads).is_integer():
        return pow2_slopes(heads)
    closest = 2 ** math.floor(math.log2(heads))
    return pow2_slopes(closest) + pow2_slopes(2 * closest)[0::2][: heads - closest]


def _attn_additive_mask(heads, n):
    # alibi bias (slope * key_index, matching the torch reference) combined
    # with the causal mask (-float32.max, matching masked_fill), flattened to
    # (heads*n, n) with row = h*n + query_index to match the kernel's
    # sublane-stacked head layout.
    slopes = jnp.asarray(_alibi_slopes(heads), dtype=jnp.float32)        # (H,)
    j = jnp.arange(n, dtype=jnp.float32)
    bias = slopes[:, None, None] * j[None, None, :]                      # (H,1,n)
    bias = jnp.broadcast_to(bias, (heads, n, n))
    qi = jnp.arange(n)[None, :, None]
    kj = jnp.arange(n)[None, None, :]
    neg = -jnp.finfo(jnp.float32).max
    bias = jnp.where(kj > qi, neg, bias)
    return bias.reshape(heads * n, n)


def init_params(key, *, dim, layers, heads, dim_head, ff_mult):
    inner = heads * dim_head
    hidden = dim * ff_mult
    wdt = jnp.bfloat16                                      # bf16 weights, f32 accum
    params = {"layers": []}
    for _ in range(layers):
        key, k1, k2, k3, k4, k5 = jax.random.split(key, 6)
        attn = {
            "g":   jnp.ones((1, dim), jnp.float32),
            "wq":  (0.02 * jax.random.normal(k1, (dim, inner), jnp.float32)).astype(wdt),
            "wkv": (0.02 * jax.random.normal(k2, (dim, 2 * dim_head), jnp.float32)).astype(wdt),
            "wo":  (0.02 * jax.random.normal(k3, (inner, dim), jnp.float32)).astype(wdt),
        }
        ff = {
            "g":  jnp.ones((1, dim), jnp.float32),
            "w1": (0.02 * jax.random.normal(k4, (dim, hidden), jnp.float32)).astype(wdt),
            "b1": jnp.zeros((1, hidden), jnp.float32),
            "w2": (0.02 * jax.random.normal(k5, (hidden, dim), jnp.float32)).astype(wdt),
            "b2": jnp.zeros((1, dim), jnp.float32),
        }
        params["layers"].append({"attn": attn, "ff": ff})
    params["g"] = jnp.ones((1, dim), jnp.float32)
    return params


@functools.partial(jax.jit, static_argnames=("heads", "dim_head"))
def transformer_forward(x, params, *, heads, dim_head):
    # x: (B, N, D) float32
    _, N, _ = x.shape
    mask = _attn_additive_mask(heads, N)                    # rel_pos_bias=True + causal
    n_layers = len(params["layers"])
    for i, layer in enumerate(params["layers"]):
        x = _layer_block(x, mask, layer["attn"], layer["ff"], params["g"],
                         heads=heads, dim_head=dim_head,
                         final_norm=(i == n_layers - 1))
    return x


# --------------------------------------------------------------------------

if __name__ == "__main__":
    # small but lane-dense shapes: D = heads*dim_head = 128, N multiple of 8
    B, N, D = 2, 16, 128
    HEADS, DIM_HEAD, LAYERS, FF_MULT = 4, 32, 2, 4

    key = jax.random.PRNGKey(0)
    kx, kp = jax.random.split(key)
    x = jax.random.normal(kx, (B, N, D), dtype=jnp.float32)
    params = init_params(kp, dim=D, layers=LAYERS, heads=HEADS,
                         dim_head=DIM_HEAD, ff_mult=FF_MULT)

    out = transformer_forward(x, params, heads=HEADS, dim_head=DIM_HEAD)
    out = jax.block_until_ready(out)
    assert out.shape == (B, N, D) and out.dtype == jnp.float32
    assert bool(jnp.all(jnp.isfinite(out)))
    print("KERNEL_OK")
</pallas_src>

<mosaic_0001>
module attributes {stable_mosaic.version = 11 : i64} {
  func.func @_layer_kernel(%arg0: i32, %arg1: memref<64x16xf32, #tpu.memory_space<vmem>>, %arg2: memref<1x16x128xf32, #tpu.memory_space<vmem>>, %arg3: memref<1x128xf32, #tpu.memory_space<vmem>>, %arg4: memref<128x128xbf16, #tpu.memory_space<vmem>>, %arg5: memref<128x64xbf16, #tpu.memory_space<vmem>>, %arg6: memref<128x128xbf16, #tpu.memory_space<vmem>>, %arg7: memref<1x128xf32, #tpu.memory_space<vmem>>, %arg8: memref<128x512xbf16, #tpu.memory_space<vmem>>, %arg9: memref<1x512xf32, #tpu.memory_space<vmem>>, %arg10: memref<512x128xbf16, #tpu.memory_space<vmem>>, %arg11: memref<1x128xf32, #tpu.memory_space<vmem>>, %arg12: memref<1x128xf32, #tpu.memory_space<vmem>>, %arg13: memref<1x16x128xf32, #tpu.memory_space<vmem>>) attributes {dimension_semantics = [#tpu.dimension_semantics<parallel>], iteration_bounds = array<i64: 2>, scalar_prefetch = 0 : i64, scratch_operands = 0 : i64, tpu.core_type = #tpu.core_type<tc>, window_params = [{pipeline_mode = #tpu.pipeline_mode<synchronous>, transform_indices = @transform_0, window_bounds = array<i64: 64, 16>}, {transform_indices = @transform_1, window_bounds = array<i64: 1, 16, 128>}, {pipeline_mode = #tpu.pipeline_mode<synchronous>, transform_indices = @transform_2, window_bounds = array<i64: 1, 128>}, {pipeline_mode = #tpu.pipeline_mode<synchronous>, transform_indices = @transform_3, window_bounds = array<i64: 128, 128>}, {pipeline_mode = #tpu.pipeline_mode<synchronous>, transform_indices = @transform_4, window_bounds = array<i64: 128, 64>}, {pipeline_mode = #tpu.pipeline_mode<synchronous>, transform_indices = @transform_5, window_bounds = array<i64: 128, 128>}, {pipeline_mode = #tpu.pipeline_mode<synchronous>, transform_indices = @transform_6, window_bounds = array<i64: 1, 128>}, {pipeline_mode = #tpu.pipeline_mode<synchronous>, transform_indices = @transform_7, window_bounds = array<i64: 128, 512>}, {pipeline_mode = #tpu.pipeline_mode<synchronous>, transform_indices = @transform_8, window_bounds = array<i64: 1, 512>}, {pipeline_mode = #tpu.pipeline_mode<synchronous>, transform_indices = @transform_9, window_bounds = array<i64: 512, 128>}, {pipeline_mode = #tpu.pipeline_mode<synchronous>, transform_indices = @transform_10, window_bounds = array<i64: 1, 128>}, {pipeline_mode = #tpu.pipeline_mode<synchronous>, transform_indices = @transform_11, window_bounds = array<i64: 1, 128>}, {transform_indices = @transform_12, window_bounds = array<i64: 1, 16, 128>}]} {
    %c0 = arith.constant 0 : index
    %c0_0 = arith.constant 0 : index
    %c0_1 = arith.constant 0 : index
    %0 = vector.load %arg2[%c0, %c0_0, %c0_1] : memref<1x16x128xf32, #tpu.memory_space<vmem>>, vector<1x16x128xf32>
    %1 = vector.shape_cast %0 : vector<1x16x128xf32> to vector<16x128xf32>
    %2 = tpu.iota {dimensions = array<i32: 1>} : vector<16x128xi32>
    %3 = tpu.iota {dimensions = array<i32: 0>} : vector<16x128xi32>
    %c64_i32 = arith.constant 64 : i32
    %4 = vector.broadcast %c64_i32 : i32 to vector<16x128xi32>
    %5 = arith.cmpi slt, %2, %4 : vector<16x128xi32>
    %c0_i32 = arith.constant 0 : i32
    %6 = vector.broadcast %c0_i32 : i32 to vector<16x128xi32>
    %7 = arith.cmpi eq, %3, %6 : vector<16x128xi32>
    %c1_i32 = arith.constant 1 : i32
    %8 = tpu.dynamic_rotate %1 by %c1_i32 dim 0 : vector<16x128xf32>, i32 -> vector<16x128xf32>
    %cst = arith.constant 0.000000e+00 : f32
    %9 = vector.broadcast %cst : f32 to vector<16x128xf32>
    %10 = arith.select %7, %9, %8 : vector<16x128xi1>, vector<16x128xf32>
    %11 = arith.select %5, %1, %10 : vector<16x128xi1>, vector<16x128xf32>
    %c0_2 = arith.constant 0 : index
    %c0_3 = arith.constant 0 : index
    %12 = vector.load %arg3[%c0_2, %c0_3] : memref<1x128xf32, #tpu.memory_space<vmem>>, vector<1x128xf32>
    %13 = arith.mulf %11, %11 : vector<16x128xf32>
    %cst_4 = arith.constant dense<0.000000e+00> : vector<16xf32>
    %14 = vector.multi_reduction <add>, %13, %cst_4 [1] : vector<16x128xf32> to vector<16xf32>
    %15 = vector.shape_cast %14 : vector<16xf32> to vector<16x1xf32>
    %16 = math.sqrt %15 : vector<16x1xf32>
    %cst_5 = arith.constant 0.0883883461 : f32
    %17 = vector.broadcast %cst_5 : f32 to vector<16x1xf32>
    %18 = arith.mulf %16, %17 : vector<16x1xf32>
    %cst_6 = arith.constant 9.99999993E-9 : f32
    %19 = vector.broadcast %cst_6 : f32 to vector<16x1xf32>
    %20 = arith.maximumf %18, %19 : vector<16x1xf32>
    %cst_7 = arith.constant 1.000000e+00 : f32
    %21 = vector.broadcast %cst_7 : f32 to vector<16x1xf32>
    %22 = arith.divf %21, %20 : vector<16x1xf32>
    %23 = vector.broadcast %22 : vector<16x1xf32> to vector<16x128xf32>
    %24 = arith.mulf %11, %23 : vector<16x128xf32>
    %25 = vector.broadcast %12 : vector<1x128xf32> to vector<16x128xf32>
    %26 = arith.mulf %24, %25 : vector<16x128xf32>
    %27 = arith.truncf %26 : vector<16x128xf32> to vector<16x128xbf16>
    %c0_8 = arith.constant 0 : index
    %c0_9 = arith.constant 0 : index
    %28 = vector.load %arg4[%c0_8, %c0_9] : memref<128x128xbf16, #tpu.memory_space<vmem>>, vector<128x128xbf16>
    %cst_10 = arith.constant dense<0.000000e+00> : vector<16x128xf32>
    %29 = tpu.matmul %27, %28, %cst_10 {dimension_numbers = #tpu.dot_dimension_numbers<[1], [0], [0], [1], [0, 0, 1, 1], [], []>} : vector<16x128xbf16>, vector<128x128xbf16>, vector<16x128xf32> -> vector<16x128xf32>
    %c0_11 = arith.constant 0 : index
    %c0_12 = arith.constant 0 : index
    %30 = vector.load %arg5[%c0_11, %c0_12] : memref<128x64xbf16, #tpu.memory_space<vmem>>, vector<128x64xbf16>
    %cst_13 = arith.constant dense<0.000000e+00> : vector<16x64xf32>
    %31 = tpu.matmul %27, %30, %cst_13 {dimension_numbers = #tpu.dot_dimension_numbers<[1], [0], [0], [1], [0, 0, 1, 1], [], []>} : vector<16x128xbf16>, vector<128x64xbf16>, vector<16x64xf32> -> vector<16x64xf32>
    %32 = arith.truncf %29 : vector<16x128xf32> to vector<16x128xbf16>
    %33 = vector.extract_strided_slice %31 {offsets = [0, 0], sizes = [16, 32], strides = [1, 1]} : vector<16x64xf32> to vector<16x32xf32>
    %34 = arith.truncf %33 : vector<16x32xf32> to vector<16x32xbf16>
    %35 = vector.extract_strided_slice %31 {offsets = [0, 32], sizes = [16, 32], strides = [1, 1]} : vector<16x64xf32> to vector<16x32xf32>
    %36 = arith.truncf %35 : vector<16x32xf32> to vector<16x32xbf16>
    %37 = vector.extract_strided_slice %32 {offsets = [0, 0], sizes = [16, 32], strides = [1, 1]} : vector<16x128xbf16> to vector<16x32xbf16>
    %38 = vector.extract_strided_slice %32 {offsets = [0, 32], sizes = [16, 32], strides = [1, 1]} : vector<16x128xbf16> to vector<16x32xbf16>
    %39 = vector.extract_strided_slice %32 {offsets = [0, 64], sizes = [16, 32], strides = [1, 1]} : vector<16x128xbf16> to vector<16x32xbf16>
    %40 = vector.extract_strided_slice %32 {offsets = [0, 96], sizes = [16, 32], strides = [1, 1]} : vector<16x128xbf16> to vector<16x32xbf16>
    %41 = tpu.concatenate %37, %38, %39, %40 in 0 : vector<16x32xbf16>, vector<16x32xbf16>, vector<16x32xbf16>, vector<16x32xbf16> -> vector<64x32xbf16>
    %cst_14 = arith.constant dense<0.000000e+00> : vector<64x16xf32>
    %42 = tpu.matmul %41, %34, %cst_14 {dimension_numbers = #tpu.dot_dimension_numbers<[1], [1], [0], [0], [0, 0, 1, 0], [], []>} : vector<64x32xbf16>, vector<16x32xbf16>, vector<64x16xf32> -> vector<64x16xf32>
    %cst_15 = arith.constant 0.176776692 : f32
    %43 = vector.broadcast %cst_15 : f32 to vector<64x16xf32>
    %44 = arith.mulf %42, %43 : vector<64x16xf32>
    %c0_16 = arith.constant 0 : index
    %c0_17 = arith.constant 0 : index
    %45 = vector.load %arg1[%c0_16, %c0_17] : memref<64x16xf32, #tpu.memory_space<vmem>>, vector<64x16xf32>
    %46 = arith.addf %44, %45 : vector<64x16xf32>
    %cst_18 = arith.constant dense<0xFF800000> : vector<64xf32>
    %47 = vector.multi_reduction <maximumf>, %46, %cst_18 [1] : vector<64x16xf32> to vector<64xf32>
    %48 = vector.shape_cast %47 : vector<64xf32> to vector<64x1xf32>
    %49 = vector.broadcast %48 : vector<64x1xf32> to vector<64x16xf32>
    %50 = arith.subf %46, %49 : vector<64x16xf32>
    %51 = math.exp %50 : vector<64x16xf32>
    %cst_19 = arith.constant dense<0.000000e+00> : vector<64xf32>
    %52 = vector.multi_reduction <add>, %51, %cst_19 [1] : vector<64x16xf32> to vector<64xf32>
    %53 = vector.shape_cast %52 : vector<64xf32> to vector<64x1xf32>
    %54 = tpu.reciprocal %53 {approx = true} : vector<64x1xf32> -> vector<64x1xf32>
    %55 = vector.broadcast %54 : vector<64x1xf32> to vector<64x16xf32>
    %56 = arith.mulf %51, %55 : vector<64x16xf32>
    %57 = arith.truncf %56 : vector<64x16xf32> to vector<64x16xbf16>
    %cst_20 = arith.constant dense<0.000000e+00> : vector<64x32xf32>
    %58 = tpu.matmul %57, %36, %cst_20 {dimension_numbers = #tpu.dot_dimension_numbers<[1], [0], [0], [1], [0, 0, 1, 1], [], []>} : vector<64x16xbf16>, vector<16x32xbf16>, vector<64x32xf32> -> vector<64x32xf32>
    %59 = arith.truncf %58 : vector<64x32xf32> to vector<64x32xbf16>
    %60 = vector.extract_strided_slice %59 {offsets = [0, 0], sizes = [16, 32], strides = [1, 1]} : vector<64x32xbf16> to vector<16x32xbf16>
    %61 = vector.extract_strided_slice %59 {offsets = [16, 0], sizes = [16, 32], strides = [1, 1]} : vector<64x32xbf16> to vector<16x32xbf16>
    %62 = vector.extract_strided_slice %59 {offsets = [32, 0], sizes = [16, 32], strides = [1, 1]} : vector<64x32xbf16> to vector<16x32xbf16>
    %63 = vector.extract_strided_slice %59 {offsets = [48, 0], sizes = [16, 32], strides = [1, 1]} : vector<64x32xbf16> to vector<16x32xbf16>
    %64 = tpu.concatenate %60, %61, %62, %63 in 1 : vector<16x32xbf16>, vector<16x32xbf16>, vector<16x32xbf16>, vector<16x32xbf16> -> vector<16x128xbf16>
    %c0_21 = arith.constant 0 : index
    %c0_22 = arith.constant 0 : index
    %65 = vector.load %arg6[%c0_21, %c0_22] : memref<128x128xbf16, #tpu.memory_space<vmem>>, vector<128x128xbf16>
    %cst_23 = arith.constant dense<0.000000e+00> : vector<16x128xf32>
    %66 = tpu.matmul %64, %65, %cst_23 {dimension_numbers = #tpu.dot_dimension_numbers<[1], [0], [0], [1], [0, 0, 1, 1], [], []>} : vector<16x128xbf16>, vector<128x128xbf16>, vector<16x128xf32> -> vector<16x128xf32>
    %67 = arith.addf %1, %66 : vector<16x128xf32>
    %c1_i32_24 = arith.constant 1 : i32
    %68 = tpu.dynamic_rotate %67 by %c1_i32_24 dim 0 : vector<16x128xf32>, i32 -> vector<16x128xf32>
    %cst_25 = arith.constant 0.000000e+00 : f32
    %69 = vector.broadcast %cst_25 : f32 to vector<16x128xf32>
    %70 = arith.select %7, %69, %68 : vector<16x128xi1>, vector<16x128xf32>
    %71 = arith.select %5, %67, %70 : vector<16x128xi1>, vector<16x128xf32>
    %c0_26 = arith.constant 0 : index
    %c0_27 = arith.constant 0 : index
    %72 = vector.load %arg7[%c0_26, %c0_27] : memref<1x128xf32, #tpu.memory_space<vmem>>, vector<1x128xf32>
    %73 = arith.mulf %71, %71 : vector<16x128xf32>
    %cst_28 = arith.constant dense<0.000000e+00> : vector<16xf32>
    %74 = vector.multi_reduction <add>, %73, %cst_28 [1] : vector<16x128xf32> to vector<16xf32>
    %75 = vector.shape_cast %74 : vector<16xf32> to vector<16x1xf32>
    %76 = math.sqrt %75 : vector<16x1xf32>
    %cst_29 = arith.constant 0.0883883461 : f32
    %77 = vector.broadcast %cst_29 : f32 to vector<16x1xf32>
    %78 = arith.mulf %76, %77 : vector<16x1xf32>
    %cst_30 = arith.constant 9.99999993E-9 : f32
    %79 = vector.broadcast %cst_30 : f32 to vector<16x1xf32>
    %80 = arith.maximumf %78, %79 : vector<16x1xf32>
    %cst_31 = arith.constant 1.000000e+00 : f32
    %81 = vector.broadcast %cst_31 : f32 to vector<16x1xf32>
    %82 = arith.divf %81, %80 : vector<16x1xf32>
    %83 = vector.broadcast %82 : vector<16x1xf32> to vector<16x128xf32>
    %84 = arith.mulf %71, %83 : vector<16x128xf32>
    %85 = vector.broadcast %72 : vector<1x128xf32> to vector<16x128xf32>
    %86 = arith.mulf %84, %85 : vector<16x128xf32>
    %87 = arith.truncf %86 : vector<16x128xf32> to vector<16x128xbf16>
    %c0_32 = arith.constant 0 : index
    %c0_33 = arith.constant 0 : index
    %88 = vector.load %arg8[%c0_32, %c0_33] : memref<128x512xbf16, #tpu.memory_space<vmem>>, vector<128x512xbf16>
    %cst_34 = arith.constant dense<0.000000e+00> : vector<16x512xf32>
    %89 = tpu.matmul %87, %88, %cst_34 {dimension_numbers = #tpu.dot_dimension_numbers<[1], [0], [0], [1], [0, 0, 1, 1], [], []>} : vector<16x128xbf16>, vector<128x512xbf16>, vector<16x512xf32> -> vector<16x512xf32>
    %c0_35 = arith.constant 0 : index
    %c0_36 = arith.constant 0 : index
    %90 = vector.load %arg9[%c0_35, %c0_36] : memref<1x512xf32, #tpu.memory_space<vmem>>, vector<1x512xf32>
    %91 = vector.broadcast %90 : vector<1x512xf32> to vector<16x512xf32>
    %92 = arith.addf %89, %91 : vector<16x512xf32>
    %cst_37 = arith.constant 5.000000e-01 : f32
    %93 = vector.broadcast %cst_37 : f32 to vector<16x512xf32>
    %94 = arith.mulf %93, %92 : vector<16x512xf32>
    %cst_38 = arith.constant 0.707106769 : f32
    %95 = vector.broadcast %cst_38 : f32 to vector<16x512xf32>
    %96 = arith.mulf %92, %95 : vector<16x512xf32>
    %cst_39 = arith.constant 0.000000e+00 : f32
    %97 = vector.broadcast %cst_39 : f32 to vector<16x512xf32>
    %98 = arith.cmpf oge, %96, %97 : vector<16x512xf32>
    %cst_40 = arith.constant 1.000000e+00 : f32
    %cst_41 = arith.constant -1.000000e+00 : f32
    %99 = vector.broadcast %cst_40 : f32 to vector<16x512xf32>
    %100 = vector.broadcast %cst_41 : f32 to vector<16x512xf32>
    %101 = arith.select %98, %99, %100 : vector<16x512xi1>, vector<16x512xf32>
    %102 = math.absf %96 : vector<16x512xf32>
    %cst_42 = arith.constant 0.327591091 : f32
    %103 = vector.broadcast %cst_42 : f32 to vector<16x512xf32>
    %104 = arith.mulf %103, %102 : vector<16x512xf32>
    %cst_43 = arith.constant 1.000000e+00 : f32
    %105 = vector.broadcast %cst_43 : f32 to vector<16x512xf32>
    %106 = arith.addf %105, %104 : vector<16x512xf32>
    %107 = tpu.reciprocal %106 {approx = true} : vector<16x512xf32> -> vector<16x512xf32>
    %cst_44 = arith.constant 1.06140542 : f32
    %108 = vector.broadcast %cst_44 : f32 to vector<16x512xf32>
    %109 = arith.mulf %108, %107 : vector<16x512xf32>
    %cst_45 = arith.constant -1.45315206 : f32
    %110 = vector.broadcast %cst_45 : f32 to vector<16x512xf32>
    %111 = arith.addf %109, %110 : vector<16x512xf32>
    %112 = arith.mulf %111, %107 : vector<16x512xf32>
    %cst_46 = arith.constant 1.42141378 : f32
    %113 = vector.broadcast %cst_46 : f32 to vector<16x512xf32>
    %114 = arith.addf %112, %113 : vector<16x512xf32>
    %115 = arith.mulf %114, %107 : vector<16x512xf32>
    %cst_47 = arith.constant -0.284496725 : f32
    %116 = vector.broadcast %cst_47 : f32 to vector<16x512xf32>
    %117 = arith.addf %115, %116 : vector<16x512xf32>
    %118 = arith.mulf %117, %107 : vector<16x512xf32>
    %cst_48 = arith.constant 0.254829586 : f32
    %119 = vector.broadcast %cst_48 : f32 to vector<16x512xf32>
    %120 = arith.addf %118, %119 : vector<16x512xf32>
    %121 = arith.mulf %120, %107 : vector<16x512xf32>
    %cst_49 = arith.constant 0.000000e+00 : f32
    %122 = vector.broadcast %cst_49 : f32 to vector<16x512xf32>
    %123 = arith.subf %122, %102 : vector<16x512xf32>
    %124 = arith.mulf %123, %102 : vector<16x512xf32>
    %125 = math.exp %124 : vector<16x512xf32>
    %126 = arith.mulf %121, %125 : vector<16x512xf32>
    %cst_50 = arith.constant 1.000000e+00 : f32
    %127 = vector.broadcast %cst_50 : f32 to vector<16x512xf32>
    %128 = arith.subf %127, %126 : vector<16x512xf32>
    %129 = arith.mulf %101, %128 : vector<16x512xf32>
    %cst_51 = arith.constant 1.000000e+00 : f32
    %130 = vector.broadcast %cst_51 : f32 to vector<16x512xf32>
    %131 = arith.addf %130, %129 : vector<16x512xf32>
    %132 = arith.mulf %94, %131 : vector<16x512xf32>
    %133 = arith.truncf %132 : vector<16x512xf32> to vector<16x512xbf16>
    %c0_52 = arith.constant 0 : index
    %c0_53 = arith.constant 0 : index
    %134 = vector.load %arg10[%c0_52, %c0_53] : memref<512x128xbf16, #tpu.memory_space<vmem>>, vector<512x128xbf16>
    %cst_54 = arith.constant dense<0.000000e+00> : vector<16x128xf32>
    %135 = tpu.matmul %133, %134, %cst_54 {dimension_numbers = #tpu.dot_dimension_numbers<[1], [0], [0], [1], [0, 0, 1, 1], [], []>} : vector<16x512xbf16>, vector<512x128xbf16>, vector<16x128xf32> -> vector<16x128xf32>
    %c0_55 = arith.constant 0 : index
    %c0_56 = arith.constant 0 : index
    %136 = vector.load %arg11[%c0_55, %c0_56] : memref<1x128xf32, #tpu.memory_space<vmem>>, vector<1x128xf32>
    %137 = vector.broadcast %136 : vector<1x128xf32> to vector<16x128xf32>
    %138 = arith.addf %135, %137 : vector<16x128xf32>
    %139 = arith.addf %67, %138 : vector<16x128xf32>
    %c0_57 = arith.constant 0 : index
    %c0_58 = arith.constant 0 : index
    %c0_59 = arith.constant 0 : index
    %140 = vector.load %arg13[%c0_57, %c0_58, %c0_59] : memref<1x16x128xf32, #tpu.memory_space<vmem>>, vector<1x16x128xf32>
    %141 = vector.shape_cast %140 : vector<1x16x128xf32> to vector<16x128xf32>
    %142 = vector.shape_cast %139 : vector<16x128xf32> to vector<1x16x128xf32>
    tpu.vector_store %arg13[%c0_57, %c0_58, %c0_59], %142 {strides = array<i32>} : memref<1x16x128xf32, #tpu.memory_space<vmem>>, vector<1x16x128xf32>,
    return
  }
  func.func @transform_0(%arg0: i32) -> (i32, i32) {
    %c0_i32 = arith.constant 0 : i32
    %c0_i32_0 = arith.constant 0 : i32
    %c0_i32_1 = arith.constant 0 : i32
    return %c0_i32, %c0_i32_0 : i32, i32
  }
  func.func @transform_1(%arg0: i32) -> (i32, i32, i32) {
    %c0_i32 = arith.constant 0 : i32
    %c0_i32_0 = arith.constant 0 : i32
    %c0_i32_1 = arith.constant 0 : i32
    return %arg0, %c0_i32, %c0_i32_0 : i32, i32, i32
  }
  func.func @transform_2(%arg0: i32) -> (i32, i32) {
    %c0_i32 = arith.constant 0 : i32
    %c0_i32_0 = arith.constant 0 : i32
    %c0_i32_1 = arith.constant 0 : i32
    return %c0_i32, %c0_i32_0 : i32, i32
  }
  func.func @transform_3(%arg0: i32) -> (i32, i32) {
    %c0_i32 = arith.constant 0 : i32
    %c0_i32_0 = arith.constant 0 : i32
    %c0_i32_1 = arith.constant 0 : i32
    return %c0_i32, %c0_i32_0 : i32, i32
  }
  func.func @transform_4(%arg0: i32) -> (i32, i32) {
    %c0_i32 = arith.constant 0 : i32
    %c0_i32_0 = arith.constant 0 : i32
    %c0_i32_1 = arith.constant 0 : i32
    return %c0_i32, %c0_i32_0 : i32, i32
  }
  func.func @transform_5(%arg0: i32) -> (i32, i32) {
    %c0_i32 = arith.constant 0 : i32
    %c0_i32_0 = arith.constant 0 : i32
    %c0_i32_1 = arith.constant 0 : i32
    return %c0_i32, %c0_i32_0 : i32, i32
  }
  func.func @transform_6(%arg0: i32) -> (i32, i32) {
    %c0_i32 = arith.constant 0 : i32
    %c0_i32_0 = arith.constant 0 : i32
    %c0_i32_1 = arith.constant 0 : i32
    return %c0_i32, %c0_i32_0 : i32, i32
  }
  func.func @transform_7(%arg0: i32) -> (i32, i32) {
    %c0_i32 = arith.constant 0 : i32
    %c0_i32_0 = arith.constant 0 : i32
    %c0_i32_1 = arith.constant 0 : i32
    return %c0_i32, %c0_i32_0 : i32, i32
  }
  func.func @transform_8(%arg0: i32) -> (i32, i32) {
    %c0_i32 = arith.constant 0 : i32
    %c0_i32_0 = arith.constant 0 : i32
    %c0_i32_1 = arith.constant 0 : i32
    return %c0_i32, %c0_i32_0 : i32, i32
  }
  func.func @transform_9(%arg0: i32) -> (i32, i32) {
    %c0_i32 = arith.constant 0 : i32
    %c0_i32_0 = arith.constant 0 : i32
    %c0_i32_1 = arith.constant 0 : i32
    return %c0_i32, %c0_i32_0 : i32, i32
  }
  func.func @transform_10(%arg0: i32) -> (i32, i32) {
    %c0_i32 = arith.constant 0 : i32
    %c0_i32_0 = arith.constant 0 : i32
    %c0_i32_1 = arith.constant 0 : i32
    return %c0_i32, %c0_i32_0 : i32, i32
  }
  func.func @transform_11(%arg0: i32) -> (i32, i32) {
    %c0_i32 = arith.constant 0 : i32
    %c0_i32_0 = arith.constant 0 : i32
    %c0_i32_1 = arith.constant 0 : i32
    return %c0_i32, %c0_i32_0 : i32, i32
  }
  func.func @transform_12(%arg0: i32) -> (i32, i32, i32) {
    %c0_i32 = arith.constant 0 : i32
    %c0_i32_0 = arith.constant 0 : i32
    %c0_i32_1 = arith.constant 0 : i32
    return %arg0, %c0_i32, %c0_i32_0 : i32, i32, i32
  }
}

module attributes {stable_mosaic.version = 11 : i64} {
  func.func @_layer_kernel(%arg0: i32, %arg1: memref<64x16xf32, #tpu.memory_space<vmem>>, %arg2: memref<1x16x128xf32, #tpu.memory_space<vmem>>, %arg3: memref<1x128xf32, #tpu.memory_space<vmem>>, %arg4: memref<128x128xbf16, #tpu.memory_space<vmem>>, %arg5: memref<128x64xbf16, #tpu.memory_space<vmem>>, %arg6: memref<128x128xbf16, #tpu.memory_space<vmem>>, %arg7: memref<1x128xf32, #tpu.memory_space<vmem>>, %arg8: memref<128x512xbf16, #tpu.memory_space<vmem>>, %arg9: memref<1x512xf32, #tpu.memory_space<vmem>>, %arg10: memref<512x128xbf16, #tpu.memory_space<vmem>>, %arg11: memref<1x128xf32, #tpu.memory_space<vmem>>, %arg12: memref<1x128xf32, #tpu.memory_space<vmem>>, %arg13: memref<1x16x128xf32, #tpu.memory_space<vmem>>) attributes {dimension_semantics = [#tpu.dimension_semantics<parallel>], iteration_bounds = array<i64: 2>, scalar_prefetch = 0 : i64, scratch_operands = 0 : i64, tpu.core_type = #tpu.core_type<tc>, window_params = [{pipeline_mode = #tpu.pipeline_mode<synchronous>, transform_indices = @transform_0, window_bounds = array<i64: 64, 16>}, {transform_indices = @transform_1, window_bounds = array<i64: 1, 16, 128>}, {pipeline_mode = #tpu.pipeline_mode<synchronous>, transform_indices = @transform_2, window_bounds = array<i64: 1, 128>}, {pipeline_mode = #tpu.pipeline_mode<synchronous>, transform_indices = @transform_3, window_bounds = array<i64: 128, 128>}, {pipeline_mode = #tpu.pipeline_mode<synchronous>, transform_indices = @transform_4, window_bounds = array<i64: 128, 64>}, {pipeline_mode = #tpu.pipeline_mode<synchronous>, transform_indices = @transform_5, window_bounds = array<i64: 128, 128>}, {pipeline_mode = #tpu.pipeline_mode<synchronous>, transform_indices = @transform_6, window_bounds = array<i64: 1, 128>}, {pipeline_mode = #tpu.pipeline_mode<synchronous>, transform_indices = @transform_7, window_bounds = array<i64: 128, 512>}, {pipeline_mode = #tpu.pipeline_mode<synchronous>, transform_indices = @transform_8, window_bounds = array<i64: 1, 512>}, {pipeline_mode = #tpu.pipeline_mode<synchronous>, transform_indices = @transform_9, window_bounds = array<i64: 512, 128>}, {pipeline_mode = #tpu.pipeline_mode<synchronous>, transform_indices = @transform_10, window_bounds = array<i64: 1, 128>}, {pipeline_mode = #tpu.pipeline_mode<synchronous>, transform_indices = @transform_11, window_bounds = array<i64: 1, 128>}, {transform_indices = @transform_12, window_bounds = array<i64: 1, 16, 128>}]} {
    %c0 = arith.constant 0 : index
    %c0_0 = arith.constant 0 : index
    %c0_1 = arith.constant 0 : index
    %0 = vector.load %arg2[%c0, %c0_0, %c0_1] : memref<1x16x128xf32, #tpu.memory_space<vmem>>, vector<1x16x128xf32>
    %1 = vector.shape_cast %0 : vector<1x16x128xf32> to vector<16x128xf32>
    %2 = tpu.iota {dimensions = array<i32: 1>} : vector<16x128xi32>
    %3 = tpu.iota {dimensions = array<i32: 0>} : vector<16x128xi32>
    %c64_i32 = arith.constant 64 : i32
    %4 = vector.broadcast %c64_i32 : i32 to vector<16x128xi32>
    %5 = arith.cmpi slt, %2, %4 : vector<16x128xi32>
    %c0_i32 = arith.constant 0 : i32
    %6 = vector.broadcast %c0_i32 : i32 to vector<16x128xi32>
    %7 = arith.cmpi eq, %3, %6 : vector<16x128xi32>
    %c1_i32 = arith.constant 1 : i32
    %8 = tpu.dynamic_rotate %1 by %c1_i32 dim 0 : vector<16x128xf32>, i32 -> vector<16x128xf32>
    %cst = arith.constant 0.000000e+00 : f32
    %9 = vector.broadcast %cst : f32 to vector<16x128xf32>
    %10 = arith.select %7, %9, %8 : vector<16x128xi1>, vector<16x128xf32>
    %11 = arith.select %5, %1, %10 : vector<16x128xi1>, vector<16x128xf32>
    %c0_2 = arith.constant 0 : index
    %c0_3 = arith.constant 0 : index
    %12 = vector.load %arg3[%c0_2, %c0_3] : memref<1x128xf32, #tpu.memory_space<vmem>>, vector<1x128xf32>
    %13 = arith.mulf %11, %11 : vector<16x128xf32>
    %cst_4 = arith.constant dense<0.000000e+00> : vector<16xf32>
    %14 = vector.multi_reduction <add>, %13, %cst_4 [1] : vector<16x128xf32> to vector<16xf32>
    %15 = vector.shape_cast %14 : vector<16xf32> to vector<16x1xf32>
    %16 = math.sqrt %15 : vector<16x1xf32>
    %cst_5 = arith.constant 0.0883883461 : f32
    %17 = vector.broadcast %cst_5 : f32 to vector<16x1xf32>
    %18 = arith.mulf %16, %17 : vector<16x1xf32>
    %cst_6 = arith.constant 9.99999993E-9 : f32
    %19 = vector.broadcast %cst_6 : f32 to vector<16x1xf32>
    %20 = arith.maximumf %18, %19 : vector<16x1xf32>
    %cst_7 = arith.constant 1.000000e+00 : f32
    %21 = vector.broadcast %cst_7 : f32 to vector<16x1xf32>
    %22 = arith.divf %21, %20 : vector<16x1xf32>
    %23 = vector.broadcast %22 : vector<16x1xf32> to vector<16x128xf32>
    %24 = arith.mulf %11, %23 : vector<16x128xf32>
    %25 = vector.broadcast %12 : vector<1x128xf32> to vector<16x128xf32>
    %26 = arith.mulf %24, %25 : vector<16x128xf32>
    %27 = arith.truncf %26 : vector<16x128xf32> to vector<16x128xbf16>
    %c0_8 = arith.constant 0 : index
    %c0_9 = arith.constant 0 : index
    %28 = vector.load %arg4[%c0_8, %c0_9] : memref<128x128xbf16, #tpu.memory_space<vmem>>, vector<128x128xbf16>
    %cst_10 = arith.constant dense<0.000000e+00> : vector<16x128xf32>
    %29 = tpu.matmul %27, %28, %cst_10 {dimension_numbers = #tpu.dot_dimension_numbers<[1], [0], [0], [1], [0, 0, 1, 1], [], []>} : vector<16x128xbf16>, vector<128x128xbf16>, vector<16x128xf32> -> vector<16x128xf32>
    %c0_11 = arith.constant 0 : index
    %c0_12 = arith.constant 0 : index
    %30 = vector.load %arg5[%c0_11, %c0_12] : memref<128x64xbf16, #tpu.memory_space<vmem>>, vector<128x64xbf16>
    %cst_13 = arith.constant dense<0.000000e+00> : vector<16x64xf32>
    %31 = tpu.matmul %27, %30, %cst_13 {dimension_numbers = #tpu.dot_dimension_numbers<[1], [0], [0], [1], [0, 0, 1, 1], [], []>} : vector<16x128xbf16>, vector<128x64xbf16>, vector<16x64xf32> -> vector<16x64xf32>
    %32 = arith.truncf %29 : vector<16x128xf32> to vector<16x128xbf16>
    %33 = vector.extract_strided_slice %31 {offsets = [0, 0], sizes = [16, 32], strides = [1, 1]} : vector<16x64xf32> to vector<16x32xf32>
    %34 = arith.truncf %33 : vector<16x32xf32> to vector<16x32xbf16>
    %35 = vector.extract_strided_slice %31 {offsets = [0, 32], sizes = [16, 32], strides = [1, 1]} : vector<16x64xf32> to vector<16x32xf32>
    %36 = arith.truncf %35 : vector<16x32xf32> to vector<16x32xbf16>
    %37 = vector.extract_strided_slice %32 {offsets = [0, 0], sizes = [16, 32], strides = [1, 1]} : vector<16x128xbf16> to vector<16x32xbf16>
    %38 = vector.extract_strided_slice %32 {offsets = [0, 32], sizes = [16, 32], strides = [1, 1]} : vector<16x128xbf16> to vector<16x32xbf16>
    %39 = vector.extract_strided_slice %32 {offsets = [0, 64], sizes = [16, 32], strides = [1, 1]} : vector<16x128xbf16> to vector<16x32xbf16>
    %40 = vector.extract_strided_slice %32 {offsets = [0, 96], sizes = [16, 32], strides = [1, 1]} : vector<16x128xbf16> to vector<16x32xbf16>
    %41 = tpu.concatenate %37, %38, %39, %40 in 0 : vector<16x32xbf16>, vector<16x32xbf16>, vector<16x32xbf16>, vector<16x32xbf16> -> vector<64x32xbf16>
    %cst_14 = arith.constant dense<0.000000e+00> : vector<64x16xf32>
    %42 = tpu.matmul %41, %34, %cst_14 {dimension_numbers = #tpu.dot_dimension_numbers<[1], [1], [0], [0], [0, 0, 1, 0], [], []>} : vector<64x32xbf16>, vector<16x32xbf16>, vector<64x16xf32> -> vector<64x16xf32>
    %cst_15 = arith.constant 0.176776692 : f32
    %43 = vector.broadcast %cst_15 : f32 to vector<64x16xf32>
    %44 = arith.mulf %42, %43 : vector<64x16xf32>
    %c0_16 = arith.constant 0 : index
    %c0_17 = arith.constant 0 : index
    %45 = vector.load %arg1[%c0_16, %c0_17] : memref<64x16xf32, #tpu.memory_space<vmem>>, vector<64x16xf32>
    %46 = arith.addf %44, %45 : vector<64x16xf32>
    %cst_18 = arith.constant dense<0xFF800000> : vector<64xf32>
    %47 = vector.multi_reduction <maximumf>, %46, %cst_18 [1] : vector<64x16xf32> to vector<64xf32>
    %48 = vector.shape_cast %47 : vector<64xf32> to vector<64x1xf32>
    %49 = vector.broadcast %48 : vector<64x1xf32> to vector<64x16xf32>
    %50 = arith.subf %46, %49 : vector<64x16xf32>
    %51 = math.exp %50 : vector<64x16xf32>
    %cst_19 = arith.constant dense<0.000000e+00> : vector<64xf32>
    %52 = vector.multi_reduction <add>, %51, %cst_19 [1] : vector<64x16xf32> to vector<64xf32>
    %53 = vector.shape_cast %52 : vector<64xf32> to vector<64x1xf32>
    %54 = tpu.reciprocal %53 {approx = true} : vector<64x1xf32> -> vector<64x1xf32>
    %55 = vector.broadcast %54 : vector<64x1xf32> to vector<64x16xf32>
    %56 = arith.mulf %51, %55 : vector<64x16xf32>
    %57 = arith.truncf %56 : vector<64x16xf32> to vector<64x16xbf16>
    %cst_20 = arith.constant dense<0.000000e+00> : vector<64x32xf32>
    %58 = tpu.matmul %57, %36, %cst_20 {dimension_numbers = #tpu.dot_dimension_numbers<[1], [0], [0], [1], [0, 0, 1, 1], [], []>} : vector<64x16xbf16>, vector<16x32xbf16>, vector<64x32xf32> -> vector<64x32xf32>
    %59 = arith.truncf %58 : vector<64x32xf32> to vector<64x32xbf16>
    %60 = vector.extract_strided_slice %59 {offsets = [0, 0], sizes = [16, 32], strides = [1, 1]} : vector<64x32xbf16> to vector<16x32xbf16>
    %61 = vector.extract_strided_slice %59 {offsets = [16, 0], sizes = [16, 32], strides = [1, 1]} : vector<64x32xbf16> to vector<16x32xbf16>
    %62 = vector.extract_strided_slice %59 {offsets = [32, 0], sizes = [16, 32], strides = [1, 1]} : vector<64x32xbf16> to vector<16x32xbf16>
    %63 = vector.extract_strided_slice %59 {offsets = [48, 0], sizes = [16, 32], strides = [1, 1]} : vector<64x32xbf16> to vector<16x32xbf16>
    %64 = tpu.concatenate %60, %61, %62, %63 in 1 : vector<16x32xbf16>, vector<16x32xbf16>, vector<16x32xbf16>, vector<16x32xbf16> -> vector<16x128xbf16>
    %c0_21 = arith.constant 0 : index
    %c0_22 = arith.constant 0 : index
    %65 = vector.load %arg6[%c0_21, %c0_22] : memref<128x128xbf16, #tpu.memory_space<vmem>>, vector<128x128xbf16>
    %cst_23 = arith.constant dense<0.000000e+00> : vector<16x128xf32>
    %66 = tpu.matmul %64, %65, %cst_23 {dimension_numbers = #tpu.dot_dimension_numbers<[1], [0], [0], [1], [0, 0, 1, 1], [], []>} : vector<16x128xbf16>, vector<128x128xbf16>, vector<16x128xf32> -> vector<16x128xf32>
    %67 = arith.addf %1, %66 : vector<16x128xf32>
    %c1_i32_24 = arith.constant 1 : i32
    %68 = tpu.dynamic_rotate %67 by %c1_i32_24 dim 0 : vector<16x128xf32>, i32 -> vector<16x128xf32>
    %cst_25 = arith.constant 0.000000e+00 : f32
    %69 = vector.broadcast %cst_25 : f32 to vector<16x128xf32>
    %70 = arith.select %7, %69, %68 : vector<16x128xi1>, vector<16x128xf32>
    %71 = arith.select %5, %67, %70 : vector<16x128xi1>, vector<16x128xf32>
    %c0_26 = arith.constant 0 : index
    %c0_27 = arith.constant 0 : index
    %72 = vector.load %arg7[%c0_26, %c0_27] : memref<1x128xf32, #tpu.memory_space<vmem>>, vector<1x128xf32>
    %73 = arith.mulf %71, %71 : vector<16x128xf32>
    %cst_28 = arith.constant dense<0.000000e+00> : vector<16xf32>
    %74 = vector.multi_reduction <add>, %73, %cst_28 [1] : vector<16x128xf32> to vector<16xf32>
    %75 = vector.shape_cast %74 : vector<16xf32> to vector<16x1xf32>
    %76 = math.sqrt %75 : vector<16x1xf32>
    %cst_29 = arith.constant 0.0883883461 : f32
    %77 = vector.broadcast %cst_29 : f32 to vector<16x1xf32>
    %78 = arith.mulf %76, %77 : vector<16x1xf32>
    %cst_30 = arith.constant 9.99999993E-9 : f32
    %79 = vector.broadcast %cst_30 : f32 to vector<16x1xf32>
    %80 = arith.maximumf %78, %79 : vector<16x1xf32>
    %cst_31 = arith.constant 1.000000e+00 : f32
    %81 = vector.broadcast %cst_31 : f32 to vector<16x1xf32>
    %82 = arith.divf %81, %80 : vector<16x1xf32>
    %83 = vector.broadcast %82 : vector<16x1xf32> to vector<16x128xf32>
    %84 = arith.mulf %71, %83 : vector<16x128xf32>
    %85 = vector.broadcast %72 : vector<1x128xf32> to vector<16x128xf32>
    %86 = arith.mulf %84, %85 : vector<16x128xf32>
    %87 = arith.truncf %86 : vector<16x128xf32> to vector<16x128xbf16>
    %c0_32 = arith.constant 0 : index
    %c0_33 = arith.constant 0 : index
    %88 = vector.load %arg8[%c0_32, %c0_33] : memref<128x512xbf16, #tpu.memory_space<vmem>>, vector<128x512xbf16>
    %cst_34 = arith.constant dense<0.000000e+00> : vector<16x512xf32>
    %89 = tpu.matmul %87, %88, %cst_34 {dimension_numbers = #tpu.dot_dimension_numbers<[1], [0], [0], [1], [0, 0, 1, 1], [], []>} : vector<16x128xbf16>, vector<128x512xbf16>, vector<16x512xf32> -> vector<16x512xf32>
    %c0_35 = arith.constant 0 : index
    %c0_36 = arith.constant 0 : index
    %90 = vector.load %arg9[%c0_35, %c0_36] : memref<1x512xf32, #tpu.memory_space<vmem>>, vector<1x512xf32>
    %91 = vector.broadcast %90 : vector<1x512xf32> to vector<16x512xf32>
    %92 = arith.addf %89, %91 : vector<16x512xf32>
    %cst_37 = arith.constant 5.000000e-01 : f32
    %93 = vector.broadcast %cst_37 : f32 to vector<16x512xf32>
    %94 = arith.mulf %93, %92 : vector<16x512xf32>
    %cst_38 = arith.constant 0.707106769 : f32
    %95 = vector.broadcast %cst_38 : f32 to vector<16x512xf32>
    %96 = arith.mulf %92, %95 : vector<16x512xf32>
    %cst_39 = arith.constant 0.000000e+00 : f32
    %97 = vector.broadcast %cst_39 : f32 to vector<16x512xf32>
    %98 = arith.cmpf oge, %96, %97 : vector<16x512xf32>
    %cst_40 = arith.constant 1.000000e+00 : f32
    %cst_41 = arith.constant -1.000000e+00 : f32
    %99 = vector.broadcast %cst_40 : f32 to vector<16x512xf32>
    %100 = vector.broadcast %cst_41 : f32 to vector<16x512xf32>
    %101 = arith.select %98, %99, %100 : vector<16x512xi1>, vector<16x512xf32>
    %102 = math.absf %96 : vector<16x512xf32>
    %cst_42 = arith.constant 0.327591091 : f32
    %103 = vector.broadcast %cst_42 : f32 to vector<16x512xf32>
    %104 = arith.mulf %103, %102 : vector<16x512xf32>
    %cst_43 = arith.constant 1.000000e+00 : f32
    %105 = vector.broadcast %cst_43 : f32 to vector<16x512xf32>
    %106 = arith.addf %105, %104 : vector<16x512xf32>
    %107 = tpu.reciprocal %106 {approx = true} : vector<16x512xf32> -> vector<16x512xf32>
    %cst_44 = arith.constant 1.06140542 : f32
    %108 = vector.broadcast %cst_44 : f32 to vector<16x512xf32>
    %109 = arith.mulf %108, %107 : vector<16x512xf32>
    %cst_45 = arith.constant -1.45315206 : f32
    %110 = vector.broadcast %cst_45 : f32 to vector<16x512xf32>
    %111 = arith.addf %109, %110 : vector<16x512xf32>
    %112 = arith.mulf %111, %107 : vector<16x512xf32>
    %cst_46 = arith.constant 1.42141378 : f32
    %113 = vector.broadcast %cst_46 : f32 to vector<16x512xf32>
    %114 = arith.addf %112, %113 : vector<16x512xf32>
    %115 = arith.mulf %114, %107 : vector<16x512xf32>
    %cst_47 = arith.constant -0.284496725 : f32
    %116 = vector.broadcast %cst_47 : f32 to vector<16x512xf32>
    %117 = arith.addf %115, %116 : vector<16x512xf32>
    %118 = arith.mulf %117, %107 : vector<16x512xf32>
    %cst_48 = arith.constant 0.254829586 : f32
    %119 = vector.broadcast %cst_48 : f32 to vector<16x512xf32>
    %120 = arith.addf %118, %119 : vector<16x512xf32>
    %121 = arith.mulf %120, %107 : vector<16x512xf32>
    %cst_49 = arith.constant 0.000000e+00 : f32
    %122 = vector.broadcast %cst_49 : f32 to vector<16x512xf32>
    %123 = arith.subf %122, %102 : vector<16x512xf32>
    %124 = arith.mulf %123, %102 : vector<16x512xf32>
    %125 = math.exp %124 : vector<16x512xf32>
    %126 = arith.mulf %121, %125 : vector<16x512xf32>
    %cst_50 = arith.constant 1.000000e+00 : f32
    %127 = vector.broadcast %cst_50 : f32 to vector<16x512xf32>
    %128 = arith.subf %127, %126 : vector<16x512xf32>
    %129 = arith.mulf %101, %128 : vector<16x512xf32>
    %cst_51 = arith.constant 1.000000e+00 : f32
    %130 = vector.broadcast %cst_51 : f32 to vector<16x512xf32>
    %131 = arith.addf %130, %129 : vector<16x512xf32>
    %132 = arith.mulf %94, %131 : vector<16x512xf32>
    %133 = arith.truncf %132 : vector<16x512xf32> to vector<16x512xbf16>
    %c0_52 = arith.constant 0 : index
    %c0_53 = arith.constant 0 : index
    %134 = vector.load %arg10[%c0_52, %c0_53] : memref<512x128xbf16, #tpu.memory_space<vmem>>, vector<512x128xbf16>
    %cst_54 = arith.constant dense<0.000000e+00> : vector<16x128xf32>
    %135 = tpu.matmul %133, %134, %cst_54 {dimension_numbers = #tpu.dot_dimension_numbers<[1], [0], [0], [1], [0, 0, 1, 1], [], []>} : vector<16x512xbf16>, vector<512x128xbf16>, vector<16x128xf32> -> vector<16x128xf32>
    %c0_55 = arith.constant 0 : index
    %c0_56 = arith.constant 0 : index
    %136 = vector.load %arg11[%c0_55, %c0_56] : memref<1x128xf32, #tpu.memory_space<vmem>>, vector<1x128xf32>
    %137 = vector.broadcast %136 : vector<1x128xf32> to vector<16x128xf32>
    %138 = arith.addf %135, %137 : vector<16x128xf32>
    %139 = arith.addf %67, %138 : vector<16x128xf32>
    %c0_57 = arith.constant 0 : index
    %c0_58 = arith.constant 0 : index
    %140 = vector.load %arg12[%c0_57, %c0_58] : memref<1x128xf32, #tpu.memory_space<vmem>>, vector<1x128xf32>
    %141 = arith.mulf %139, %139 : vector<16x128xf32>
    %cst_59 = arith.constant dense<0.000000e+00> : vector<16xf32>
    %142 = vector.multi_reduction <add>, %141, %cst_59 [1] : vector<16x128xf32> to vector<16xf32>
    %143 = vector.shape_cast %142 : vector<16xf32> to vector<16x1xf32>
    %144 = math.sqrt %143 : vector<16x1xf32>
    %cst_60 = arith.constant 0.0883883461 : f32
    %145 = vector.broadcast %cst_60 : f32 to vector<16x1xf32>
    %146 = arith.mulf %144, %145 : vector<16x1xf32>
    %cst_61 = arith.constant 9.99999993E-9 : f32
    %147 = vector.broadcast %cst_61 : f32 to vector<16x1xf32>
    %148 = arith.maximumf %146, %147 : vector<16x1xf32>
    %cst_62 = arith.constant 1.000000e+00 : f32
    %149 = vector.broadcast %cst_62 : f32 to vector<16x1xf32>
    %150 = arith.divf %149, %148 : vector<16x1xf32>
    %151 = vector.broadcast %150 : vector<16x1xf32> to vector<16x128xf32>
    %152 = arith.mulf %139, %151 : vector<16x128xf32>
    %153 = vector.broadcast %140 : vector<1x128xf32> to vector<16x128xf32>
    %154 = arith.mulf %152, %153 : vector<16x128xf32>
    %c0_63 = arith.constant 0 : index
    %c0_64 = arith.constant 0 : index
    %c0_65 = arith.constant 0 : index
    %155 = vector.load %arg13[%c0_63, %c0_64, %c0_65] : memref<1x16x128xf32, #tpu.memory_space<vmem>>, vector<1x16x128xf32>
    %156 = vector.shape_cast %155 : vector<1x16x128xf32> to vector<16x128xf32>
    %157 = vector.shape_cast %154 : vector<16x128xf32> to vector<1x16x128xf32>
    tpu.vector_store %arg13[%c0_63, %c0_64, %c0_65], %157 {strides = array<i32>} : memref<1x16x128xf32, #tpu.memory_space<vmem>>, vector<1x16x128xf32>,
    return
  }
  func.func @transform_0(%arg0: i32) -> (i32, i32) {
    %c0_i32 = arith.constant 0 : i32
    %c0_i32_0 = arith.constant 0 : i32
    %c0_i32_1 = arith.constant 0 : i32
    return %c0_i32, %c0_i32_0 : i32, i32
  }
  func.func @transform_1(%arg0: i32) -> (i32, i32, i32) {
    %c0_i32 = arith.constant 0 : i32
    %c0_i32_0 = arith.constant 0 : i32
    %c0_i32_1 = arith.constant 0 : i32
    return %arg0, %c0_i32, %c0_i32_0 : i32, i32, i32
  }
  func.func @transform_2(%arg0: i32) -> (i32, i32) {
    %c0_i32 = arith.constant 0 : i32
    %c0_i32_0 = arith.constant 0 : i32
    %c0_i32_1 = arith.constant 0 : i32
    return %c0_i32, %c0_i32_0 : i32, i32
  }
  func.func @transform_3(%arg0: i32) -> (i32, i32) {
    %c0_i32 = arith.constant 0 : i32
    %c0_i32_0 = arith.constant 0 : i32
    %c0_i32_1 = arith.constant 0 : i32
    return %c0_i32, %c0_i32_0 : i32, i32
  }
  func.func @transform_4(%arg0: i32) -> (i32, i32) {
    %c0_i32 = arith.constant 0 : i32
    %c0_i32_0 = arith.constant 0 : i32
    %c0_i32_1 = arith.constant 0 : i32
    return %c0_i32, %c0_i32_0 : i32, i32
  }
  func.func @transform_5(%arg0: i32) -> (i32, i32) {
    %c0_i32 = arith.constant 0 : i32
    %c0_i32_0 = arith.constant 0 : i32
    %c0_i32_1 = arith.constant 0 : i32
    return %c0_i32, %c0_i32_0 : i32, i32
  }
  func.func @transform_6(%arg0: i32) -> (i32, i32) {
    %c0_i32 = arith.constant 0 : i32
    %c0_i32_0 = arith.constant 0 : i32
    %c0_i32_1 = arith.constant 0 : i32
    return %c0_i32, %c0_i32_0 : i32, i32
  }
  func.func @transform_7(%arg0: i32) -> (i32, i32) {
    %c0_i32 = arith.constant 0 : i32
    %c0_i32_0 = arith.constant 0 : i32
    %c0_i32_1 = arith.constant 0 : i32
    return %c0_i32, %c0_i32_0 : i32, i32
  }
  func.func @transform_8(%arg0: i32) -> (i32, i32) {
    %c0_i32 = arith.constant 0 : i32
    %c0_i32_0 = arith.constant 0 : i32
    %c0_i32_1 = arith.constant 0 : i32
    return %c0_i32, %c0_i32_0 : i32, i32
  }
  func.func @transform_9(%arg0: i32) -> (i32, i32) {
    %c0_i32 = arith.constant 0 : i32
    %c0_i32_0 = arith.constant 0 : i32
    %c0_i32_1 = arith.constant 0 : i32
    return %c0_i32, %c0_i32_0 : i32, i32
  }
  func.func @transform_10(%arg0: i32) -> (i32, i32) {
    %c0_i32 = arith.constant 0 : i32
    %c0_i32_0 = arith.constant 0 : i32
    %c0_i32_1 = arith.constant 0 : i32
    return %c0_i32, %c0_i32_0 : i32, i32
  }
  func.func @transform_11(%arg0: i32) -> (i32, i32) {
    %c0_i32 = arith.constant 0 : i32
    %c0_i32_0 = arith.constant 0 : i32
    %c0_i32_1 = arith.constant 0 : i32
    return %c0_i32, %c0_i32_0 : i32, i32
  }
  func.func @transform_12(%arg0: i32) -> (i32, i32, i32) {
    %c0_i32 = arith.constant 0 : i32
    %c0_i32_0 = arith.constant 0 : i32
    %c0_i32_1 = arith.constant 0 : i32
    return %arg0, %c0_i32, %c0_i32_0 : i32, i32, i32
  }
}

</mosaic_0001>

<bundles_post_ra>
// kernel: transformer_forward.2
= control target key start
LH: loop header
LB: loop body
LE: loop exit
PB: predicated region body
PF: predicated region fallthrough
CT: control target
= control target key end

     0   :  { %17 = vsyncpa [#allocation3], 0  ;;  %s3257_s0 = inlined_call_operand.vmem [shape: f32[64,16], index: 0, kind: input, shape index: {}]   ;;  %s3258_s1 = inlined_call_operand.vmem [shape: f32[2,16,128], index: 1, kind: input, shape index: {}]   ;;  %s3259_s2 = inlined_call_operand.vmem [shape: f32[1,128], index: 2, kind: input, shape index: {}]   ;;  %s3260_s3 = inlined_call_operand.vmem [shape: bf16[128,128], index: 3, kind: input, shape index: {}]   ;;  %s3261_s4 = inlined_call_operand.vmem [shape: bf16[128,64], index: 4, kind: input, shape index: {}]   ;;  %s3262_s5 = inlined_call_operand.hbm [shape: bf16[128,128], index: 5, kind: input, shape index: {}]   ;;  %s3263_s6 = inlined_call_operand.vmem [shape: f32[1,128], index: 6, kind: input, shape index: {}]   ;;  %s3264_s7 = inlined_call_operand.hbm [shape: bf16[128,512], index: 7, kind: input, shape index: {}]   ;;  %s3265_s8 = inlined_call_operand.vmem [shape: f32[1,512], index: 8, kind: input, shape index: {}]   ;;  %s3266_s9 = inlined_call_operand.hbm [shape: bf16[512,128], index: 9, kind: input, shape index: {}]   ;;  %s3267_s10 = inlined_call_operand.vmem [shape: f32[1,128], index: 10, kind: input, shape index: {}]   ;;  %s3268_s11 = inlined_call_operand.vmem [shape: f32[1,128], index: 11, kind: input, shape index: {}]   ;;  %s3269_s12 = inlined_call_operand.vmem [shape: f32[2,16,128], index: 12, kind: output, shape index: {}]  }
   0x1   :  { %18 = vsyncpa [#allocation5], 0  ;;  %s2794_s21 = smov 0  }
   0x2 LB: > { %s352_s24 = sshll.u32 %s3264_s7, 4  ;;  %s2803_s11 = sadd.s32 4294967295, %s2716_s21   ;;  %s2716_s21 = sphi %s2794_s21, %s24_s21   ;;  %s353_s24 = int_to_ptr.hbm [resolvable:$true] %s352_s24 }
   0x3   : > { %p2017_p0 = scmp.ge.s32.totalorder %s2716_s21, 1  ;;  %p312_p1 = scmp.lt.s32.totalorder %s2716_s21, 3 }
   0x4   : > { %p2504_p2 = scmp.eq.s32.totalorder %s2803_s11, 0  ;;  %s2718_s26 = smov [#allocation4]  }
   0x5   : > { %p2808_p3 = pnand %p2017_p0, %p312_p1  ;;  %s354_s27 = sshll.u32 %s2718_s26, 4  ;;  %s355_s27 = int_to_ptr.vmem [resolvable:$true] %s354_s27 }
   0x6   : > { %s335_s30 = sshll.u32 %s3262_s5, 4  ;;  %s2719_s14 = smov [#allocation2]   ;;  %s336_s30 = int_to_ptr.hbm [resolvable:$true] %s335_s30 }
   0x7   : > { %p2494_p4 = pneg %p2808_p3  ;;  %s337_s15 = sshll.u32 %s2719_s14, 4  ;;  %s338_s15 = int_to_ptr.vmem [resolvable:$true] %s337_s15 }
   0x8   : > { %s2720_s16 = smov 256   ;;  %s2721_s17 = smov 16  }
   0x9   : > { %p2819_p5 = pnand %p2504_p2, %p2494_p4  ;;  %s369_s20 = sshll.u32 %s3266_s9, 4  ;;  %s370_s20 = int_to_ptr.hbm [resolvable:$true] %s369_s20 }
   0xa   : > { %s2722_s22 = smov 64   ;;  %s2723_s23 = smov 4  }
   0xb   : > { %2500 = dma.hbm_to_vmem [thread:$0]  (!%p2819_p5), %s353_s24, 4096, %s355_s27, [#allocation5], %s2720_s16, %s2720_s16, %s2721_s17  }
   0xc   : > { %2497 = dma.hbm_to_vmem [thread:$0]  (!%p2819_p5), %s336_s30, 1024, %s338_s15, [#allocation3], %s2722_s22, %s2722_s22, %s2723_s23  }
   0xd   : > { %s2724_s26 = smov [#allocation6]   ;;  %401 = sbr.rel (%p2808_p3) target bundleno = 1796 (0x704), region = 68 }
   0xe   : > { %s371_s28 = sshll.u32 %s2724_s26, 4  ;;  %s372_s28 = int_to_ptr.vmem [resolvable:$true] %s371_s28 }
   0xf   : > { %2503 = dma.hbm_to_vmem [thread:$0]  (!%p2819_p5), %s370_s20, 4096, %s372_s28, [#allocation5], %s2722_s22, %s2722_s22, %s2723_s23  }
  0x12   : > { %2707 = dma.done.wait (%p2504_p2), [#allocation3], 1024  }
  0x13   : > { %2709 = vsyncadd (%p2504_p2), [#allocation3], 4294966272 }
  0x14   : > { %2711 = dma.done.wait (%p2504_p2), [#allocation5], 8192  }
  0x15   : > { %2713 = vsyncadd (%p2504_p2), [#allocation5], 4294959104  ;;  %p454_p6 = scmp.lt.s32.totalorder %s2803_s11, 1  ;;  %v467_v0 = vlaneseq  ;;  %v2401_v14 = vld [vmem:[%s3260_s3 + $0x38] sm:$0xff]  ;;  %v2400_v16 = vld [vmem:[%s3260_s3 + $0x30] sm:$0xff]  ;;  %vm727_vm15 = vcmask 261120  }
  0x16   : > { %v2409_v15 = vld [vmem:[%s3261_s4 + $0x38] sm:$0xff]  ;;  %621 = vmatpush.bf16.msra.mxu0 %v2401_v14  ;;  %v2408_v17 = vld [vmem:[%s3261_s4 + $0x30] sm:$0xff]  ;;  %v2399_v19 = vld [vmem:[%s3260_s3 + $0x28] sm:$0xff]  ;;  %s2725_s14 = smov 32   ;;  %s2726_s15 = smov 96  }
  0x17   : > { %s3273_s11 = smov (!%p454_p6, %s2803_s11), 1  ;;  %v2846_v1 = vshrl.u32 %v467_v0, 7  ;;  %v2854_v2 = vand.u32 127, %v467_v0  ;;  %699 = vmatpush.bf16.msra.mxu1 %v2409_v15  ;;  %v2407_v20 = vld [vmem:[%s3261_s4 + $0x28] sm:$0xff]  ;;  %v2398_v21 = vld [vmem:[%s3260_s3 + $0x20] sm:$0xff]  ;;  %v2397_v23 = vld [vmem:[%s3260_s3 + $0x18] sm:$0xff] }
  0x18   : > { %s2392_s24 = sshll.u32 %s3273_s11, 4  ;;  %v2406_v22 = vld [vmem:[%s3261_s4 + $0x20] sm:$0xff]  ;;  %v2405_v24 = vld [vmem:[%s3261_s4 + $0x18] sm:$0xff]  ;;  %v2396_v29 = vld [vmem:[%s3260_s3 + $0x10] sm:$0xff]  ;;  %s2727_s16 = smov 64  }
  0x19   : > { %s458_s29 = scalar_lea.vmem %s3258_s1, %s2392_s24  ;;  %vm473_vm0 = vcmp.eq.s32.totalorder %v2846_v1, 0  ;;  %vm477_vm1 = vcmp.lt.s32.totalorder %v2846_v1, 1  ;;  %vm472_vm2 = vcmp.lt.s32.totalorder %v2854_v2, 64  ;;  %v2404_v30 = vld [vmem:[%s3261_s4 + $0x10] sm:$0xff]  ;;  %v2395_v33 = vld [vmem:[%s3260_s3 + $0x8] sm:$0xff]  ;;  %v2394_v40 = vld [vmem:[%s3260_s3] sm:$0xff]  ;;  %s463_s25 = scalar_lea.vmem %s3269_s12, %s2392_s24 }
  0x1a   : > { %v2856_v3 = vld [vmem:[%s458_s29] sm:$0xff]  ;;  %v2858_v4 = vld [vmem:[%s458_s29 + $0x8] sm:$0xff]  ;;  %622 = vmatpush.bf16.msra.mxu0 %v2400_v16  ;;  %v2242_v2 = vld [vmem:[#allocation4 + $0xd8] sm:$0xf0] }
  0x1b   : > { %v475_v5 = vrot.slane %v2856_v3, 7  ;;  %v476_v6 = vrot.slane %v2858_v4, 7  ;;  %700 = vmatpush.bf16.msra.mxu1 %v2408_v17  ;;  %v2403_v34 = vld [vmem:[%s3261_s4 + $0x8] sm:$0xff]  ;;  %v2402_v41 = vld [vmem:[%s3261_s4] sm:$0xff] }
  0x1d   : > { %v479_v7 = vsel %vm477_vm1, %v476_v6, %v475_v5  ;;  %v478_v11 = vsel %vm477_vm1, %v475_v5, %v476_v6 }
  0x1e   : > { %v480_v8 = vsel %vm473_vm0, 0.0, %v479_v7  ;;  %v2881_v12 = vsel %vm472_vm2, %v2858_v4, %v478_v11  ;;  %623 = vmatpush.bf16.msra.mxu0 %v2399_v19 }
  0x1f   : > { %v2872_v9 = vsel %vm472_vm2, %v2856_v3, %v480_v8  ;;  %v486_v13 = vmul.f32 %v2881_v12, %v2881_v12  ;;  %701 = vmatpush.bf16.msra.mxu1 %v2407_v20 }
  0x20   : > { %v485_v10 = vmul.f32 %v2872_v9, %v2872_v9 }
  0x22   : > { %487 = vadd.xlane.f32.xlu0 %v485_v10  ;;  %624 = vmatpush.bf16.msra.mxu0 %v2398_v21 }
  0x23   : > { %702 = vmatpush.bf16.msra.mxu1 %v2406_v22 }
  0x26   : > { %625 = vmatpush.bf16.msra.mxu0 %v2397_v23 }
  0x27   : > { %703 = vmatpush.bf16.msra.mxu1 %v2405_v24 }
  0x2a   : > { %489 = vadd.xlane.f32.xlu0 %v486_v13  ;;  %626 = vmatpush.bf16.msra.mxu0 %v2396_v29 }
  0x2b   : > { %704 = vmatpush.bf16.msra.mxu1 %v2404_v30 }
  0x2e   : > { %627 = vmatpush.bf16.msra.mxu0 %v2395_v33 }
  0x2f   : > { %705 = vmatpush.bf16.msra.mxu1 %v2403_v34 }
  0x32   : > { %628 = vmatpush.bf16.msra.mxu0 %v2394_v40 }
  0x33   : > { %706 = vmatpush.bf16.msra.mxu1 %v2402_v41  ;;  %v781_v41 = vld [vmem:[%s3257_s0 + $0x8] sm:$0xff] }
  0x95   : > { %v488_v18 = vpop.xlane.xlu0 %487 }
  0x96   : > { %2532 = vrsqrt.f32 %v488_v18  ;;  %vm498_vm3 = vcmp.eq.f32.partialorder %v488_v18, inf  ;;  %v501_v42 = vand.u32 2147483648, %v488_v18  ;;  %vm500_vm4 = vcmp.eq.f32.partialorder %v488_v18, 0.0 }
  0x9c   : > { %v2533_v25 = vpop.eup %2532 }
  0x9d   : > { %v492_v26 = vmul.f32 %v2533_v25, %v488_v18  ;;  %v490_v27 = vpop.xlane.xlu0 %489 }
  0x9e   : > { %2534 = vrsqrt.f32 %v490_v27  ;;  %vm510_vm5 = vcmp.eq.f32.partialorder %v490_v27, inf  ;;  %v513_v51 = vand.u32 2147483648, %v490_v27  ;;  %vm512_vm6 = vcmp.eq.f32.partialorder %v490_v27, 0.0 }
  0x9f   : > { %v493_v28 = vmul.f32 %v2533_v25, %v492_v26 }
  0xa1   : > { %v494_v31 = vmul.f32 0.5, %v493_v28 }
  0xa3   : > { %v495_v32 = vsub.f32 1.5, %v494_v31 }
  0xa4   : > { %v2535_v35 = vpop.eup %2534 }
  0xa5   : > { %v496_v36 = vmul.f32 %v2533_v25, %v495_v32  ;;  %v504_v37 = vmul.f32 %v2535_v35, %v490_v27 }
  0xa7   : > { %v497_v38 = vmul.f32 %v496_v36, %v488_v18  ;;  %v505_v39 = vmul.f32 %v2535_v35, %v504_v37  ;;  %v780_v36 = vld [vmem:[%s3257_s0] sm:$0xff] }
  0xa9   : > { %v499_v43 = vsel %vm498_vm3, %v488_v18, %v497_v38  ;;  %v506_v44 = vmul.f32 0.5, %v505_v39  ;;  %v2529_v18 = vld [vmem:[%s3259_s2] ss:$0 sm:$0xff]  ;;  %vm796_vm3 = vcmask 130048  }
  0xaa   : > { %v502_v45 = vsel %vm500_vm4, %v501_v42, %v499_v43  ;;  %vm971_vm4 = vcmask 523264  }
  0xab   : > { %v515_v46 = vmul.f32 0.088388346, %v502_v45  ;;  %v507_v47 = vsub.f32 1.5, %v506_v44 }
  0xad   : > { %v517_v48 = vmax.f32 %v515_v46, 1e-08  ;;  %v508_v49 = vmul.f32 %v2535_v35, %v507_v47  ;;  %v782_v47 = vld [vmem:[%s3257_s0 + $0x10] sm:$0xff] }
  0xaf   : > { %2536 = vrcp.f32 %v517_v48  ;;  %v509_v50 = vmul.f32 %v508_v49, %v490_v27  ;;  %v530_v62 = vand.u32 2147483648, %v517_v48  ;;  %vm524_vm8 = vweird.f32 %v517_v48 }
  0xb0   : > { %v528_v63 = vand.u32 2147483647, %v517_v48 }
  0xb1   : > { %v511_v52 = vsel %vm510_vm5, %v490_v27, %v509_v50  ;;  %v531_v7 = vor.u32 1.1754944e-38, %v530_v62  ;;  %v785_v62 = vld [vmem:[%s3257_s0 + $0x28] sm:$0xff]  ;;  %vm974_vm5 = vcmask 785408  }
  0xb2   : > { %v514_v53 = vsel %vm512_vm6, %v513_v51, %v511_v52  ;;  %vm529_vm10 = vcmp.eq.f32.partialorder %v528_v63, 8.507059e+37  ;;  %v783_v52 = vld [vmem:[%s3257_s0 + $0x18] sm:$0xff] }
  0xb3   : > { %v516_v54 = vmul.f32 0.088388346, %v514_v53 }
  0xb5   : > { %v2537_v55 = vpop.eup %2536  ;;  %v518_v56 = vmax.f32 %v516_v54, 1e-08 }
  0xb6   : > { %v520_v57 = vmul.f32 %v2537_v55, %v517_v48  ;;  %vm525_vm7 = vweird.f32 %v2537_v55 }
  0xb7   : > { %2538 = vrcp.f32 %v518_v56  ;;  %vm526_vm9 = vmor %vm524_vm8, %vm525_vm7  ;;  %v545_v8 = vand.u32 2147483648, %v518_v56  ;;  %v543_v11 = vand.u32 2147483647, %v518_v56  ;;  %vm539_vm12 = vweird.f32 %v518_v56 }
  0xb8   : > { %v521_v58 = vsub.f32 1.0, %v520_v57  ;;  %v784_v57 = vld [vmem:[%s3257_s0 + $0x20] sm:$0xff] }
  0xb9   : > { %v546_v15 = vor.u32 1.1754944e-38, %v545_v8  ;;  %vm544_vm14 = vcmp.eq.f32.partialorder %v543_v11, 8.507059e+37  ;;  %v786_v11 = vld [vmem:[%s3257_s0 + $0x30] sm:$0xff] }
  0xba   : > { %v522_v59 = vmul.f32 %v2537_v55, %v521_v58 }
  0xbc   : > { %v523_v60 = vadd.f32 %v2537_v55, %v522_v59 }
  0xbd   : > { %v2539_v61 = vpop.eup %2538 }
  0xbe   : > { %v535_v0 = vmul.f32 %v2539_v61, %v518_v56  ;;  %v527_v5 = vsel %vm526_vm9, %v2537_v55, %v523_v60  ;;  %vm540_vm11 = vweird.f32 %v2539_v61 }
  0xbf   : > { %v532_v13 = vsel %vm529_vm10, %v531_v7, %v527_v5  ;;  %vm541_vm13 = vmor %vm539_vm12, %vm540_vm11 }
  0xc0   : > { %v536_v6 = vsub.f32 1.0, %v535_v0  ;;  %v549_v17 = vmul.f32 %v532_v13, %v2872_v9 }
  0xc2   : > { %v537_v10 = vmul.f32 %v2539_v61, %v536_v6  ;;  %v554_v21 = vmul.f32 %v2529_v18, %v549_v17 }
  0xc4   : > { %v538_v14 = vadd.f32 %v2539_v61, %v537_v10 }
  0xc6   : > { %v542_v16 = vsel %vm541_vm13, %v2539_v61, %v538_v14 }
  0xc7   : > { %v547_v19 = vsel %vm544_vm14, %v546_v15, %v542_v16 }
  0xc8   : > { %v550_v20 = vmul.f32 %v547_v19, %v2881_v12 }
  0xca   : > { %v555_v22 = vmul.f32 %v2529_v18, %v550_v20  ;;  %v787_v20 = vld [vmem:[%s3257_s0 + $0x38] sm:$0xff] }
  0xcc   : > { %v556_v23 = vpack.c.bf16 %v555_v22, %v554_v21 }
  0xce   : > { %629 = vmatmul.bf16.vlgmr.msra.gmra.mxu0 %v556_v23  ;;  %707 = vmatmul.bf16.vlgmr.msra.gmra.mxu1 %v556_v23 }
 0x14b   : > { %v630_v24 = vpop.f32.mrf.mxu0  ;;  %v708_v25 = vpop.f32.mrf.mxu1 }
 0x14c   : > { %v713_v26 = vpack.c.bf16 %v630_v24, %v630_v24 }
 0x14e   : > { %v718_v30 = vunpack.c.l.b16 %v713_v26 }
 0x153   : > { %v632_v27 = vpop.f32.mrf.mxu0  ;;  %v710_v28 = vpop.f32.mrf.mxu1 }
 0x154   : > { %v714_v29 = vpack.c.bf16 %v632_v27, %v632_v27  ;;  %v715_v9 = vpack.c.bf16 %v710_v28, %v708_v25 }
 0x156   : > { %v719_v31 = vunpack.c.l.b16 %v714_v29  ;;  %v741_v32 = vsel %vm727_vm15, %v715_v9, 0 }
 0x157   : > { %750 = vmatpush.bf16.xpose.msra.mxu2 %v741_v32 }
 0x158   : > { %v720_v33 = vpack.c.b16 %v719_v31, %v718_v30 }
 0x15a   : > { %725 = vrot.lane.b32.xlu2 %v720_v33, %s2725_s14  ;;  %721 = vrot.lane.b32.xlu1 %v720_v33, %s2726_s15 }
 0x15e   : > { %2094 = vmatmul.msk.bf16.vlgmr.msra.gmra.mxu2 %vm727_vm15, %v720_v33 }
 0x162   : > { %723 = vrot.lane.b32.xlu1 %v720_v33, %s2727_s16 }
 0x1b4   : > { %v726_v43 = vpop.permute.xlu2 %725 }
 0x1cc   : > { %v722_v12 = vpop.permute.xlu1 %721 }
 0x1cd   : > { %2095 = vmatmul.msk.bf16.gmra.mxu2 %vm727_vm15, %v722_v12 }
 0x1d4   : > { %v724_v34 = vpop.permute.xlu1 %723 }
 0x1dd   : > { %2096 = vmatmul.msk.bf16.gmra.mxu2 %vm727_vm15, %v724_v34 }
 0x1e1   : > { %v752_v35 = vpop.f32.mrf.mxu2 }
 0x1e2   : > { %v772_v37 = vmul.f32 0.17677669, %v752_v35 }
 0x1e4   : > { %v788_v38 = vadd.f32 %v780_v36, %v772_v37 }
 0x1e6   : > { %v797_v39 = vsel %vm796_vm3, %v788_v38, -inf }
 0x1e7   : > { %798 = vmax.xlane.f32.xlu2 %v797_v39 }
 0x1e9   : > { %v754_v40 = vpop.f32.mrf.mxu2 }
 0x1ea   : > { %v773_v42 = vmul.f32 0.17677669, %v754_v40 }
 0x1ec   : > { %v789_v44 = vadd.f32 %v781_v41, %v773_v42 }
 0x1ed   : > { %2097 = vmatmul.msk.bf16.gmra.mxu2 %vm727_vm15, %v726_v43 }
 0x1ee   : > { %v800_v45 = vsel %vm796_vm3, %v789_v44, -inf }
 0x1ef   : > { %801 = vmax.xlane.f32.xlu0 %v800_v45 }
 0x250   : > { %v757_v46 = vpop.f32.mrf.mxu2 }
 0x251   : > { %v774_v48 = vmul.f32 0.17677669, %v757_v46 }
 0x253   : > { %v790_v49 = vadd.f32 %v782_v47, %v774_v48 }
 0x255   : > { %v803_v50 = vsel %vm796_vm3, %v790_v49, -inf }
 0x256   : > { %804 = vmax.xlane.f32.xlu1 %v803_v50 }
 0x258   : > { %v759_v51 = vpop.f32.mrf.mxu2 }
 0x259   : > { %v775_v53 = vmul.f32 0.17677669, %v759_v51 }
 0x25a   : > { %v799_v63 = vpop.xlane.xlu2 %798 }
 0x25b   : > { %v791_v54 = vadd.f32 %v783_v52, %v775_v53  ;;  %v821_v6 = vsub.f32 %v788_v38, %v799_v63 }
 0x25d   : > { %v806_v55 = vsel %vm796_vm3, %v791_v54, -inf  ;;  %v829_v8 = vmul.f32 1.442695, %v821_v6 }
 0x25e   : > { %807 = vmax.xlane.f32.xlu0 %v806_v55 }
 0x25f   : > { %2540 = vpow2.f32 %v829_v8 }
 0x260   : > { %v762_v56 = vpop.f32.mrf.mxu2 }
 0x261   : > { %v776_v58 = vmul.f32 0.17677669, %v762_v56 }
 0x262   : > { %v802_v13 = vpop.xlane.xlu0 %801 }
 0x263   : > { %v792_v59 = vadd.f32 %v784_v57, %v776_v58  ;;  %v822_v16 = vsub.f32 %v789_v44, %v802_v13 }
 0x265   : > { %v809_v60 = vsel %vm796_vm3, %v792_v59, -inf  ;;  %v831_v18 = vmul.f32 1.442695, %v822_v16  ;;  %v2541_v22 = vpop.eup %2540 }
 0x266   : > { %810 = vmax.xlane.f32.xlu0 %v809_v60  ;;  %v845_v24 = vsel %vm796_vm3, %v2541_v22, 0.0 }
 0x267   : > { %2542 = vpow2.f32 %v831_v18 }
 0x268   : > { %v764_v61 = vpop.f32.mrf.mxu2 }
 0x269   : > { %v777_v0 = vmul.f32 0.17677669, %v764_v61 }
 0x26b   : > { %v793_v5 = vadd.f32 %v785_v62, %v777_v0 }
 0x26d   : > { %v812_v7 = vsel %vm796_vm3, %v793_v5, -inf  ;;  %v2543_v26 = vpop.eup %2542 }
 0x26e   : > { %813 = vmax.xlane.f32.xlu0 %v812_v7  ;;  %v848_v27 = vsel %vm796_vm3, %v2543_v26, 0.0 }
 0x26f   : > { %890 = vrot.lane.b32.xlu1 %v715_v9, %s2726_s15 }
 0x270   : > { %v767_v10 = vpop.f32.mrf.mxu2 }
 0x271   : > { %v778_v14 = vmul.f32 0.17677669, %v767_v10 }
 0x273   : > { %v794_v15 = vadd.f32 %v786_v11, %v778_v14 }
 0x275   : > { %v815_v17 = vsel %vm796_vm3, %v794_v15, -inf }
 0x276   : > { %816 = vmax.xlane.f32.xlu0 %v815_v17 }
 0x278   : > { %v769_v19 = vpop.f32.mrf.mxu2 }
 0x279   : > { %v779_v21 = vmul.f32 0.17677669, %v769_v19 }
 0x27b   : > { %v795_v23 = vadd.f32 %v787_v20, %v779_v21 }
 0x27d   : > { %v818_v25 = vsel %vm796_vm3, %v795_v23, -inf }
 0x27e   : > { %846 = vadd.xlane.f32.xlu0 %v845_v24  ;;  %819 = vmax.xlane.f32.xlu2 %v818_v25 }
 0x286   : > { %849 = vadd.xlane.f32.xlu2 %v848_v27 }
 0x2c9   : > { %v805_v28 = vpop.xlane.xlu1 %804 }
 0x2ca   : > { %v823_v29 = vsub.f32 %v790_v49, %v805_v28 }
 0x2cc   : > { %v833_v9 = vmul.f32 1.442695, %v823_v29 }
 0x2ce   : > { %2544 = vpow2.f32 %v833_v9 }
 0x2d1   : > { %v808_v30 = vpop.xlane.xlu0 %807 }
 0x2d2   : > { %v824_v31 = vsub.f32 %v791_v54, %v808_v30 }
 0x2d4   : > { %v2545_v32 = vpop.eup %2544  ;;  %v835_v33 = vmul.f32 1.442695, %v824_v31 }
 0x2d5   : > { %v851_v12 = vsel %vm796_vm3, %v2545_v32, 0.0 }
 0x2d6   : > { %2546 = vpow2.f32 %v835_v33  ;;  %852 = vadd.xlane.f32.xlu0 %v851_v12 }
 0x2d9   : > { %v811_v34 = vpop.xlane.xlu0 %810 }
 0x2da   : > { %v825_v35 = vsub.f32 %v792_v59, %v811_v34  ;;  %v2417_v34 = vld [vmem:[#allocation2 + $0x38] sm:$0xff] }
 0x2db   : > { %1042 = vmatpush.bf16.msrb.mxu0 %v2417_v34  ;;  %v2258_v34 = vld [vmem:[#allocation4 + $0xf8] sm:$0xf0] }
 0x2dc   : > { %v2547_v36 = vpop.eup %2546  ;;  %v837_v37 = vmul.f32 1.442695, %v825_v35 }
 0x2dd   : > { %v854_v38 = vsel %vm796_vm3, %v2547_v36, 0.0 }
 0x2de   : > { %2548 = vpow2.f32 %v837_v37  ;;  %855 = vadd.xlane.f32.xlu2 %v854_v38  ;;  %v2415_v37 = vld [vmem:[#allocation2 + $0x28] sm:$0xff] }
 0x2e1   : > { %v891_v39 = vpop.permute.xlu1 %890  ;;  %v814_v40 = vpop.xlane.xlu0 %813 }
 0x2e2   : > { %v826_v41 = vsub.f32 %v793_v5, %v814_v40  ;;  %912 = vmatpush.bf16.msra.mxu3 %v891_v39 }
 0x2e4   : > { %v2549_v42 = vpop.eup %2548  ;;  %v839_v43 = vmul.f32 1.442695, %v826_v41  ;;  %v2414_v41 = vld [vmem:[#allocation2 + $0x20] sm:$0xff] }
 0x2e5   : > { %v857_v44 = vsel %vm796_vm3, %v2549_v42, 0.0 }
 0x2e6   : > { %2550 = vpow2.f32 %v839_v43  ;;  %858 = vadd.xlane.f32.xlu0 %v857_v44 }
 0x2e9   : > { %v817_v45 = vpop.xlane.xlu0 %816 }
 0x2ea   : > { %v827_v46 = vsub.f32 %v794_v15, %v817_v45 }
 0x2ec   : > { %v2551_v47 = vpop.eup %2550  ;;  %v841_v48 = vmul.f32 1.442695, %v827_v46 }
 0x2ed   : > { %v860_v49 = vsel %vm796_vm3, %v2551_v47, 0.0 }
 0x2ee   : > { %2552 = vpow2.f32 %v841_v48  ;;  %861 = vadd.xlane.f32.xlu2 %v860_v49 }
 0x2f1   : > { %v820_v50 = vpop.xlane.xlu2 %819  ;;  %v847_v54 = vpop.xlane.xlu0 %846 }
 0x2f2   : > { %v828_v51 = vsub.f32 %v795_v23, %v820_v50 }
 0x2f4   : > { %v2553_v52 = vpop.eup %2552  ;;  %v843_v53 = vmul.f32 1.442695, %v828_v51 }
 0x2f5   : > { %v863_v55 = vsel %vm796_vm3, %v2553_v52, 0.0 }
 0x2f6   : > { %2554 = vpow2.f32 %v843_v53  ;;  %864 = vadd.xlane.f32.xlu0 %v863_v55  ;;  %v2412_v53 = vld [vmem:[#allocation2 + $0x10] sm:$0xff]  ;;  %v2410_v55 = vld [vmem:[#allocation2] sm:$0xff] }
 0x2f7   : > { %2556 = vrcp.f32 %v847_v54  ;;  %v2411_v54 = vld [vmem:[#allocation2 + $0x8] sm:$0xff] }
 0x2f9   : > { %v850_v56 = vpop.xlane.xlu2 %849 }
 0x2fa   : > { %2558 = vrcp.f32 %v850_v56 }
 0x2fc   : > { %v2555_v57 = vpop.eup %2554 }
 0x2fd   : > { %v866_v58 = vsel %vm796_vm3, %v2555_v57, 0.0  ;;  %v2557_v59 = vpop.eup %2556 }
 0x2fe   : > { %867 = vadd.xlane.f32.xlu2 %v866_v58  ;;  %v877_v61 = vmul.f32 %v2557_v59, %v2541_v22 }
 0x300   : > { %v2559_v60 = vpop.eup %2558 }
 0x301   : > { %v878_v62 = vmul.f32 %v2559_v60, %v2543_v26 }
 0x303   : > { %v885_v63 = vpack.c.bf16 %v878_v62, %v877_v61 }
 0x305   : > { %2098 = vmatmul.msk.bf16.vlgmr.msra.gmra.mxu3 %vm796_vm3, %v885_v63 }
 0x349   : > { %v853_v0 = vpop.xlane.xlu0 %852 }
 0x34a   : > { %2560 = vrcp.f32 %v853_v0 }
 0x350   : > { %v2561_v6 = vpop.eup %2560 }
 0x351   : > { %v856_v5 = vpop.xlane.xlu2 %855  ;;  %v879_v8 = vmul.f32 %v2561_v6, %v2545_v32 }
 0x352   : > { %2562 = vrcp.f32 %v856_v5 }
 0x358   : > { %v2563_v7 = vpop.eup %2562 }
 0x359   : > { %v880_v10 = vmul.f32 %v2563_v7, %v2547_v36  ;;  %v859_v13 = vpop.xlane.xlu0 %858  ;;  %v2416_v36 = vld [vmem:[#allocation2 + $0x30] sm:$0xff]  ;;  %v2446_v7 = vld [vmem:[#allocation4 + $0xe4] sm:$0xf] }
 0x35a   : > { %2564 = vrcp.f32 %v859_v13  ;;  %1043 = vmatpush.bf16.msrb.mxu0 %v2416_v36  ;;  %v2449_v13 = vld [vmem:[#allocation4 + $0xf4] sm:$0xf0]  ;;  %v2444_v36 = vld [vmem:[#allocation4 + $0xcc] sm:$0xf0] }
 0x35b   : > { %v886_v11 = vpack.c.bf16 %v880_v10, %v879_v8  ;;  %v2250_v8 = vld [vmem:[#allocation4 + $0xf0] sm:$0xf0]  ;;  %v2256_v10 = vld [vmem:[#allocation4 + $0xe8] sm:$0xf] }
 0x35d   : > { %2099 = vmatmul.msk.bf16.gmra.mxu3 %vm796_vm3, %v886_v11  ;;  %v2253_v11 = vor.u32 %v2446_v7, %v2250_v8  ;;  %v2210_v7 = vld [vmem:[#allocation4 + $0x98] sm:$0xf0] }
 0x35e   : > { %1044 = vmatpush.bf16.msrb.mxu0 %v2415_v37  ;;  %v2443_v37 = vld [vmem:[#allocation4 + $0xcc] sm:$0xf] }
 0x35f   : > { %1355 = vmatpush.bf16.msrb.mxu3 %v2253_v11  ;;  %v2426_v11 = vld [vmem:[#allocation4 + $0x44] sm:$0xf] }
 0x360   : > { %v2565_v15 = vpop.eup %2564 }
 0x361   : > { %v862_v14 = vpop.xlane.xlu2 %861  ;;  %v881_v17 = vmul.f32 %v2565_v15, %v2549_v42  ;;  %v2234_v15 = vld [vmem:[#allocation4 + $0xd0] sm:$0xf0] }
 0x362   : > { %2566 = vrcp.f32 %v862_v14  ;;  %1045 = vmatpush.bf16.msrb.mxu0 %v2414_v41  ;;  %v2442_v14 = vld [vmem:[#allocation4 + $0xc4] sm:$0xf]  ;;  %v2218_v41 = vld [vmem:[#allocation4 + $0xb0] sm:$0xf0] }
 0x368   : > { %v2567_v16 = vpop.eup %2566 }
 0x369   : > { %v882_v18 = vmul.f32 %v2567_v16, %v2551_v47  ;;  %v865_v20 = vpop.xlane.xlu0 %864  ;;  %v2257_v16 = vor.u32 %v2449_v13, %v2256_v10  ;;  %v2170_v13 = vld [vmem:[#allocation4 + $0x50] sm:$0xf0] }
 0x36a   : > { %2568 = vrcp.f32 %v865_v20 }
 0x36b   : > { %v887_v19 = vpack.c.bf16 %v882_v18, %v881_v17  ;;  %v2240_v17 = vld [vmem:[#allocation4 + $0xc8] sm:$0xf]  ;;  %v2445_v18 = vld [vmem:[#allocation4 + $0xd4] sm:$0xf0]  ;;  %1369 = vmatpush.bf16.msrb.mxu2 %v2257_v16 }
 0x36c   : > { %v2241_v20 = vor.u32 %v2445_v18, %v2240_v17  ;;  %v2184_v18 = vld [vmem:[#allocation4 + $0x60] sm:$0xf] }
 0x36d   : > { %2100 = vmatmul.msk.bf16.gmra.mxu3 %vm796_vm3, %v887_v19  ;;  %v2237_v19 = vor.u32 %v2442_v14, %v2234_v15  ;;  %v2176_v14 = vld [vmem:[#allocation4 + $0x48] sm:$0xf]  ;;  %v2429_v15 = vld [vmem:[#allocation4 + $0x54] sm:$0xf0] }
 0x36f   : > { %1356 = vmatpush.bf16.msrb.mxu3 %v2237_v19  ;;  %1370 = vmatpush.bf16.msrb.mxu2 %v2241_v20  ;;  %v2432_v19 = vld [vmem:[#allocation4 + $0x6c] sm:$0xf0]  ;;  %v2431_v20 = vld [vmem:[#allocation4 + $0x6c] sm:$0xf] }
 0x370   : > { %v2569_v22 = vpop.eup %2568 }
 0x371   : > { %v868_v21 = vpop.xlane.xlu2 %867  ;;  %v883_v24 = vmul.f32 %v2569_v22, %v2553_v52  ;;  %v2413_v52 = vld [vmem:[#allocation2 + $0x18] sm:$0xff] }
 0x372   : > { %2570 = vrcp.f32 %v868_v21  ;;  %1046 = vmatpush.bf16.msrb.mxu0 %v2413_v52 }
 0x376   : > { %1047 = vmatpush.bf16.msrb.mxu0 %v2412_v53  ;;  %v2437_v53 = vld [vmem:[#allocation4 + $0x94] sm:$0xf0] }
 0x378   : > { %v2571_v23 = vpop.eup %2570 }
 0x379   : > { %v884_v25 = vmul.f32 %v2571_v23, %v2555_v57 }
 0x37a   : > { %1048 = vmatpush.bf16.msrb.mxu0 %v2411_v54 }
 0x37b   : > { %v888_v26 = vpack.c.bf16 %v884_v25, %v883_v24 }
 0x37d   : > { %2101 = vmatmul.msk.bf16.gmra.mxu3 %vm796_vm3, %v888_v26 }
 0x37e   : > { %1049 = vmatpush.bf16.msrb.mxu0 %v2410_v55  ;;  %v2430_v55 = vld [vmem:[#allocation4 + $0x64] sm:$0xf] }
 0x388   : > { %v914_v27 = vpop.f32.mrf.mxu3 }
 0x389   : > { %v934_v57 = vpack.c.bf16 %v914_v27, %v914_v27 }
 0x38b   : > { %v944_v59 = vunpack.c.l.b16 %v934_v57  ;;  %v2192_v57 = vld [vmem:[#allocation4 + $0x68] sm:$0xf] }
 0x390   : > { %v916_v28 = vpop.f32.mrf.mxu3 }
 0x391   : > { %v935_v56 = vpack.c.bf16 %v916_v28, %v916_v28 }
 0x393   : > { %v945_v58 = vunpack.c.l.b16 %v935_v56  ;;  %v2186_v56 = vld [vmem:[#allocation4 + $0x70] sm:$0xf0] }
 0x395   : > { %v946_v61 = vpack.c.b16 %v945_v58, %v944_v59  ;;  %v2433_v58 = vld [vmem:[#allocation4 + $0x74] sm:$0xf0]  ;;  %v2439_v59 = vld [vmem:[#allocation4 + $0xac] sm:$0xf] }
 0x396   : > { %v2193_v10 = vor.u32 %v2433_v58, %v2192_v57  ;;  %v2136_v57 = vld [vmem:[#allocation4] sm:$0xf]  ;;  %v2420_v58 = vld [vmem:[#allocation4 + $0xc] sm:$0xf0] }
 0x3e0   : > { %v919_v29 = vpop.f32.mrf.mxu3 }
 0x3e1   : > { %v936_v9 = vpack.c.bf16 %v919_v29, %v919_v29 }
 0x3e3   : > { %v949_v32 = vunpack.c.l.b16 %v936_v9 }
 0x3e8   : > { %v921_v30 = vpop.f32.mrf.mxu3 }
 0x3e9   : > { %v937_v31 = vpack.c.bf16 %v921_v30, %v921_v30 }
 0x3eb   : > { %v950_v33 = vunpack.c.l.b16 %v937_v31  ;;  %v2248_v31 = vld [vmem:[#allocation4 + $0xe0] sm:$0xf] }
 0x3ed   : > { %v951_v12 = vpack.c.b16 %v950_v33, %v949_v32  ;;  %v2448_v32 = vld [vmem:[#allocation4 + $0xec] sm:$0xf0]  ;;  %v2447_v33 = vld [vmem:[#allocation4 + $0xec] sm:$0xf] }
 0x3ee   : > { %v2261_v1 = vor.u32 %v2447_v33, %v2258_v34  ;;  %v2178_v34 = vld [vmem:[#allocation4 + $0x58] sm:$0xf0] }
 0x3ef   : > { %952 = vrot.lane.b32.xlu1 %v951_v12, %s2725_s14  ;;  %v2249_v12 = vor.u32 %v2448_v32, %v2248_v31  ;;  %v2168_v31 = vld [vmem:[#allocation4 + $0x40] sm:$0xf]  ;;  %v2428_v32 = vld [vmem:[#allocation4 + $0x4c] sm:$0xf0] }
 0x3f0   : > { %v924_v35 = vpop.f32.mrf.mxu3  ;;  %1383 = vmatpush.bf16.msra.mxu0 %v2261_v1 }
 0x3f1   : > { %v938_v38 = vpack.c.bf16 %v924_v35, %v924_v35  ;;  %1341 = vmatpush.bf16.msrb.mxu1 %v2249_v12  ;;  %v2232_v35 = vld [vmem:[#allocation4 + $0xc0] sm:$0xf]  ;;  %v2427_v12 = vld [vmem:[#allocation4 + $0x4c] sm:$0xf] }
 0x3f3   : > { %v956_v42 = vunpack.c.l.b16 %v938_v38  ;;  %v2233_v38 = vor.u32 %v2444_v36, %v2232_v35 }
 0x3f5   : > { %1342 = vmatpush.bf16.msrb.mxu1 %v2233_v38 }
 0x3f8   : > { %v926_v39 = vpop.f32.mrf.mxu3 }
 0x3f9   : > { %v939_v40 = vpack.c.bf16 %v926_v39, %v926_v39  ;;  %v2245_v39 = vor.u32 %v2443_v37, %v2242_v2  ;;  %v2169_v2 = vor.u32 %v2428_v32, %v2168_v31 }
 0x3fb   : > { %v957_v43 = vunpack.c.l.b16 %v939_v40  ;;  %v2438_v40 = vld [vmem:[#allocation4 + $0xa4] sm:$0xf]  ;;  %1384 = vmatpush.bf16.msra.mxu0 %v2245_v39 }
 0x3fc   : > { %v2418_v39 = vld [vmem:[#allocation4 + $0x4] sm:$0xf] }
 0x3fd   : > { %v958_v44 = vpack.c.b16 %v957_v43, %v956_v42  ;;  %v2224_v42 = vld [vmem:[#allocation4 + $0xa8] sm:$0xf]  ;;  %v2221_v43 = vor.u32 %v2438_v40, %v2218_v41  ;;  %v2138_v40 = vld [vmem:[#allocation4 + $0x10] sm:$0xf0]  ;;  %v2152_v41 = vld [vmem:[#allocation4 + $0x20] sm:$0xf] }
 0x3ff   : > { %959 = vrot.lane.b32.xlu0 %v958_v44, %s2727_s16  ;;  %v2441_v44 = vld [vmem:[#allocation4 + $0xb4] sm:$0xf0]  ;;  %1357 = vmatpush.bf16.msrb.mxu3 %v2221_v43  ;;  %v2181_v43 = vor.u32 %v2427_v12, %v2178_v34 }
 0x400   : > { %v929_v45 = vpop.f32.mrf.mxu3 }
 0x401   : > { %v940_v46 = vpack.c.bf16 %v929_v45, %v929_v45  ;;  %v2216_v45 = vld [vmem:[#allocation4 + $0xa0] sm:$0xf] }
 0x403   : > { %v963_v49 = vunpack.c.l.b16 %v940_v46  ;;  %v2440_v46 = vld [vmem:[#allocation4 + $0xac] sm:$0xf0] }
 0x408   : > { %v931_v47 = vpop.f32.mrf.mxu3 }
 0x409   : > { %v941_v48 = vpack.c.bf16 %v931_v47, %v931_v47  ;;  %v2225_v47 = vor.u32 %v2441_v44, %v2224_v42  ;;  %v2424_v44 = vld [vmem:[#allocation4 + $0x2c] sm:$0xf0] }
 0x40b   : > { %v964_v50 = vunpack.c.l.b16 %v941_v48  ;;  %v2434_v48 = vld [vmem:[#allocation4 + $0x84] sm:$0xf]  ;;  %1371 = vmatpush.bf16.msrb.mxu2 %v2225_v47 }
 0x40d   : > { %v965_v51 = vpack.c.b16 %v964_v50, %v963_v49  ;;  %v2202_v49 = vld [vmem:[#allocation4 + $0x90] sm:$0xf0]  ;;  %v2208_v50 = vld [vmem:[#allocation4 + $0x88] sm:$0xf] }
 0x40e   : > { %v2205_v52 = vor.u32 %v2434_v48, %v2202_v49  ;;  %v2209_v54 = vor.u32 %v2437_v53, %v2208_v50  ;;  %v2423_v48 = vld [vmem:[#allocation4 + $0x2c] sm:$0xf]  ;;  %v2162_v49 = vld [vmem:[#allocation4 + $0x38] sm:$0xf0]  ;;  %v2153_v53 = vor.u32 %v2424_v44, %v2152_v41  ;;  %v3049_v44 = vld [vmem:[%s3265_s8] sm:$0xf] }
 0x40f   : > { %966 = vrot.lane.b32.xlu2 %v965_v51, %s2726_s15  ;;  %v2217_v51 = vor.u32 %v2440_v46, %v2216_v45  ;;  %v2144_v45 = vld [vmem:[#allocation4 + $0x8] sm:$0xf]  ;;  %v2421_v46 = vld [vmem:[#allocation4 + $0x14] sm:$0xf0] }
 0x410   : > { %1358 = vmatpush.bf16.msrb.mxu3 %v2205_v52  ;;  %1372 = vmatpush.bf16.msrb.mxu2 %v2209_v54  ;;  %v2145_v54 = vor.u32 %v2421_v46, %v2144_v45  ;;  %v1173_v45 = vperm.slane %v3049_v44, 0  ;;  %v1176_v46 = vperm.slane %v3049_v44, 3 }
 0x411   : > { %1343 = vmatpush.bf16.msrb.mxu1 %v2217_v51  ;;  %v2141_v51 = vor.u32 %v2418_v39, %v2138_v40 }
 0x414   : > { %1373 = vmatpush.bf16.msrb.mxu2 %v2193_v10 }
 0x461   : > { %v953_v60 = vpop.permute.xlu1 %952 }
 0x462   : > { %v970_v62 = vsel %vm727_vm15, %v946_v61, %v953_v60  ;;  %v2226_v60 = vld [vmem:[#allocation4 + $0xb8] sm:$0xf0] }
 0x463   : > { %v2229_v61 = vor.u32 %v2439_v59, %v2226_v60  ;;  %v2419_v60 = vld [vmem:[#allocation4 + $0xc] sm:$0xf] }
 0x465   : > { %1385 = vmatpush.bf16.msra.mxu0 %v2229_v61  ;;  %v2146_v61 = vld [vmem:[#allocation4 + $0x18] sm:$0xf0] }
 0x469   : > { %v967_v0 = vpop.permute.xlu2 %966 }
 0x471   : > { %v960_v63 = vpop.permute.xlu0 %959 }
 0x472   : > { %v973_v5 = vsel %vm971_vm4, %v970_v62, %v960_v63  ;;  %v2200_v62 = vld [vmem:[#allocation4 + $0x80] sm:$0xf] }
 0x473   : > { %v976_v6 = vsel %vm974_vm5, %v973_v5, %v967_v0  ;;  %v2189_v0 = vor.u32 %v2430_v55, %v2186_v56  ;;  %v2436_v5 = vld [vmem:[#allocation4 + $0x8c] sm:$0xf0]  ;;  %v2165_v56 = vor.u32 %v2423_v48, %v2162_v49 }
 0x474   : > { %1050 = vmatmul.bf16.vlgmr.msrb.gmra.mxu0 %v976_v6  ;;  %v2435_v6 = vld [vmem:[#allocation4 + $0x8c] sm:$0xf]  ;;  %v2201_v16 = vor.u32 %v2436_v5, %v2200_v62  ;;  %v2137_v5 = vor.u32 %v2420_v58, %v2136_v57 }
 0x475   : > { %v2213_v17 = vor.u32 %v2435_v6, %v2210_v7  ;;  %1359 = vmatpush.bf16.msrb.mxu3 %v2189_v0  ;;  %v2149_v7 = vor.u32 %v2419_v60, %v2146_v61 }
 0x476   : > { %1344 = vmatpush.bf16.msrb.mxu1 %v2201_v16 }
 0x477   : > { %1386 = vmatpush.bf16.msra.mxu0 %v2213_v17 }
 0x4f1   : > { %v1051_v21 = vpop.f32.mrf.mxu0 }
 0x4f2   : > { %v2996_v22 = vadd.f32 %v1051_v21, %v2856_v3  ;;  %v2173_v21 = vor.u32 %v2426_v11, %v2170_v13 }
 0x4f4   : > { %v1058_v25 = vrot.slane %v2996_v22, 7  ;;  %1360 = vmatpush.bf16.msrb.mxu3 %v2173_v21 }
 0x4f9   : > { %v1053_v23 = vpop.f32.mrf.mxu0 }
 0x4fa   : > { %v2999_v24 = vadd.f32 %v1053_v23, %v2858_v4  ;;  %v2194_v23 = vld [vmem:[#allocation4 + $0x78] sm:$0xf0] }
 0x4fc   : > { %v1059_v26 = vrot.slane %v2999_v24, 7 }
 0x4fe   : > { %v1060_v27 = vsel %vm477_vm1, %v1058_v25, %v1059_v26  ;;  %v1061_v28 = vsel %vm477_vm1, %v1059_v26, %v1058_v25  ;;  %v2177_v25 = vor.u32 %v2429_v15, %v2176_v14  ;;  %v2422_v26 = vld [vmem:[#allocation4 + $0x24] sm:$0xf] }
 0x4ff   : > { %v3010_v29 = vsel %vm472_vm2, %v2999_v24, %v1060_v27  ;;  %v1062_v3 = vsel %vm473_vm0, 0.0, %v1061_v28  ;;  %v2154_v27 = vld [vmem:[#allocation4 + $0x30] sm:$0xf0]  ;;  %v2185_v28 = vor.u32 %v2432_v19, %v2184_v18 }
 0x500   : > { %v1068_v4 = vmul.f32 %v3010_v29, %v3010_v29  ;;  %v3019_v9 = vsel %vm472_vm2, %v2996_v22, %v1062_v3  ;;  %v2160_v3 = vld [vmem:[#allocation4 + $0x28] sm:$0xf]  ;;  %v2157_v36 = vor.u32 %v2422_v26, %v2154_v27  ;;  %1374 = vmatpush.bf16.msrb.mxu2 %v2177_v25 }
 0x501   : > { %v1067_v30 = vmul.f32 %v3019_v9, %v3019_v9  ;;  %1345 = vmatpush.bf16.msrb.mxu1 %v2185_v28 }
 0x502   : > { %1071 = vadd.xlane.f32.xlu0 %v1068_v4  ;;  %v2197_v4 = vor.u32 %v2431_v20, %v2194_v23  ;;  %1361 = vmatpush.bf16.msrb.mxu3 %v2157_v36  ;;  %v2530_v36 = vld [vmem:[%s3263_s6] ss:$0 sm:$0xff] }
 0x503   : > { %1069 = vadd.xlane.f32.xlu1 %v1067_v30  ;;  %v2425_v30 = vld [vmem:[#allocation4 + $0x34] sm:$0xf0] }
 0x504   : > { %v2161_v38 = vor.u32 %v2425_v30, %v2160_v3  ;;  %1387 = vmatpush.bf16.msra.mxu0 %v2197_v4 }
 0x505   : > { %1346 = vmatpush.bf16.msrb.mxu1 %v2169_v2 }
 0x506   : > { %1375 = vmatpush.bf16.msrb.mxu2 %v2161_v38  ;;  %1362 = vmatpush.bf16.msrb.mxu3 %v2141_v51 }
 0x508   : > { %1388 = vmatpush.bf16.msra.mxu0 %v2181_v43 }
 0x509   : > { %1347 = vmatpush.bf16.msrb.mxu1 %v2153_v53 }
 0x50a   : > { %1376 = vmatpush.bf16.msrb.mxu2 %v2145_v54 }
 0x50c   : > { %1389 = vmatpush.bf16.msra.mxu0 %v2165_v56 }
 0x50d   : > { %1348 = vmatpush.bf16.msrb.mxu1 %v2137_v5 }
 0x510   : > { %1390 = vmatpush.bf16.msra.mxu0 %v2149_v7 }
 0x575   : > { %v3023_v63 = vpop.xlane.xlu0 %1071 }
 0x576   : > { %2572 = vrsqrt.f32 %v3023_v63  ;;  %v3026_v8 = vpop.xlane.xlu1 %1069  ;;  %vm1092_vm0 = vcmp.eq.f32.partialorder %v3023_v63, inf  ;;  %v1095_v10 = vand.u32 2147483648, %v3023_v63  ;;  %vm1094_vm1 = vcmp.eq.f32.partialorder %v3023_v63, 0.0 }
 0x577   : > { %2574 = vrsqrt.f32 %v3026_v8  ;;  %vm1080_vm2 = vcmp.eq.f32.partialorder %v3026_v8, inf  ;;  %v1083_v14 = vand.u32 2147483648, %v3026_v8  ;;  %vm1082_vm6 = vcmp.eq.f32.partialorder %v3026_v8, 0.0 }
 0x57c   : > { %v2573_v33 = vpop.eup %2572 }
 0x57d   : > { %v2575_v1 = vpop.eup %2574  ;;  %v1086_v35 = vmul.f32 %v2573_v33, %v3023_v63 }
 0x57e   : > { %v1074_v37 = vmul.f32 %v2575_v1, %v3026_v8 }
 0x57f   : > { %v1087_v42 = vmul.f32 %v2573_v33, %v1086_v35 }
 0x580   : > { %v1075_v47 = vmul.f32 %v2575_v1, %v1074_v37 }
 0x581   : > { %v1088_v50 = vmul.f32 0.5, %v1087_v42 }
 0x582   : > { %v1076_v52 = vmul.f32 0.5, %v1075_v47 }
 0x583   : > { %v1089_v55 = vsub.f32 1.5, %v1088_v50  ;;  %v1174_v50 = vperm.slane %v3049_v44, 1 }
 0x584   : > { %v1077_v59 = vsub.f32 1.5, %v1076_v52  ;;  %v1175_v52 = vperm.slane %v3049_v44, 2  ;;  %v2471_v44 = vld [vmem:[#allocation6 + $0xa8] sm:$0xff] }
 0x585   : > { %v1090_v62 = vmul.f32 %v2573_v33, %v1089_v55 }
 0x586   : > { %v1078_v0 = vmul.f32 %v2575_v1, %v1077_v59 }
 0x587   : > { %v1091_v6 = vmul.f32 %v1090_v62, %v3023_v63 }
 0x588   : > { %v1079_v11 = vmul.f32 %v1078_v0, %v3026_v8 }
 0x589   : > { %v1093_v13 = vsel %vm1092_vm0, %v3023_v63, %v1091_v6 }
 0x58a   : > { %v1096_v15 = vsel %vm1094_vm1, %v1095_v10, %v1093_v13  ;;  %v1081_v16 = vsel %vm1080_vm2, %v3026_v8, %v1079_v11 }
 0x58b   : > { %v1098_v17 = vmul.f32 0.088388346, %v1096_v15  ;;  %v1084_v18 = vsel %vm1082_vm6, %v1083_v14, %v1081_v16 }
 0x58c   : > { %v1097_v19 = vmul.f32 0.088388346, %v1084_v18 }
 0x58d   : > { %v1100_v20 = vmax.f32 %v1098_v17, 1e-08 }
 0x58e   : > { %v1099_v21 = vmax.f32 %v1097_v19, 1e-08 }
 0x58f   : > { %2576 = vrcp.f32 %v1100_v20  ;;  %v1127_v3 = vand.u32 2147483648, %v1100_v20  ;;  %v1125_v8 = vand.u32 2147483647, %v1100_v20  ;;  %vm1121_vm9 = vweird.f32 %v1100_v20 }
 0x590   : > { %2578 = vrcp.f32 %v1099_v21  ;;  %v1112_v4 = vand.u32 2147483648, %v1099_v21  ;;  %v1110_v32 = vand.u32 2147483647, %v1099_v21  ;;  %vm1106_vm10 = vweird.f32 %v1099_v21 }
 0x591   : > { %v1128_v34 = vor.u32 1.1754944e-38, %v1127_v3  ;;  %vm1126_vm13 = vcmp.eq.f32.partialorder %v1125_v8, 8.507059e+37 }
 0x592   : > { %v1113_v1 = vor.u32 1.1754944e-38, %v1112_v4  ;;  %vm1111_vm14 = vcmp.eq.f32.partialorder %v1110_v32, 8.507059e+37 }
 0x595   : > { %v2577_v23 = vpop.eup %2576 }
 0x596   : > { %v2579_v63 = vpop.eup %2578  ;;  %v1117_v25 = vmul.f32 %v2577_v23, %v1100_v20  ;;  %vm1122_vm7 = vweird.f32 %v2577_v23  ;;  %v2457_v20 = vld [vmem:[#allocation6 + $0x38] sm:$0xff] }
 0x597   : > { %v1102_v26 = vmul.f32 %v2579_v63, %v1099_v21  ;;  %vm1107_vm8 = vweird.f32 %v2579_v63  ;;  %vm1123_vm11 = vmor %vm1121_vm9, %vm1122_vm7  ;;  %1869 = vmatpush.bf16.msra.mxu1 %v2457_v20 }
 0x598   : > { %v1118_v27 = vsub.f32 1.0, %v1117_v25  ;;  %vm1108_vm12 = vmor %vm1106_vm10, %vm1107_vm8 }
 0x599   : > { %v1103_v28 = vsub.f32 1.0, %v1102_v26 }
 0x59a   : > { %v1119_v30 = vmul.f32 %v2577_v23, %v1118_v27  ;;  %v2481_v27 = vld [vmem:[#allocation6 + $0xf8] sm:$0xff] }
 0x59b   : > { %v1104_v31 = vmul.f32 %v2579_v63, %v1103_v28  ;;  %1911 = vmatpush.bf16.msrb.mxu0 %v2481_v27 }
 0x59c   : > { %v1120_v33 = vadd.f32 %v2577_v23, %v1119_v30  ;;  %v2456_v30 = vld [vmem:[#allocation6 + $0x30] sm:$0xff] }
 0x59d   : > { %v1105_v12 = vadd.f32 %v2579_v63, %v1104_v31  ;;  %1870 = vmatpush.bf16.msra.mxu1 %v2456_v30  ;;  %v2463_v30 = vld [vmem:[#allocation6 + $0x68] sm:$0xff] }
 0x59e   : > { %v1124_v35 = vsel %vm1123_vm11, %v2577_v23, %v1120_v33 }
 0x59f   : > { %v1109_v37 = vsel %vm1108_vm12, %v2579_v63, %v1105_v12  ;;  %v1129_v38 = vsel %vm1126_vm13, %v1128_v34, %v1124_v35  ;;  %v2480_v34 = vld [vmem:[#allocation6 + $0xf0] sm:$0xff]  ;;  %v2473_v35 = vld [vmem:[#allocation6 + $0xb8] sm:$0xff] }
 0x5a0   : > { %v1114_v2 = vsel %vm1111_vm14, %v1113_v1, %v1109_v37  ;;  %v1132_v39 = vmul.f32 %v1129_v38, %v3010_v29  ;;  %v2465_v1 = vld [vmem:[#allocation6 + $0x78] sm:$0xff]  ;;  %1912 = vmatpush.bf16.msrb.mxu0 %v2480_v34  ;;  %1897 = vmatpush.bf16.msra.mxu2 %v2473_v35 }
 0x5a1   : > { %v1131_v40 = vmul.f32 %v1114_v2, %v3019_v9  ;;  %1883 = vmatpush.bf16.msra.mxu3 %v2465_v1 }
 0x5a2   : > { %v1137_v41 = vmul.f32 %v2530_v36, %v1132_v39 }
 0x5a3   : > { %v1136_v42 = vmul.f32 %v2530_v36, %v1131_v40 }
 0x5a5   : > { %v1138_v43 = vpack.c.bf16 %v1137_v41, %v1136_v42 }
 0x5a7   : > { %1349 = vmatmul.bf16.vlgmr.msrb.gmra.mxu1 %v1138_v43  ;;  %1363 = vmatmul.bf16.vlgmr.msrb.gmra.mxu3 %v1138_v43 }
 0x5a8   : > { %1377 = vmatmul.bf16.vlgmr.msrb.gmra.mxu2 %v1138_v43  ;;  %1391 = vmatmul.bf16.vlgmr.msra.gmra.mxu0 %v1138_v43 }
 0x624   : > { %v1350_v47 = vpop.f32.mrf.mxu1 }
 0x625   : > { %v3053_v29 = vadd.f32 %v1350_v47, %v1173_v45  ;;  %v1392_v9 = vpop.f32.mrf.mxu0 }
 0x626   : > { %v3055_v48 = vadd.f32 %v1392_v9, %v1176_v46 }
 0x627   : > { %v3058_v49 = vmul.f32 0.70710677, %v3053_v29 }
 0x628   : > { %v3062_v51 = vmul.f32 0.70710677, %v3055_v48 }
 0x629   : > { %v3066_v53 = vand.u32 2147483647, %v3058_v49  ;;  %vm1413_vm15 = vcmp.ge.f32.partialorder %v3058_v49, 0.0 }
 0x62a   : > { %v3069_v54 = vand.u32 2147483647, %v3062_v51  ;;  %v1364_v55 = vpop.f32.mrf.mxu3  ;;  %vm1416_vm3 = vcmp.ge.f32.partialorder %v3062_v51, 0.0 }
 0x62b   : > { %v1437_v56 = vmul.f32 0.3275911, %v3066_v53  ;;  %v3072_v57 = vadd.f32 %v1364_v55, %v1174_v50  ;;  %v1378_v58 = vpop.f32.mrf.mxu2  ;;  %v1533_v37 = vsub.f32 0.0, %v3066_v53 }
 0x62c   : > { %v1440_v59 = vmul.f32 0.3275911, %v3069_v54  ;;  %v3077_v60 = vadd.f32 %v1378_v58, %v1175_v52  ;;  %v1352_v7 = vpop.f32.mrf.mxu1  ;;  %v1536_v43 = vsub.f32 0.0, %v3069_v54  ;;  %v2479_v58 = vld [vmem:[#allocation6 + $0xe8] sm:$0xff] }
 0x62d   : > { %v1445_v61 = vadd.f32 1.0, %v1437_v56  ;;  %v3080_v62 = vmul.f32 0.70710677, %v3072_v57  ;;  %v1394_v10 = vpop.f32.mrf.mxu0  ;;  %v3092_v14 = vadd.f32 %v1352_v7, %v1173_v45  ;;  %1913 = vmatpush.bf16.msrb.mxu0 %v2479_v58  ;;  %v2470_v58 = vld [vmem:[#allocation6 + $0xa0] sm:$0xff] }
 0x62e   : > { %v1448_v0 = vadd.f32 1.0, %v1440_v59  ;;  %v3083_v5 = vmul.f32 0.70710677, %v3077_v60  ;;  %v3094_v15 = vadd.f32 %v1394_v10, %v1176_v46  ;;  %v2455_v46 = vld [vmem:[#allocation6 + $0x28] sm:$0xff]  ;;  %v2464_v59 = vld [vmem:[#allocation6 + $0x70] sm:$0xff] }
 0x62f   : > { %2580 = vrcp.f32 %v1445_v61  ;;  %v3086_v6 = vand.u32 2147483647, %v3080_v62  ;;  %v3098_v18 = vmul.f32 0.70710677, %v3092_v14  ;;  %v3133_v61 = vmul.f32 0.5, %v3053_v29  ;;  %1871 = vmatpush.bf16.msra.mxu1 %v2455_v46  ;;  %1884 = vmatpush.bf16.msra.mxu3 %v2464_v59  ;;  %v2478_v29 = vld [vmem:[#allocation6 + $0xe0] sm:$0xff] }
 0x630   : > { %2582 = vrcp.f32 %v1448_v0  ;;  %v3090_v13 = vand.u32 2147483647, %v3083_v5  ;;  %v3106_v25 = vmul.f32 0.70710677, %v3094_v15  ;;  %v1541_v0 = vmul.f32 %v1533_v37, %v3066_v53  ;;  %v2453_v46 = vld [vmem:[#allocation6 + $0x18] sm:$0xff] }
 0x631   : > { %v1438_v11 = vmul.f32 0.3275911, %v3086_v6  ;;  %v3110_v3 = vand.u32 2147483647, %v3098_v18  ;;  %v1544_v53 = vmul.f32 %v1536_v43, %v3069_v54  ;;  %1914 = vmatpush.bf16.msrb.mxu0 %v2478_v29  ;;  %vm1417_vm4 = vcmp.ge.f32.partialorder %v3098_v18, 0.0 }
 0x632   : > { %v1439_v17 = vmul.f32 0.3275911, %v3090_v13  ;;  %v1366_v26 = vpop.f32.mrf.mxu3  ;;  %v3117_v12 = vand.u32 2147483647, %v3106_v25  ;;  %vm1414_vm5 = vcmp.ge.f32.partialorder %v3080_v62, 0.0  ;;  %vm1420_vm0 = vcmp.ge.f32.partialorder %v3106_v25, 0.0 }
 0x633   : > { %v1446_v16 = vadd.f32 1.0, %v1438_v11  ;;  %v1441_v31 = vmul.f32 0.3275911, %v3110_v3  ;;  %v3113_v32 = vadd.f32 %v1366_v26, %v1174_v50  ;;  %v1380_v56 = vpop.f32.mrf.mxu2  ;;  %v2472_v11 = vld [vmem:[#allocation6 + $0xb0] sm:$0xff]  ;;  %v1534_v26 = vsub.f32 0.0, %v3086_v6  ;;  %1885 = vmatpush.bf16.msra.mxu3 %v2463_v30  ;;  %v2469_v30 = vld [vmem:[#allocation6 + $0x98] sm:$0xff] }
 0x634   : > { %v1447_v63 = vadd.f32 1.0, %v1439_v17  ;;  %v1444_v41 = vmul.f32 0.3275911, %v3117_v12  ;;  %v3139_v17 = vmul.f32 0.5, %v3055_v48  ;;  %v3146_v27 = vadd.f32 %v1380_v56, %v1175_v52  ;;  %1898 = vmatpush.bf16.msra.mxu2 %v2472_v11  ;;  %v2462_v56 = vld [vmem:[#allocation6 + $0x60] sm:$0xff] }
 0x635   : > { %v3100_v19 = vpop.eup %2580  ;;  %2584 = vrcp.f32 %v1446_v16  ;;  %v1449_v2 = vadd.f32 1.0, %v1441_v31  ;;  %v3127_v45 = vmul.f32 0.70710677, %v3113_v32  ;;  %v1549_v31 = vmul.f32 1.442695, %v1541_v0 }
 0x636   : > { %v3102_v21 = vpop.eup %2582  ;;  %v1461_v23 = vmul.f32 1.0614054, %v3100_v19  ;;  %2586 = vrcp.f32 %v1447_v63  ;;  %v1452_v55 = vadd.f32 1.0, %v1444_v41  ;;  %v1555_v37 = vmul.f32 1.442695, %v1544_v53 }
 0x637   : > { %v1464_v28 = vmul.f32 1.0614054, %v3102_v21  ;;  %2588 = vrcp.f32 %v1449_v2  ;;  %v1540_v2 = vsub.f32 0.0, %v3117_v12  ;;  %1886 = vmatpush.bf16.msra.mxu3 %v2462_v56  ;;  %vm1418_vm1 = vcmp.ge.f32.partialorder %v3127_v45, 0.0 }
 0x638   : > { %v1469_v4 = vadd.f32 -1.4531521, %v1461_v23  ;;  %2590 = vrcp.f32 %v1452_v55  ;;  %v2454_v23 = vld [vmem:[#allocation6 + $0x20] sm:$0xff]  ;;  %1899 = vmatpush.bf16.msra.mxu2 %v2471_v44  ;;  %vm1415_vm2 = vcmp.ge.f32.partialorder %v3083_v5, 0.0 }
 0x639   : > { %v1472_v8 = vadd.f32 -1.4531521, %v1464_v28  ;;  %1872 = vmatpush.bf16.msra.mxu1 %v2454_v23  ;;  %2592 = vpow2.f32 %v1549_v31  ;;  %v2728_v23 = vmov -1.0  }
 0x63a   : > { %v1477_v33 = vmul.f32 %v3100_v19, %v1469_v4  ;;  %v3151_v4 = vand.u32 2147483647, %v3127_v45  ;;  %v3175_v29 = vsel %vm1413_vm15, 1.0, %v2728_v23  ;;  %v1428_v25 = vsel %vm1420_vm0, 1.0, %v2728_v23 }
 0x63b   : > { %v3119_v36 = vpop.eup %2584  ;;  %v1480_v38 = vmul.f32 %v3102_v21, %v1472_v8  ;;  %v1398_v45 = vmul.f32 0.5, %v3072_v57 }
 0x63c   : > { %v1485_v39 = vadd.f32 1.4214138, %v1477_v33  ;;  %v1462_v40 = vmul.f32 1.0614054, %v3119_v36  ;;  %v3129_v47 = vpop.eup %2586  ;;  %v1537_v33 = vsub.f32 0.0, %v3110_v3  ;;  %1900 = vmatpush.bf16.msra.mxu2 %v2470_v58 }
 0x63d   : > { %v1488_v42 = vadd.f32 1.4214138, %v1480_v38  ;;  %v1463_v10 = vmul.f32 1.0614054, %v3129_v47  ;;  %v3153_v8 = vpop.eup %2588  ;;  %v1442_v35 = vmul.f32 0.3275911, %v3151_v4  ;;  %v1542_v38 = vmul.f32 %v1534_v26, %v3086_v6  ;;  %1873 = vmatpush.bf16.msra.mxu1 %v2453_v46 }
 0x63e   : > { %v1493_v9 = vmul.f32 %v3100_v19, %v1485_v39  ;;  %v1470_v50 = vadd.f32 -1.4531521, %v1462_v40  ;;  %v1465_v1 = vmul.f32 1.0614054, %v3153_v8  ;;  %v3163_v39 = vmul.f32 0.70710677, %v3146_v27  ;;  %v3165_v40 = vpop.eup %2590 }
 0x63f   : > { %v1496_v7 = vmul.f32 %v3102_v21, %v1488_v42  ;;  %v1471_v54 = vadd.f32 -1.4531521, %v1463_v10  ;;  %v1450_v43 = vadd.f32 1.0, %v1442_v35  ;;  %v1468_v55 = vmul.f32 1.0614054, %v3165_v40  ;;  %v2477_v6 = vld [vmem:[#allocation6 + $0xd8] sm:$0xff]  ;;  %v2593_v44 = vpop.eup %2592 }
 0x640   : > { %v1501_v16 = vadd.f32 -0.28449672, %v1493_v9  ;;  %v1478_v20 = vmul.f32 %v3119_v36, %v1470_v50  ;;  %v1473_v42 = vadd.f32 -1.4531521, %v1465_v1  ;;  %v1545_v50 = vmul.f32 %v1537_v33, %v3110_v3  ;;  %v2452_v10 = vld [vmem:[#allocation6 + $0x10] sm:$0xff]  ;;  %1915 = vmatpush.bf16.msrb.mxu0 %v2477_v6  ;;  %v2475_v35 = vld [vmem:[#allocation6 + $0xc8] sm:$0xff]  ;;  %1901 = vmatpush.bf16.msra.mxu2 %v2469_v30 }
 0x641   : > { %v1504_v63 = vadd.f32 -0.28449672, %v1496_v7  ;;  %v1479_v9 = vmul.f32 %v3129_v47, %v1471_v54  ;;  %2594 = vrcp.f32 %v1450_v43  ;;  %v1551_v11 = vmul.f32 1.442695, %v1542_v38  ;;  %v2476_v3 = vld [vmem:[#allocation6 + $0xd0] sm:$0xff]  ;;  %1874 = vmatpush.bf16.msra.mxu1 %v2452_v10 }
 0x642   : > { %v1509_v48 = vmul.f32 %v3100_v19, %v1501_v16  ;;  %v1486_v28 = vadd.f32 1.4214138, %v1478_v20  ;;  %v1481_v7 = vmul.f32 %v3153_v8, %v1473_v42  ;;  %2596 = vpow2.f32 %v1555_v37  ;;  %v2460_v42 = vld [vmem:[#allocation6 + $0x50] sm:$0xff] }
 0x643   : > { %v1512_v52 = vmul.f32 %v3102_v21, %v1504_v63  ;;  %v1476_v16 = vadd.f32 -1.4531521, %v1468_v55  ;;  %v1548_v20 = vmul.f32 %v1540_v2, %v3117_v12  ;;  %v1487_v26 = vadd.f32 1.4214138, %v1479_v9  ;;  %v2461_v12 = vld [vmem:[#allocation6 + $0x58] sm:$0xff]  ;;  %v2468_v55 = vld [vmem:[#allocation6 + $0x90] sm:$0xff] }
 0x644   : > { %v1494_v34 = vmul.f32 %v3119_v36, %v1486_v28  ;;  %v1517_v41 = vadd.f32 0.2548296, %v1509_v48  ;;  %v1489_v53 = vadd.f32 1.4214138, %v1481_v7  ;;  %v1557_v48 = vmul.f32 1.442695, %v1545_v50  ;;  %1916 = vmatpush.bf16.msrb.mxu0 %v2476_v3  ;;  %1887 = vmatpush.bf16.msra.mxu3 %v2461_v12 }
 0x645   : > { %v1520_v59 = vadd.f32 0.2548296, %v1512_v52  ;;  %v1484_v28 = vmul.f32 %v3165_v40, %v1476_v16  ;;  %v3184_v33 = vand.u32 2147483647, %v3163_v39  ;;  %2598 = vpow2.f32 %v1551_v11  ;;  %v2474_v16 = vld [vmem:[#allocation6 + $0xc0] sm:$0xff]  ;;  %1902 = vmatpush.bf16.msra.mxu2 %v2468_v55 }
 0x646   : > { %v1502_v0 = vadd.f32 -0.28449672, %v1494_v34  ;;  %v1525_v63 = vmul.f32 %v3100_v19, %v1517_v41  ;;  %v1497_v49 = vmul.f32 %v3153_v8, %v1489_v53  ;;  %v2451_v19 = vld [vmem:[#allocation6 + $0x8] sm:$0xff]  ;;  %v1535_v52 = vsub.f32 0.0, %v3090_v13 }
 0x647   : > { %v1528_v31 = vmul.f32 %v3102_v21, %v1520_v59  ;;  %v1492_v34 = vadd.f32 1.4214138, %v1484_v28  ;;  %v1563_v1 = vmul.f32 1.442695, %v1548_v20  ;;  %v3187_v37 = vpop.eup %2594  ;;  %v1538_v2 = vsub.f32 0.0, %v3151_v4  ;;  %1875 = vmatpush.bf16.msra.mxu1 %v2451_v19  ;;  %v2459_v53 = vld [vmem:[#allocation6 + $0x48] sm:$0xff] }
 0x648   : > { %v1510_v54 = vmul.f32 %v3119_v36, %v1502_v0  ;;  %v1565_v21 = vmul.f32 %v2593_v44, %v1525_v63  ;;  %v1505_v38 = vadd.f32 -0.28449672, %v1497_v49  ;;  %v1443_v41 = vmul.f32 0.3275911, %v3184_v33  ;;  %v2597_v43 = vpop.eup %2596  ;;  %v2450_v0 = vld [vmem:[#allocation6] sm:$0xff]  ;;  %1917 = vmatpush.bf16.msrb.mxu0 %v2475_v35  ;;  %1888 = vmatpush.bf16.msra.mxu3 %v2460_v42 }
 0x649   : > { %v1495_v46 = vmul.f32 %v3129_v47, %v1487_v26  ;;  %2600 = vpow2.f32 %v1557_v48  ;;  %v1500_v9 = vmul.f32 %v3165_v40, %v1492_v34  ;;  %v1466_v50 = vmul.f32 1.0614054, %v3187_v37  ;;  %v2467_v26 = vld [vmem:[#allocation6 + $0x88] sm:$0xff] }
 0x64a   : > { %v1568_v6 = vmul.f32 %v2597_v43, %v1528_v31  ;;  %v1518_v56 = vadd.f32 0.2548296, %v1510_v54  ;;  %v1513_v58 = vmul.f32 %v3153_v8, %v1505_v38  ;;  %v1451_v59 = vadd.f32 1.0, %v1443_v41  ;;  %1903 = vmatpush.bf16.msra.mxu2 %v2467_v26 }
 0x64b   : > { %v1424_v7 = vsel %vm1416_vm3, 1.0, %v2728_v23  ;;  %v1508_v10 = vadd.f32 -0.28449672, %v1500_v9  ;;  %2602 = vpow2.f32 %v1563_v1  ;;  %v1474_v11 = vadd.f32 -1.4531521, %v1466_v50  ;;  %v2599_v48 = vpop.eup %2598  ;;  %1876 = vmatpush.bf16.msra.mxu1 %v2450_v0  ;;  %v2458_v1 = vld [vmem:[#allocation6 + $0x40] sm:$0xff] }
 0x64c   : > { %v1573_v20 = vsub.f32 1.0, %v1565_v21  ;;  %v1521_v3 = vadd.f32 0.2548296, %v1513_v58  ;;  %v1546_v63 = vmul.f32 %v1538_v2, %v3151_v4  ;;  %2604 = vrcp.f32 %v1451_v59  ;;  %1918 = vmatpush.bf16.msrb.mxu0 %v2474_v16  ;;  %1889 = vmatpush.bf16.msra.mxu3 %v2459_v53 }
 0x64d   : > { %v1503_v28 = vadd.f32 -0.28449672, %v1495_v46  ;;  %v1516_v51 = vmul.f32 %v3165_v40, %v1508_v10  ;;  %v1482_v12 = vmul.f32 %v3187_v37, %v1474_v11  ;;  %v1576_v30 = vsub.f32 1.0, %v1568_v6 }
 0x64e   : > { %v1543_v31 = vmul.f32 %v1535_v52, %v3090_v13  ;;  %v1529_v54 = vmul.f32 %v3153_v8, %v1521_v3  ;;  %v1526_v49 = vmul.f32 %v3119_v36, %v1518_v56  ;;  %v1401_v19 = vmul.f32 0.5, %v3092_v14  ;;  %v2466_v8 = vld [vmem:[#allocation6 + $0x80] sm:$0xff] }
 0x64f   : > { %v2601_v4 = vpop.eup %2600  ;;  %v1524_v44 = vadd.f32 0.2548296, %v1516_v51  ;;  %v1490_v34 = vadd.f32 1.4214138, %v1482_v12  ;;  %v1581_v35 = vmul.f32 %v1573_v20, %v3175_v29  ;;  %v1425_v21 = vsel %vm1417_vm4, 1.0, %v2728_v23  ;;  %1904 = vmatpush.bf16.msra.mxu2 %v2466_v8 }
 0x650   : > { %v1569_v13 = vmul.f32 %v2601_v4, %v1529_v54  ;;  %v1559_v52 = vmul.f32 1.442695, %v1546_v63  ;;  %v1511_v36 = vmul.f32 %v3129_v47, %v1503_v28  ;;  %v1584_v29 = vmul.f32 %v1576_v30, %v1424_v7  ;;  %1890 = vmatpush.bf16.msra.mxu3 %v2458_v1 }
 0x651   : > { %v2603_v38 = vpop.eup %2602  ;;  %v1532_v14 = vmul.f32 %v3165_v40, %v1524_v44  ;;  %v1498_v2 = vmul.f32 %v3187_v37, %v1490_v34  ;;  %v1553_v42 = vmul.f32 1.442695, %v1543_v31  ;;  %v1539_v18 = vsub.f32 0.0, %v3184_v33 }
 0x652   : > { %v3215_v41 = vpop.eup %2604  ;;  %v1577_v43 = vsub.f32 1.0, %v1569_v13  ;;  %v1566_v46 = vmul.f32 %v2599_v48, %v1526_v49  ;;  %v1589_v6 = vadd.f32 1.0, %v1581_v35  ;;  %2606 = vpow2.f32 %v1559_v52 }
 0x653   : > { %v1572_v9 = vmul.f32 %v2603_v38, %v1532_v14  ;;  %v1506_v50 = vadd.f32 -0.28449672, %v1498_v2  ;;  %v1467_v55 = vmul.f32 1.0614054, %v3215_v41  ;;  %v1519_v40 = vadd.f32 0.2548296, %v1511_v36 }
 0x654   : > { %v1585_v56 = vmul.f32 %v1577_v43, %v1425_v21  ;;  %v1592_v7 = vadd.f32 1.0, %v1584_v29  ;;  %2608 = vpow2.f32 %v1553_v42  ;;  %v1547_v11 = vmul.f32 %v1539_v18, %v3184_v33 }
 0x655   : > { %v1580_v58 = vsub.f32 1.0, %v1572_v9  ;;  %v1514_v59 = vmul.f32 %v3187_v37, %v1506_v50  ;;  %v1475_v0 = vadd.f32 -1.4531521, %v1467_v55  ;;  %v1574_v16 = vsub.f32 1.0, %v1566_v46 }
 0x656   : > { %v1593_v10 = vadd.f32 1.0, %v1585_v56  ;;  %v1597_v53 = vmul.f32 %v1589_v6, %v3133_v61  ;;  %v1422_v26 = vsel %vm1414_vm5, 1.0, %v2728_v23  ;;  %v1404_v28 = vmul.f32 0.5, %v3094_v15 }
 0x657   : > { %v1588_v20 = vmul.f32 %v1580_v58, %v1428_v25  ;;  %v1522_v3 = vadd.f32 0.2548296, %v1514_v59  ;;  %v1483_v63 = vmul.f32 %v3215_v41, %v1475_v0  ;;  %v1527_v51 = vmul.f32 %v3129_v47, %v1519_v40 }
 0x658   : > { %v1601_v48 = vmul.f32 %v1593_v10, %v1401_v19  ;;  %v2607_v31 = vpop.eup %2606  ;;  %v1600_v54 = vmul.f32 %v1592_v7, %v3139_v17  ;;  %v1561_v61 = vmul.f32 1.442695, %v1547_v11  ;;  %v1582_v49 = vmul.f32 %v1574_v16, %v1422_v26 }
 0x659   : > { %v1596_v12 = vadd.f32 1.0, %v1588_v20  ;;  %v1530_v30 = vmul.f32 %v3187_v37, %v1522_v3  ;;  %v1491_v33 = vadd.f32 1.4214138, %v1483_v63  ;;  %v1426_v37 = vsel %vm1418_vm1, 1.0, %v2728_v23 }
 0x65a   : > { %v1605_v4 = vpack.c.bf16 %v1601_v48, %v1597_v53  ;;  %v2609_v34 = vpop.eup %2608  ;;  %2610 = vpow2.f32 %v1561_v61  ;;  %v1590_v21 = vadd.f32 1.0, %v1582_v49  ;;  %v1402_v8 = vmul.f32 0.5, %v3113_v32 }
 0x65b   : > { %v1604_v44 = vmul.f32 %v1596_v12, %v1404_v28  ;;  %v1570_v62 = vmul.f32 %v2607_v31, %v1530_v30  ;;  %v1499_v19 = vmul.f32 %v3215_v41, %v1491_v33  ;;  %v1567_v15 = vmul.f32 %v2609_v34, %v1527_v51 }
 0x65c   : > { %1877 = vmatmul.bf16.vlgmr.msra.gmra.mxu1 %v1605_v4  ;;  %v1598_v14 = vmul.f32 %v1590_v21, %v1398_v45  ;;  %v1423_v43 = vsel %vm1415_vm2, 1.0, %v2728_v23  ;;  %vm1419_vm6 = vcmp.ge.f32.partialorder %v3163_v39, 0.0  ;;  %v1399_v55 = vmul.f32 0.5, %v3077_v60  ;;  %v2531_v39 = vld [vmem:[%s3267_s10] ss:$0 sm:$0xff] }
 0x65d   : > { %v1608_v47 = vpack.c.bf16 %v1604_v44, %v1600_v54  ;;  %v1578_v1 = vsub.f32 1.0, %v1570_v62  ;;  %v1507_v35 = vadd.f32 -0.28449672, %v1499_v19  ;;  %v1575_v52 = vsub.f32 1.0, %v1567_v15 }
 0x65e   : > { %v1427_v5 = vsel %vm1419_vm6, 1.0, %v2728_v23  ;;  %v1403_v6 = vmul.f32 0.5, %v3146_v27 }
 0x65f   : > { %v1586_v17 = vmul.f32 %v1578_v1, %v1426_v37  ;;  %v1515_v13 = vmul.f32 %v3215_v41, %v1507_v35  ;;  %1919 = vmatmul.bf16.vlgmr.msrb.gmra.mxu0 %v1608_v47  ;;  %v1583_v18 = vmul.f32 %v1575_v52, %v1423_v43 }
 0x660   : > { %v2611_v42 = vpop.eup %2610 }
 0x661   : > { %v1594_v38 = vadd.f32 1.0, %v1586_v17  ;;  %v1523_v36 = vadd.f32 0.2548296, %v1515_v13  ;;  %v1591_v50 = vadd.f32 1.0, %v1583_v18 }
 0x663   : > { %v1602_v2 = vmul.f32 %v1594_v38, %v1402_v8  ;;  %v1531_v29 = vmul.f32 %v3215_v41, %v1523_v36  ;;  %v1599_v41 = vmul.f32 %v1591_v50, %v1399_v55 }
 0x665   : > { %v1606_v46 = vpack.c.bf16 %v1602_v2, %v1598_v14  ;;  %v1571_v9 = vmul.f32 %v2611_v42, %v1531_v29 }
 0x667   : > { %v1579_v57 = vsub.f32 1.0, %v1571_v9  ;;  %1891 = vmatmul.bf16.vlgmr.msra.gmra.mxu3 %v1606_v46 }
 0x669   : > { %v1587_v32 = vmul.f32 %v1579_v57, %v1427_v5 }
 0x66b   : > { %v1595_v56 = vadd.f32 1.0, %v1587_v32 }
 0x66d   : > { %v1603_v25 = vmul.f32 %v1595_v56, %v1403_v6 }
 0x66f   : > { %v1607_v40 = vpack.c.bf16 %v1603_v25, %v1599_v41 }
 0x671   : > { %1905 = vmatmul.bf16.vlgmr.msra.gmra.mxu2 %v1607_v40 }
 0x6d9   : > { %v1878_v58 = vpop.f32.mrf.mxu1 }
 0x6da   : > { %v1879_v0 = vadd.f32 %v2531_v39, %v1878_v58 }
 0x6dc   : > { %v1920_v7 = vpop.f32.mrf.mxu0 }
 0x6e1   : > { %v1880_v10 = vpop.f32.mrf.mxu1 }
 0x6e2   : > { %v1881_v27 = vadd.f32 %v2531_v39, %v1880_v10 }
 0x6e4   : > { %v1922_v48 = vpop.f32.mrf.mxu0 }
 0x6ea   : > { %v1892_v59 = vpop.f32.mrf.mxu3 }
 0x6eb   : > { %v1893_v23 = vadd.f32 %v1892_v59, %v1879_v0 }
 0x6f2   : > { %v1894_v16 = vpop.f32.mrf.mxu3 }
 0x6f3   : > { %v1895_v63 = vadd.f32 %v1894_v16, %v1881_v27 }
 0x6f4   : > { %v1906_v11 = vpop.f32.mrf.mxu2 }
 0x6f5   : > { %v1907_v60 = vadd.f32 %v1906_v11, %v1893_v23 }
 0x6f7   : > { %v1921_v20 = vadd.f32 %v1920_v7, %v1907_v60 }
 0x6f9   : > { %v1925_v3 = vadd.f32 %v1921_v20, %v2996_v22 }
 0x6fb   : > { %1927 = vst [vmem:[%s463_s25] sm:$0xff] %v1925_v3 }
 0x6fc   : > { %v1908_v53 = vpop.f32.mrf.mxu2 }
 0x6fd   : > { %v1909_v26 = vadd.f32 %v1908_v53, %v1895_v63 }
 0x6ff   : > { %v1923_v28 = vadd.f32 %v1922_v48, %v1909_v26 }
 0x701   : > { %v1926_v51 = vadd.f32 %v1923_v28, %v2999_v24 }
 0x703   : > { %1928 = vst [vmem:[%s463_s25 + $0x8] sm:$0xff] %v1926_v51 }
 0x704 PF: > { %s24_s21 = sadd.s32 1, %s2716_s21  }
 0x705   : > { %p21_p7 = scmp.ge.s32.totalorder %s24_s21, 4  }
 0x707   :  { %23 = sbr.rel (!%p21_p7) target bundleno = 2 (0x2), region = 111 }
 0x70c   :  { %1950 = vsyncpa [#allocation3], 1 }
 0x70d   :  { %1952 = vsyncpa [#allocation3 + $0x1], 1 }
 0x70e   :  { %1953 = vsyncpa [#allocation5], 1 }

// kernel: transformer_forward.3
= control target key start
LH: loop header
LB: loop body
LE: loop exit
PB: predicated region body
PF: predicated region fallthrough
CT: control target
= control target key end

     0   :  { %s3525_s0 = inlined_call_operand.vmem [shape: f32[64,16], index: 0, kind: input, shape index: {}]   ;;  %s3526_s1 = inlined_call_operand.vmem [shape: f32[2,16,128], index: 1, kind: input, shape index: {}]   ;;  %s3527_s2 = inlined_call_operand.vmem [shape: f32[1,128], index: 2, kind: input, shape index: {}]   ;;  %s3528_s3 = inlined_call_operand.vmem [shape: bf16[128,128], index: 3, kind: input, shape index: {}]   ;;  %s3529_s4 = inlined_call_operand.vmem [shape: bf16[128,64], index: 4, kind: input, shape index: {}]   ;;  %s3530_s5 = inlined_call_operand.hbm [shape: bf16[128,128], index: 5, kind: input, shape index: {}]   ;;  %s3531_s6 = inlined_call_operand.vmem [shape: f32[1,128], index: 6, kind: input, shape index: {}]   ;;  %s3532_s7 = inlined_call_operand.hbm [shape: bf16[128,512], index: 7, kind: input, shape index: {}]   ;;  %s3533_s8 = inlined_call_operand.vmem [shape: f32[1,512], index: 8, kind: input, shape index: {}]   ;;  %s3534_s9 = inlined_call_operand.hbm [shape: bf16[512,128], index: 9, kind: input, shape index: {}]   ;;  %s3535_s10 = inlined_call_operand.vmem [shape: f32[1,128], index: 10, kind: input, shape index: {}]   ;;  %s3536_s11 = inlined_call_operand.vmem [shape: f32[1,128], index: 11, kind: input, shape index: {}]   ;;  %s3537_s12 = inlined_call_operand.hbm [shape: f32[2,16,128], index: 12, kind: output, shape index: {}]  }
   0x1   :  { %3543 = sst [smem:[#allocation17_spill]] %s3530_s5 }
   0x2   :  { %3544 = sst [smem:[#allocation18_spill]] %s3532_s7 }
   0x3   :  { %17 = vsyncpa [#allocation3], 0 }
   0x4   :  { %18 = vsyncpa [#allocation6], 0 }
   0x5   :  { %19 = vsyncpa [#allocation4], 0 }
   0x6   :  { %21 = vsyncpa [#allocation4 + $0x1], 0  ;;  %s2988_s21 = smov 0   ;;  %s2990_s22 = smov 0  }
   0x7   :  { %s2992_s23 = smov 0   ;;  %s2994_s24 = smov 0  }
   0x8 LB: > { %3545 = sst [smem:[#allocation12_spill]] %s2896_s21  ;;  %s3009_s25 = sadd.s32 4294967295, %s2908_s24   ;;  %s2908_s24 = sphi %s2994_s24, %s3558_s24   ;;  %s2904_s23 = sphi %s2992_s23, %s3560_s23   ;;  %s2900_s22 = sphi %s2990_s22, %s3562_s22   ;;  %s2896_s21 = sphi %s2988_s21, %s3561_s21  }
   0x9   : > { %3546 = sst [smem:[#allocation13_spill]] %s2904_s23  ;;  %s2108_s26 = sadd.s32 4294967294, %s2908_s24  }
   0xa   : > { %s3013_s27 = sadd.s32 1, %s2908_s24   ;;  %s291_s28 = sadd.s32 1, %s2904_s23 }
   0xb   : > { %3547 = sst [smem:[#allocation14_spill]] %s3013_s27  ;;  %s288_s29 = ssub.s32 %s2908_s24, %s3013_s27 }
   0xc   : > { %p301_p0 = scmp.ne.s32.totalorder %s2904_s23, %s2900_s22  ;;  %p289_p1 = scmp.eq.s32.totalorder %s288_s29, 0 }
   0xd   : > { %p302_p2 = scmp.eq.s32.totalorder %s3009_s25, 1  ;;  %p307_p3 = scmp.ne.s32.totalorder %s2900_s22, %s2896_s21 }
   0xe   : > { %p308_p4 = scmp.eq.s32.totalorder %s2108_s26, 1  ;;  %p2109_p7 = scmp.ge.s32.totalorder %s2908_s24, 1 }
   0xf   : > { %s3024_s30 = scalar_select %p289_p1, %s2904_s23, %s291_s28  }
  0x10   : > { %p3026_p5 = por %p302_p2, %p301_p0  ;;  %p3030_p6 = por %p308_p4, %p307_p3 }
  0x11   : > { %3548 = sst [smem:[#allocation15_spill]] %s3024_s30  ;;  %p315_p8 = scmp.lt.s32.totalorder %s2908_s24, 3 }
  0x12   : > { %s3550_s14 = scalar_select %p3030_p6, 1, 0 }
  0x13   : > { %p2604_p9 = scmp.eq.s32.totalorder %s3009_s25, 0  ;;  %p3037_p10 = pnand %p2109_p7, %p315_p8 }
  0x14   : > { %3551 = sst [smem:[#allocation16_spill]] %s3550_s14  ;;  %s2910_s19 = smov [#allocation5]  }
  0x15   : > { %s3553_s7 = sld [smem:[#allocation18_spill]]  ;;  %p2590_p11 = pneg %p3037_p10 }
  0x16   : > { %s357_s20 = sshll.u32 %s2910_s19, 4  ;;  %s3555_s5 = sld [smem:[#allocation17_spill]]  ;;  %s358_s20 = int_to_ptr.vmem [resolvable:$true] %s357_s20 }
  0x17   : > { %p3048_p12 = pnand %p2604_p9, %p2590_p11  ;;  %s2911_s16 = smov 256  }
  0x18   : > { %s2912_s17 = smov 16   ;;  %s2914_s23 = smov 64  }
  0x19   : > { %s2915_s27 = smov 4   ;;  %s372_s28 = sshll.u32 %s3534_s9, 4  ;;  %s373_s28 = int_to_ptr.hbm [resolvable:$true] %s372_s28 }
  0x1a   : > { %s2916_s29 = smov [#allocation7]  }
  0x1b   : > { %s355_s18 = sshll.u32 %s3553_s7, 4  ;;  %s2913_s7 = smov [#allocation2]   ;;  %s356_s18 = int_to_ptr.hbm [resolvable:$true] %s355_s18 }
  0x1c   : > { %s338_s30 = sshll.u32 %s3555_s5, 4  ;;  %s340_s19 = sshll.u32 %s2913_s7, 4  ;;  %s339_s30 = int_to_ptr.hbm [resolvable:$true] %s338_s30  ;;  %s341_s19 = int_to_ptr.vmem [resolvable:$true] %s340_s19 }
  0x1d   : > { %2596 = dma.hbm_to_vmem [thread:$0]  (!%p3048_p12), %s356_s18, 4096, %s358_s20, [#allocation6], %s2911_s16, %s2911_s16, %s2912_s17  }
  0x1e   : > { %2593 = dma.hbm_to_vmem [thread:$0]  (!%p3048_p12), %s339_s30, 1024, %s341_s19, [#allocation3], %s2914_s23, %s2914_s23, %s2915_s27  }
  0x1f   : > { %s374_s5 = sshll.u32 %s2916_s29, 4  ;;  %404 = sbr.rel (%p3037_p10) target bundleno = 1982 (0x7be), region = 68  ;;  %s375_s5 = int_to_ptr.vmem [resolvable:$true] %s374_s5 }
  0x20   : > { %2599 = dma.hbm_to_vmem [thread:$0]  (!%p3048_p12), %s373_s28, 4096, %s375_s5, [#allocation6], %s2914_s23, %s2914_s23, %s2915_s27  }
  0x24   : > { %2883 = dma.done.wait (%p2604_p9), [#allocation3], 1024  }
  0x25   : > { %2885 = vsyncadd (%p2604_p9), [#allocation3], 4294966272 }
  0x26   : > { %2887 = dma.done.wait (%p2604_p9), [#allocation6], 8192  }
  0x27   : > { %2889 = vsyncadd (%p2604_p9), [#allocation6], 4294959104  ;;  %p457_p13 = scmp.lt.s32.totalorder %s3009_s25, 1  ;;  %v465_v0 = vlaneseq  ;;  %v2494_v14 = vld [vmem:[%s3528_s3 + $0x38] sm:$0xff]  ;;  %v2493_v16 = vld [vmem:[%s3528_s3 + $0x30] sm:$0xff]  ;;  %vm725_vm15 = vcmask 261120  }
  0x28   : > { %v2502_v15 = vld [vmem:[%s3529_s4 + $0x38] sm:$0xff]  ;;  %619 = vmatpush.bf16.msra.mxu0 %v2494_v14  ;;  %v2501_v17 = vld [vmem:[%s3529_s4 + $0x30] sm:$0xff]  ;;  %v2492_v19 = vld [vmem:[%s3528_s3 + $0x28] sm:$0xff]  ;;  %s2917_s15 = smov 32   ;;  %s2918_s18 = smov 96  }
  0x29   : > { %s458_s5 = scalar_select %p457_p13, %s3009_s25, 1  ;;  %v3076_v1 = vshrl.u32 %v465_v0, 7  ;;  %v3081_v2 = vand.u32 127, %v465_v0  ;;  %697 = vmatpush.bf16.msra.mxu1 %v2502_v15  ;;  %v2500_v20 = vld [vmem:[%s3529_s4 + $0x28] sm:$0xff]  ;;  %v2491_v21 = vld [vmem:[%s3528_s3 + $0x20] sm:$0xff]  ;;  %v2490_v23 = vld [vmem:[%s3528_s3 + $0x18] sm:$0xff] }
  0x2a   : > { %v2499_v22 = vld [vmem:[%s3529_s4 + $0x20] sm:$0xff]  ;;  %v2498_v24 = vld [vmem:[%s3529_s4 + $0x18] sm:$0xff]  ;;  %v2489_v29 = vld [vmem:[%s3528_s3 + $0x10] sm:$0xff]  ;;  %s2919_s20 = smov 64   ;;  %s2858_s29 = scalar_lea.hbm %s3537_s12, 32 }
  0x2b   : > { %s2486_s7 = sshll.u32 %s458_s5, 4  ;;  %vm471_vm0 = vcmp.eq.s32.totalorder %v3076_v1, 0  ;;  %vm475_vm1 = vcmp.lt.s32.totalorder %v3076_v1, 1  ;;  %vm470_vm2 = vcmp.lt.s32.totalorder %v3081_v2, 64  ;;  %v2497_v30 = vld [vmem:[%s3529_s4 + $0x10] sm:$0xff]  ;;  %v2488_v33 = vld [vmem:[%s3528_s3 + $0x8] sm:$0xff] }
  0x2c   : > { %s461_s27 = scalar_lea.vmem %s3526_s1, %s2486_s7  ;;  %620 = vmatpush.bf16.msra.mxu0 %v2493_v16  ;;  %v2496_v34 = vld [vmem:[%s3529_s4 + $0x8] sm:$0xff]  ;;  %v2487_v40 = vld [vmem:[%s3528_s3] sm:$0xff]  ;;  %v2333_v2 = vld [vmem:[#allocation5 + $0xd8] sm:$0xf0]  ;;  %s454_s5 = sand.u32 1, %s2900_s22  }
  0x2d   : > { %v3083_v3 = vld [vmem:[%s461_s27] sm:$0xff]  ;;  %v3085_v4 = vld [vmem:[%s461_s27 + $0x8] sm:$0xff]  ;;  %698 = vmatpush.bf16.msra.mxu1 %v2501_v17  ;;  %s2118_s7 = sshll.u32 %s454_s5, 4  ;;  %s2575_s27 = sshll.u32 %s3009_s25, 4 }
  0x2e   : > { %v473_v5 = vrot.slane %v3083_v3, 7  ;;  %v474_v6 = vrot.slane %v3085_v4, 7  ;;  %v2495_v41 = vld [vmem:[%s3529_s4] sm:$0xff]  ;;  %s2011_s26 = scalar_lea.hbm %s3537_s12, %s2575_s27  ;;  %s456_s16 = scalar_lea.vmem [#allocation8], %s2118_s7 }
  0x2f   : > { %s2012_s25 = sshll.u32 %s456_s16, 4  ;;  %s2014_s17 = sshll.u32 %s2011_s26, 4  ;;  %s2013_s25 = int_to_ptr.vmem [resolvable:$true] %s2012_s25  ;;  %s2015_s17 = int_to_ptr.hbm [resolvable:$true] %s2014_s17 }
  0x30   : > { %v477_v7 = vsel %vm475_vm1, %v474_v6, %v473_v5  ;;  %v476_v11 = vsel %vm475_vm1, %v473_v5, %v474_v6  ;;  %621 = vmatpush.bf16.msra.mxu0 %v2492_v19 }
  0x31   : > { %v478_v8 = vsel %vm471_vm0, 0.0, %v477_v7  ;;  %v3108_v12 = vsel %vm470_vm2, %v3085_v4, %v476_v11  ;;  %699 = vmatpush.bf16.msra.mxu1 %v2500_v20 }
  0x32   : > { %v3099_v9 = vsel %vm470_vm2, %v3083_v3, %v478_v8  ;;  %v484_v13 = vmul.f32 %v3108_v12, %v3108_v12 }
  0x33   : > { %v483_v10 = vmul.f32 %v3099_v9, %v3099_v9 }
  0x34   : > { %622 = vmatpush.bf16.msra.mxu0 %v2491_v21 }
  0x35   : > { %485 = vadd.xlane.f32.xlu0 %v483_v10  ;;  %700 = vmatpush.bf16.msra.mxu1 %v2499_v22 }
  0x38   : > { %623 = vmatpush.bf16.msra.mxu0 %v2490_v23 }
  0x39   : > { %701 = vmatpush.bf16.msra.mxu1 %v2498_v24 }
  0x3c   : > { %624 = vmatpush.bf16.msra.mxu0 %v2489_v29 }
  0x3d   : > { %487 = vadd.xlane.f32.xlu0 %v484_v13  ;;  %702 = vmatpush.bf16.msra.mxu1 %v2497_v30 }
  0x40   : > { %625 = vmatpush.bf16.msra.mxu0 %v2488_v33 }
  0x41   : > { %703 = vmatpush.bf16.msra.mxu1 %v2496_v34 }
  0x44   : > { %626 = vmatpush.bf16.msra.mxu0 %v2487_v40 }
  0x45   : > { %704 = vmatpush.bf16.msra.mxu1 %v2495_v41  ;;  %v779_v41 = vld [vmem:[%s3525_s0 + $0x8] sm:$0xff] }
  0xa8   : > { %v486_v18 = vpop.xlane.xlu0 %485 }
  0xa9   : > { %2660 = vrsqrt.f32 %v486_v18  ;;  %vm496_vm3 = vcmp.eq.f32.partialorder %v486_v18, inf  ;;  %v499_v42 = vand.u32 2147483648, %v486_v18  ;;  %vm498_vm4 = vcmp.eq.f32.partialorder %v486_v18, 0.0 }
  0xaf   : > { %v2661_v25 = vpop.eup %2660 }
  0xb0   : > { %v490_v26 = vmul.f32 %v2661_v25, %v486_v18  ;;  %v488_v27 = vpop.xlane.xlu0 %487 }
  0xb1   : > { %2662 = vrsqrt.f32 %v488_v27  ;;  %vm508_vm5 = vcmp.eq.f32.partialorder %v488_v27, inf  ;;  %v511_v51 = vand.u32 2147483648, %v488_v27  ;;  %vm510_vm6 = vcmp.eq.f32.partialorder %v488_v27, 0.0 }
  0xb2   : > { %v491_v28 = vmul.f32 %v2661_v25, %v490_v26 }
  0xb4   : > { %v492_v31 = vmul.f32 0.5, %v491_v28 }
  0xb6   : > { %v493_v32 = vsub.f32 1.5, %v492_v31 }
  0xb7   : > { %v2663_v35 = vpop.eup %2662 }
  0xb8   : > { %v494_v36 = vmul.f32 %v2661_v25, %v493_v32  ;;  %v502_v37 = vmul.f32 %v2663_v35, %v488_v27 }
  0xba   : > { %v495_v38 = vmul.f32 %v494_v36, %v486_v18  ;;  %v503_v39 = vmul.f32 %v2663_v35, %v502_v37  ;;  %v778_v36 = vld [vmem:[%s3525_s0] sm:$0xff] }
  0xbc   : > { %v497_v43 = vsel %vm496_vm3, %v486_v18, %v495_v38  ;;  %v504_v44 = vmul.f32 0.5, %v503_v39  ;;  %v2656_v18 = vld [vmem:[%s3527_s2] ss:$0 sm:$0xff]  ;;  %vm794_vm3 = vcmask 130048  }
  0xbd   : > { %v500_v45 = vsel %vm498_vm4, %v499_v42, %v497_v43  ;;  %vm969_vm4 = vcmask 523264  }
  0xbe   : > { %v513_v46 = vmul.f32 0.088388346, %v500_v45  ;;  %v505_v47 = vsub.f32 1.5, %v504_v44 }
  0xc0   : > { %v515_v48 = vmax.f32 %v513_v46, 1e-08  ;;  %v506_v49 = vmul.f32 %v2663_v35, %v505_v47  ;;  %v780_v47 = vld [vmem:[%s3525_s0 + $0x10] sm:$0xff] }
  0xc2   : > { %2664 = vrcp.f32 %v515_v48  ;;  %v507_v50 = vmul.f32 %v506_v49, %v488_v27  ;;  %v528_v62 = vand.u32 2147483648, %v515_v48  ;;  %vm522_vm8 = vweird.f32 %v515_v48 }
  0xc3   : > { %v526_v63 = vand.u32 2147483647, %v515_v48 }
  0xc4   : > { %v509_v52 = vsel %vm508_vm5, %v488_v27, %v507_v50  ;;  %v529_v7 = vor.u32 1.1754944e-38, %v528_v62  ;;  %v783_v62 = vld [vmem:[%s3525_s0 + $0x28] sm:$0xff]  ;;  %vm972_vm5 = vcmask 785408  }
  0xc5   : > { %v512_v53 = vsel %vm510_vm6, %v511_v51, %v509_v52  ;;  %vm527_vm10 = vcmp.eq.f32.partialorder %v526_v63, 8.507059e+37  ;;  %v781_v52 = vld [vmem:[%s3525_s0 + $0x18] sm:$0xff] }
  0xc6   : > { %v514_v54 = vmul.f32 0.088388346, %v512_v53 }
  0xc8   : > { %v2665_v55 = vpop.eup %2664  ;;  %v516_v56 = vmax.f32 %v514_v54, 1e-08 }
  0xc9   : > { %v518_v57 = vmul.f32 %v2665_v55, %v515_v48  ;;  %vm523_vm7 = vweird.f32 %v2665_v55 }
  0xca   : > { %2666 = vrcp.f32 %v516_v56  ;;  %vm524_vm9 = vmor %vm522_vm8, %vm523_vm7  ;;  %v543_v8 = vand.u32 2147483648, %v516_v56  ;;  %v541_v11 = vand.u32 2147483647, %v516_v56  ;;  %vm537_vm12 = vweird.f32 %v516_v56 }
  0xcb   : > { %v519_v58 = vsub.f32 1.0, %v518_v57  ;;  %v782_v57 = vld [vmem:[%s3525_s0 + $0x20] sm:$0xff] }
  0xcc   : > { %v544_v15 = vor.u32 1.1754944e-38, %v543_v8  ;;  %vm542_vm14 = vcmp.eq.f32.partialorder %v541_v11, 8.507059e+37  ;;  %v784_v11 = vld [vmem:[%s3525_s0 + $0x30] sm:$0xff] }
  0xcd   : > { %v520_v59 = vmul.f32 %v2665_v55, %v519_v58 }
  0xcf   : > { %v521_v60 = vadd.f32 %v2665_v55, %v520_v59 }
  0xd0   : > { %v2667_v61 = vpop.eup %2666 }
  0xd1   : > { %v533_v0 = vmul.f32 %v2667_v61, %v516_v56  ;;  %v525_v5 = vsel %vm524_vm9, %v2665_v55, %v521_v60  ;;  %vm538_vm11 = vweird.f32 %v2667_v61 }
  0xd2   : > { %v530_v13 = vsel %vm527_vm10, %v529_v7, %v525_v5  ;;  %vm539_vm13 = vmor %vm537_vm12, %vm538_vm11 }
  0xd3   : > { %v534_v6 = vsub.f32 1.0, %v533_v0  ;;  %v547_v17 = vmul.f32 %v530_v13, %v3099_v9 }
  0xd5   : > { %v535_v10 = vmul.f32 %v2667_v61, %v534_v6  ;;  %v552_v21 = vmul.f32 %v2656_v18, %v547_v17 }
  0xd7   : > { %v536_v14 = vadd.f32 %v2667_v61, %v535_v10 }
  0xd9   : > { %v540_v16 = vsel %vm539_vm13, %v2667_v61, %v536_v14 }
  0xda   : > { %v545_v19 = vsel %vm542_vm14, %v544_v15, %v540_v16 }
  0xdb   : > { %v548_v20 = vmul.f32 %v545_v19, %v3108_v12 }
  0xdd   : > { %v553_v22 = vmul.f32 %v2656_v18, %v548_v20  ;;  %v785_v20 = vld [vmem:[%s3525_s0 + $0x38] sm:$0xff] }
  0xdf   : > { %v554_v23 = vpack.c.bf16 %v553_v22, %v552_v21 }
  0xe1   : > { %627 = vmatmul.bf16.vlgmr.msra.gmra.mxu0 %v554_v23  ;;  %705 = vmatmul.bf16.vlgmr.msra.gmra.mxu1 %v554_v23 }
 0x15e   : > { %v628_v24 = vpop.f32.mrf.mxu0  ;;  %v706_v25 = vpop.f32.mrf.mxu1 }
 0x15f   : > { %v711_v26 = vpack.c.bf16 %v628_v24, %v628_v24 }
 0x161   : > { %v716_v30 = vunpack.c.l.b16 %v711_v26 }
 0x166   : > { %v630_v27 = vpop.f32.mrf.mxu0  ;;  %v708_v28 = vpop.f32.mrf.mxu1 }
 0x167   : > { %v712_v29 = vpack.c.bf16 %v630_v27, %v630_v27  ;;  %v713_v9 = vpack.c.bf16 %v708_v28, %v706_v25 }
 0x169   : > { %v717_v31 = vunpack.c.l.b16 %v712_v29  ;;  %v739_v32 = vsel %vm725_vm15, %v713_v9, 0 }
 0x16a   : > { %748 = vmatpush.bf16.xpose.msra.mxu2 %v739_v32 }
 0x16b   : > { %v718_v33 = vpack.c.b16 %v717_v31, %v716_v30 }
 0x16d   : > { %723 = vrot.lane.b32.xlu2 %v718_v33, %s2917_s15  ;;  %719 = vrot.lane.b32.xlu1 %v718_v33, %s2918_s18 }
 0x171   : > { %2185 = vmatmul.msk.bf16.vlgmr.msra.gmra.mxu2 %vm725_vm15, %v718_v33 }
 0x175   : > { %721 = vrot.lane.b32.xlu1 %v718_v33, %s2919_s20 }
 0x1c7   : > { %v724_v43 = vpop.permute.xlu2 %723 }
 0x1df   : > { %v720_v12 = vpop.permute.xlu1 %719 }
 0x1e0   : > { %2186 = vmatmul.msk.bf16.gmra.mxu2 %vm725_vm15, %v720_v12 }
 0x1e7   : > { %v722_v34 = vpop.permute.xlu1 %721 }
 0x1f0   : > { %2187 = vmatmul.msk.bf16.gmra.mxu2 %vm725_vm15, %v722_v34 }
 0x1f4   : > { %v750_v35 = vpop.f32.mrf.mxu2 }
 0x1f5   : > { %v770_v37 = vmul.f32 0.17677669, %v750_v35 }
 0x1f7   : > { %v786_v38 = vadd.f32 %v778_v36, %v770_v37 }
 0x1f9   : > { %v795_v39 = vsel %vm794_vm3, %v786_v38, -inf }
 0x1fa   : > { %796 = vmax.xlane.f32.xlu2 %v795_v39 }
 0x1fc   : > { %v752_v40 = vpop.f32.mrf.mxu2 }
 0x1fd   : > { %v771_v42 = vmul.f32 0.17677669, %v752_v40 }
 0x1ff   : > { %v787_v44 = vadd.f32 %v779_v41, %v771_v42 }
 0x200   : > { %2188 = vmatmul.msk.bf16.gmra.mxu2 %vm725_vm15, %v724_v43 }
 0x201   : > { %v798_v45 = vsel %vm794_vm3, %v787_v44, -inf }
 0x202   : > { %799 = vmax.xlane.f32.xlu0 %v798_v45 }
 0x263   : > { %v755_v46 = vpop.f32.mrf.mxu2 }
 0x264   : > { %v772_v48 = vmul.f32 0.17677669, %v755_v46 }
 0x266   : > { %v788_v49 = vadd.f32 %v780_v47, %v772_v48 }
 0x268   : > { %v801_v50 = vsel %vm794_vm3, %v788_v49, -inf }
 0x269   : > { %802 = vmax.xlane.f32.xlu1 %v801_v50 }
 0x26b   : > { %v757_v51 = vpop.f32.mrf.mxu2 }
 0x26c   : > { %v773_v53 = vmul.f32 0.17677669, %v757_v51 }
 0x26d   : > { %v797_v63 = vpop.xlane.xlu2 %796 }
 0x26e   : > { %v789_v54 = vadd.f32 %v781_v52, %v773_v53  ;;  %v819_v6 = vsub.f32 %v786_v38, %v797_v63 }
 0x270   : > { %v804_v55 = vsel %vm794_vm3, %v789_v54, -inf  ;;  %v827_v8 = vmul.f32 1.442695, %v819_v6 }
 0x271   : > { %805 = vmax.xlane.f32.xlu0 %v804_v55 }
 0x272   : > { %2668 = vpow2.f32 %v827_v8 }
 0x273   : > { %v760_v56 = vpop.f32.mrf.mxu2 }
 0x274   : > { %v774_v58 = vmul.f32 0.17677669, %v760_v56 }
 0x275   : > { %v800_v13 = vpop.xlane.xlu0 %799 }
 0x276   : > { %v790_v59 = vadd.f32 %v782_v57, %v774_v58  ;;  %v820_v16 = vsub.f32 %v787_v44, %v800_v13 }
 0x278   : > { %v807_v60 = vsel %vm794_vm3, %v790_v59, -inf  ;;  %v829_v18 = vmul.f32 1.442695, %v820_v16  ;;  %v2669_v22 = vpop.eup %2668 }
 0x279   : > { %808 = vmax.xlane.f32.xlu0 %v807_v60  ;;  %v843_v24 = vsel %vm794_vm3, %v2669_v22, 0.0 }
 0x27a   : > { %2670 = vpow2.f32 %v829_v18 }
 0x27b   : > { %v762_v61 = vpop.f32.mrf.mxu2 }
 0x27c   : > { %v775_v0 = vmul.f32 0.17677669, %v762_v61 }
 0x27e   : > { %v791_v5 = vadd.f32 %v783_v62, %v775_v0 }
 0x280   : > { %v810_v7 = vsel %vm794_vm3, %v791_v5, -inf  ;;  %v2671_v26 = vpop.eup %2670 }
 0x281   : > { %811 = vmax.xlane.f32.xlu0 %v810_v7  ;;  %v846_v27 = vsel %vm794_vm3, %v2671_v26, 0.0 }
 0x282   : > { %888 = vrot.lane.b32.xlu1 %v713_v9, %s2918_s18 }
 0x283   : > { %v765_v10 = vpop.f32.mrf.mxu2 }
 0x284   : > { %v776_v14 = vmul.f32 0.17677669, %v765_v10 }
 0x286   : > { %v792_v15 = vadd.f32 %v784_v11, %v776_v14 }
 0x288   : > { %v813_v17 = vsel %vm794_vm3, %v792_v15, -inf }
 0x289   : > { %814 = vmax.xlane.f32.xlu0 %v813_v17 }
 0x28b   : > { %v767_v19 = vpop.f32.mrf.mxu2 }
 0x28c   : > { %v777_v21 = vmul.f32 0.17677669, %v767_v19 }
 0x28e   : > { %v793_v23 = vadd.f32 %v785_v20, %v777_v21 }
 0x290   : > { %v816_v25 = vsel %vm794_vm3, %v793_v23, -inf }
 0x291   : > { %844 = vadd.xlane.f32.xlu0 %v843_v24  ;;  %817 = vmax.xlane.f32.xlu2 %v816_v25 }
 0x299   : > { %847 = vadd.xlane.f32.xlu2 %v846_v27 }
 0x2dc   : > { %v803_v28 = vpop.xlane.xlu1 %802 }
 0x2dd   : > { %v821_v29 = vsub.f32 %v788_v49, %v803_v28 }
 0x2df   : > { %v831_v9 = vmul.f32 1.442695, %v821_v29 }
 0x2e1   : > { %2672 = vpow2.f32 %v831_v9 }
 0x2e4   : > { %v806_v30 = vpop.xlane.xlu0 %805 }
 0x2e5   : > { %v822_v31 = vsub.f32 %v789_v54, %v806_v30 }
 0x2e7   : > { %v2673_v32 = vpop.eup %2672  ;;  %v833_v33 = vmul.f32 1.442695, %v822_v31 }
 0x2e8   : > { %v849_v12 = vsel %vm794_vm3, %v2673_v32, 0.0 }
 0x2e9   : > { %2674 = vpow2.f32 %v833_v33  ;;  %850 = vadd.xlane.f32.xlu0 %v849_v12 }
 0x2ec   : > { %v809_v34 = vpop.xlane.xlu0 %808 }
 0x2ed   : > { %v823_v35 = vsub.f32 %v790_v59, %v809_v34  ;;  %v2510_v34 = vld [vmem:[#allocation2 + $0x38] sm:$0xff] }
 0x2ee   : > { %1040 = vmatpush.bf16.msrb.mxu0 %v2510_v34  ;;  %v2349_v34 = vld [vmem:[#allocation5 + $0xf8] sm:$0xf0] }
 0x2ef   : > { %v2675_v36 = vpop.eup %2674  ;;  %v835_v37 = vmul.f32 1.442695, %v823_v35 }
 0x2f0   : > { %v852_v38 = vsel %vm794_vm3, %v2675_v36, 0.0 }
 0x2f1   : > { %2676 = vpow2.f32 %v835_v37  ;;  %853 = vadd.xlane.f32.xlu2 %v852_v38  ;;  %v2508_v37 = vld [vmem:[#allocation2 + $0x28] sm:$0xff] }
 0x2f4   : > { %v889_v39 = vpop.permute.xlu1 %888  ;;  %v812_v40 = vpop.xlane.xlu0 %811 }
 0x2f5   : > { %v824_v41 = vsub.f32 %v791_v5, %v812_v40  ;;  %910 = vmatpush.bf16.msra.mxu3 %v889_v39 }
 0x2f7   : > { %v2677_v42 = vpop.eup %2676  ;;  %v837_v43 = vmul.f32 1.442695, %v824_v41  ;;  %v2507_v41 = vld [vmem:[#allocation2 + $0x20] sm:$0xff] }
 0x2f8   : > { %v855_v44 = vsel %vm794_vm3, %v2677_v42, 0.0 }
 0x2f9   : > { %2678 = vpow2.f32 %v837_v43  ;;  %856 = vadd.xlane.f32.xlu0 %v855_v44 }
 0x2fc   : > { %v815_v45 = vpop.xlane.xlu0 %814 }
 0x2fd   : > { %v825_v46 = vsub.f32 %v792_v15, %v815_v45 }
 0x2ff   : > { %v2679_v47 = vpop.eup %2678  ;;  %v839_v48 = vmul.f32 1.442695, %v825_v46 }
 0x300   : > { %v858_v49 = vsel %vm794_vm3, %v2679_v47, 0.0 }
 0x301   : > { %2680 = vpow2.f32 %v839_v48  ;;  %859 = vadd.xlane.f32.xlu2 %v858_v49 }
 0x304   : > { %v818_v50 = vpop.xlane.xlu2 %817  ;;  %v845_v54 = vpop.xlane.xlu0 %844 }
 0x305   : > { %v826_v51 = vsub.f32 %v793_v23, %v818_v50 }
 0x307   : > { %v2681_v52 = vpop.eup %2680  ;;  %v841_v53 = vmul.f32 1.442695, %v826_v51 }
 0x308   : > { %v861_v55 = vsel %vm794_vm3, %v2681_v52, 0.0 }
 0x309   : > { %2682 = vpow2.f32 %v841_v53  ;;  %862 = vadd.xlane.f32.xlu0 %v861_v55  ;;  %v2505_v53 = vld [vmem:[#allocation2 + $0x10] sm:$0xff]  ;;  %v2503_v55 = vld [vmem:[#allocation2] sm:$0xff] }
 0x30a   : > { %2684 = vrcp.f32 %v845_v54  ;;  %v2504_v54 = vld [vmem:[#allocation2 + $0x8] sm:$0xff] }
 0x30c   : > { %v848_v56 = vpop.xlane.xlu2 %847 }
 0x30d   : > { %2686 = vrcp.f32 %v848_v56 }
 0x30f   : > { %v2683_v57 = vpop.eup %2682 }
 0x310   : > { %v864_v58 = vsel %vm794_vm3, %v2683_v57, 0.0  ;;  %v2685_v59 = vpop.eup %2684 }
 0x311   : > { %865 = vadd.xlane.f32.xlu2 %v864_v58  ;;  %v875_v61 = vmul.f32 %v2685_v59, %v2669_v22 }
 0x313   : > { %v2687_v60 = vpop.eup %2686 }
 0x314   : > { %v876_v62 = vmul.f32 %v2687_v60, %v2671_v26 }
 0x316   : > { %v883_v63 = vpack.c.bf16 %v876_v62, %v875_v61 }
 0x318   : > { %2189 = vmatmul.msk.bf16.vlgmr.msra.gmra.mxu3 %vm794_vm3, %v883_v63 }
 0x35c   : > { %v851_v0 = vpop.xlane.xlu0 %850 }
 0x35d   : > { %2688 = vrcp.f32 %v851_v0 }
 0x363   : > { %v2689_v6 = vpop.eup %2688 }
 0x364   : > { %v854_v5 = vpop.xlane.xlu2 %853  ;;  %v877_v8 = vmul.f32 %v2689_v6, %v2673_v32 }
 0x365   : > { %2690 = vrcp.f32 %v854_v5 }
 0x36b   : > { %v2691_v7 = vpop.eup %2690 }
 0x36c   : > { %v878_v10 = vmul.f32 %v2691_v7, %v2675_v36  ;;  %v857_v13 = vpop.xlane.xlu0 %856  ;;  %v2509_v36 = vld [vmem:[#allocation2 + $0x30] sm:$0xff]  ;;  %v2539_v7 = vld [vmem:[#allocation5 + $0xe4] sm:$0xf] }
 0x36d   : > { %2692 = vrcp.f32 %v857_v13  ;;  %1041 = vmatpush.bf16.msrb.mxu0 %v2509_v36  ;;  %v2542_v13 = vld [vmem:[#allocation5 + $0xf4] sm:$0xf0]  ;;  %v2537_v36 = vld [vmem:[#allocation5 + $0xcc] sm:$0xf0] }
 0x36e   : > { %v884_v11 = vpack.c.bf16 %v878_v10, %v877_v8  ;;  %v2341_v8 = vld [vmem:[#allocation5 + $0xf0] sm:$0xf0]  ;;  %v2347_v10 = vld [vmem:[#allocation5 + $0xe8] sm:$0xf] }
 0x370   : > { %2190 = vmatmul.msk.bf16.gmra.mxu3 %vm794_vm3, %v884_v11  ;;  %v2344_v11 = vor.u32 %v2539_v7, %v2341_v8  ;;  %v2301_v7 = vld [vmem:[#allocation5 + $0x98] sm:$0xf0] }
 0x371   : > { %1042 = vmatpush.bf16.msrb.mxu0 %v2508_v37  ;;  %v2536_v37 = vld [vmem:[#allocation5 + $0xcc] sm:$0xf] }
 0x372   : > { %1353 = vmatpush.bf16.msrb.mxu3 %v2344_v11  ;;  %v2519_v11 = vld [vmem:[#allocation5 + $0x44] sm:$0xf] }
 0x373   : > { %v2693_v15 = vpop.eup %2692 }
 0x374   : > { %v860_v14 = vpop.xlane.xlu2 %859  ;;  %v879_v17 = vmul.f32 %v2693_v15, %v2677_v42  ;;  %v2325_v15 = vld [vmem:[#allocation5 + $0xd0] sm:$0xf0] }
 0x375   : > { %2694 = vrcp.f32 %v860_v14  ;;  %1043 = vmatpush.bf16.msrb.mxu0 %v2507_v41  ;;  %v2535_v14 = vld [vmem:[#allocation5 + $0xc4] sm:$0xf]  ;;  %v2309_v41 = vld [vmem:[#allocation5 + $0xb0] sm:$0xf0] }
 0x37b   : > { %v2695_v16 = vpop.eup %2694 }
 0x37c   : > { %v880_v18 = vmul.f32 %v2695_v16, %v2679_v47  ;;  %v863_v20 = vpop.xlane.xlu0 %862  ;;  %v2348_v16 = vor.u32 %v2542_v13, %v2347_v10  ;;  %v2261_v13 = vld [vmem:[#allocation5 + $0x50] sm:$0xf0] }
 0x37d   : > { %2696 = vrcp.f32 %v863_v20 }
 0x37e   : > { %v885_v19 = vpack.c.bf16 %v880_v18, %v879_v17  ;;  %v2331_v17 = vld [vmem:[#allocation5 + $0xc8] sm:$0xf]  ;;  %v2538_v18 = vld [vmem:[#allocation5 + $0xd4] sm:$0xf0]  ;;  %1367 = vmatpush.bf16.msrb.mxu2 %v2348_v16 }
 0x37f   : > { %v2332_v20 = vor.u32 %v2538_v18, %v2331_v17  ;;  %v2275_v18 = vld [vmem:[#allocation5 + $0x60] sm:$0xf] }
 0x380   : > { %2191 = vmatmul.msk.bf16.gmra.mxu3 %vm794_vm3, %v885_v19  ;;  %v2328_v19 = vor.u32 %v2535_v14, %v2325_v15  ;;  %v2267_v14 = vld [vmem:[#allocation5 + $0x48] sm:$0xf]  ;;  %v2522_v15 = vld [vmem:[#allocation5 + $0x54] sm:$0xf0] }
 0x382   : > { %1354 = vmatpush.bf16.msrb.mxu3 %v2328_v19  ;;  %1368 = vmatpush.bf16.msrb.mxu2 %v2332_v20  ;;  %v2525_v19 = vld [vmem:[#allocation5 + $0x6c] sm:$0xf0]  ;;  %v2524_v20 = vld [vmem:[#allocation5 + $0x6c] sm:$0xf] }
 0x383   : > { %v2697_v22 = vpop.eup %2696 }
 0x384   : > { %v866_v21 = vpop.xlane.xlu2 %865  ;;  %v881_v24 = vmul.f32 %v2697_v22, %v2681_v52  ;;  %v2506_v52 = vld [vmem:[#allocation2 + $0x18] sm:$0xff] }
 0x385   : > { %2698 = vrcp.f32 %v866_v21  ;;  %1044 = vmatpush.bf16.msrb.mxu0 %v2506_v52 }
 0x389   : > { %1045 = vmatpush.bf16.msrb.mxu0 %v2505_v53  ;;  %v2530_v53 = vld [vmem:[#allocation5 + $0x94] sm:$0xf0] }
 0x38b   : > { %v2699_v23 = vpop.eup %2698 }
 0x38c   : > { %v882_v25 = vmul.f32 %v2699_v23, %v2683_v57 }
 0x38d   : > { %1046 = vmatpush.bf16.msrb.mxu0 %v2504_v54 }
 0x38e   : > { %v886_v26 = vpack.c.bf16 %v882_v25, %v881_v24 }
 0x390   : > { %2192 = vmatmul.msk.bf16.gmra.mxu3 %vm794_vm3, %v886_v26 }
 0x391   : > { %1047 = vmatpush.bf16.msrb.mxu0 %v2503_v55  ;;  %v2523_v55 = vld [vmem:[#allocation5 + $0x64] sm:$0xf] }
 0x39b   : > { %v912_v27 = vpop.f32.mrf.mxu3 }
 0x39c   : > { %v932_v57 = vpack.c.bf16 %v912_v27, %v912_v27 }
 0x39e   : > { %v942_v59 = vunpack.c.l.b16 %v932_v57  ;;  %v2283_v57 = vld [vmem:[#allocation5 + $0x68] sm:$0xf] }
 0x3a3   : > { %v914_v28 = vpop.f32.mrf.mxu3 }
 0x3a4   : > { %v933_v56 = vpack.c.bf16 %v914_v28, %v914_v28 }
 0x3a6   : > { %v943_v58 = vunpack.c.l.b16 %v933_v56  ;;  %v2277_v56 = vld [vmem:[#allocation5 + $0x70] sm:$0xf0] }
 0x3a8   : > { %v944_v61 = vpack.c.b16 %v943_v58, %v942_v59  ;;  %v2526_v58 = vld [vmem:[#allocation5 + $0x74] sm:$0xf0]  ;;  %v2532_v59 = vld [vmem:[#allocation5 + $0xac] sm:$0xf] }
 0x3a9   : > { %v2284_v10 = vor.u32 %v2526_v58, %v2283_v57  ;;  %v2227_v57 = vld [vmem:[#allocation5] sm:$0xf]  ;;  %v2513_v58 = vld [vmem:[#allocation5 + $0xc] sm:$0xf0] }
 0x3f3   : > { %v917_v29 = vpop.f32.mrf.mxu3 }
 0x3f4   : > { %v934_v9 = vpack.c.bf16 %v917_v29, %v917_v29 }
 0x3f6   : > { %v947_v32 = vunpack.c.l.b16 %v934_v9 }
 0x3fb   : > { %v919_v30 = vpop.f32.mrf.mxu3 }
 0x3fc   : > { %v935_v31 = vpack.c.bf16 %v919_v30, %v919_v30 }
 0x3fe   : > { %v948_v33 = vunpack.c.l.b16 %v935_v31  ;;  %v2339_v31 = vld [vmem:[#allocation5 + $0xe0] sm:$0xf] }
 0x400   : > { %v949_v12 = vpack.c.b16 %v948_v33, %v947_v32  ;;  %v2541_v32 = vld [vmem:[#allocation5 + $0xec] sm:$0xf0]  ;;  %v2540_v33 = vld [vmem:[#allocation5 + $0xec] sm:$0xf] }
 0x401   : > { %v2352_v1 = vor.u32 %v2540_v33, %v2349_v34  ;;  %v2269_v34 = vld [vmem:[#allocation5 + $0x58] sm:$0xf0] }
 0x402   : > { %950 = vrot.lane.b32.xlu1 %v949_v12, %s2917_s15  ;;  %v2340_v12 = vor.u32 %v2541_v32, %v2339_v31  ;;  %v2259_v31 = vld [vmem:[#allocation5 + $0x40] sm:$0xf]  ;;  %v2521_v32 = vld [vmem:[#allocation5 + $0x4c] sm:$0xf0]  ;;  %s2000_s15 = scalar_lea.sflag [#allocation4], %s454_s5 }
 0x403   : > { %v922_v35 = vpop.f32.mrf.mxu3  ;;  %1381 = vmatpush.bf16.msra.mxu0 %v2352_v1 }
 0x404   : > { %v936_v38 = vpack.c.bf16 %v922_v35, %v922_v35  ;;  %1339 = vmatpush.bf16.msrb.mxu1 %v2340_v12  ;;  %v2323_v35 = vld [vmem:[#allocation5 + $0xc0] sm:$0xf]  ;;  %v2520_v12 = vld [vmem:[#allocation5 + $0x4c] sm:$0xf] }
 0x406   : > { %v954_v42 = vunpack.c.l.b16 %v936_v38  ;;  %v2324_v38 = vor.u32 %v2537_v36, %v2323_v35 }
 0x408   : > { %1340 = vmatpush.bf16.msrb.mxu1 %v2324_v38 }
 0x40b   : > { %v924_v39 = vpop.f32.mrf.mxu3 }
 0x40c   : > { %v937_v40 = vpack.c.bf16 %v924_v39, %v924_v39  ;;  %v2336_v39 = vor.u32 %v2536_v37, %v2333_v2  ;;  %v2260_v2 = vor.u32 %v2521_v32, %v2259_v31 }
 0x40e   : > { %v955_v43 = vunpack.c.l.b16 %v937_v40  ;;  %v2531_v40 = vld [vmem:[#allocation5 + $0xa4] sm:$0xf]  ;;  %1382 = vmatpush.bf16.msra.mxu0 %v2336_v39 }
 0x40f   : > { %v2511_v39 = vld [vmem:[#allocation5 + $0x4] sm:$0xf] }
 0x410   : > { %v956_v44 = vpack.c.b16 %v955_v43, %v954_v42  ;;  %v2315_v42 = vld [vmem:[#allocation5 + $0xa8] sm:$0xf]  ;;  %v2312_v43 = vor.u32 %v2531_v40, %v2309_v41  ;;  %v2229_v40 = vld [vmem:[#allocation5 + $0x10] sm:$0xf0]  ;;  %v2243_v41 = vld [vmem:[#allocation5 + $0x20] sm:$0xf] }
 0x412   : > { %957 = vrot.lane.b32.xlu0 %v956_v44, %s2919_s20  ;;  %v2534_v44 = vld [vmem:[#allocation5 + $0xb4] sm:$0xf0]  ;;  %1355 = vmatpush.bf16.msrb.mxu3 %v2312_v43  ;;  %v2272_v43 = vor.u32 %v2520_v12, %v2269_v34 }
 0x413   : > { %v927_v45 = vpop.f32.mrf.mxu3 }
 0x414   : > { %v938_v46 = vpack.c.bf16 %v927_v45, %v927_v45  ;;  %v2307_v45 = vld [vmem:[#allocation5 + $0xa0] sm:$0xf] }
 0x416   : > { %v961_v49 = vunpack.c.l.b16 %v938_v46  ;;  %v2533_v46 = vld [vmem:[#allocation5 + $0xac] sm:$0xf0] }
 0x41b   : > { %v929_v47 = vpop.f32.mrf.mxu3 }
 0x41c   : > { %v939_v48 = vpack.c.bf16 %v929_v47, %v929_v47  ;;  %v2316_v47 = vor.u32 %v2534_v44, %v2315_v42  ;;  %v2517_v44 = vld [vmem:[#allocation5 + $0x2c] sm:$0xf0] }
 0x41e   : > { %v962_v50 = vunpack.c.l.b16 %v939_v48  ;;  %v2527_v48 = vld [vmem:[#allocation5 + $0x84] sm:$0xf]  ;;  %1369 = vmatpush.bf16.msrb.mxu2 %v2316_v47 }
 0x420   : > { %v963_v51 = vpack.c.b16 %v962_v50, %v961_v49  ;;  %v2293_v49 = vld [vmem:[#allocation5 + $0x90] sm:$0xf0]  ;;  %v2299_v50 = vld [vmem:[#allocation5 + $0x88] sm:$0xf] }
 0x421   : > { %v2296_v52 = vor.u32 %v2527_v48, %v2293_v49  ;;  %v2300_v54 = vor.u32 %v2530_v53, %v2299_v50  ;;  %v2516_v48 = vld [vmem:[#allocation5 + $0x2c] sm:$0xf]  ;;  %v2253_v49 = vld [vmem:[#allocation5 + $0x38] sm:$0xf0]  ;;  %v2244_v53 = vor.u32 %v2517_v44, %v2243_v41  ;;  %v3276_v44 = vld [vmem:[%s3533_s8] sm:$0xf] }
 0x422   : > { %964 = vrot.lane.b32.xlu2 %v963_v51, %s2918_s18  ;;  %v2308_v51 = vor.u32 %v2533_v46, %v2307_v45  ;;  %v2235_v45 = vld [vmem:[#allocation5 + $0x8] sm:$0xf]  ;;  %v2514_v46 = vld [vmem:[#allocation5 + $0x14] sm:$0xf0]  ;;  %s2852_s18 = sshra.s32 %s2015_s17, 4  ;;  %s2853_s18 = int_to_ptr.hbm [resolvable:$true] %s2852_s18 }
 0x423   : > { %1356 = vmatpush.bf16.msrb.mxu3 %v2296_v52  ;;  %1370 = vmatpush.bf16.msrb.mxu2 %v2300_v54  ;;  %v2236_v54 = vor.u32 %v2514_v46, %v2235_v45  ;;  %v1171_v45 = vperm.slane %v3276_v44, 0  ;;  %v1174_v46 = vperm.slane %v3276_v44, 3  ;;  %s2854_s20 = scalar_lea.hbm %s2853_s18, 16  ;;  %p2859_p3 = scmp.lt.s32.totalorder %s2853_s18, %s3537_s12 }
 0x424   : > { %1341 = vmatpush.bf16.msrb.mxu1 %v2308_v51  ;;  %v2232_v51 = vor.u32 %v2511_v39, %v2229_v40  ;;  %p2855_p0 = scmp.ne.s32.totalorder %s2853_s18, %s2854_s20  ;;  %p2860_p4 = scmp.lt.s32.totalorder %s2858_s29, %s2854_s20 }
 0x426   : > { %p2856_p1 = pnand %p2855_p0, %p3026_p5  ;;  %p2861_p7 = por %p2860_p4, %p2859_p3 }
 0x427   : > { %1371 = vmatpush.bf16.msrb.mxu2 %v2284_v10 }
 0x428   : > { %p2857_p2 = pneg %p2856_p1 }
 0x42a   : > { %p2862_p8 = pnand %p2861_p7, %p2857_p2 }
 0x474   : > { %v951_v60 = vpop.permute.xlu1 %950 }
 0x475   : > { %v968_v62 = vsel %vm725_vm15, %v944_v61, %v951_v60  ;;  %v2317_v60 = vld [vmem:[#allocation5 + $0xb8] sm:$0xf0] }
 0x476   : > { %v2320_v61 = vor.u32 %v2532_v59, %v2317_v60  ;;  %v2512_v60 = vld [vmem:[#allocation5 + $0xc] sm:$0xf] }
 0x478   : > { %1383 = vmatpush.bf16.msra.mxu0 %v2320_v61  ;;  %v2237_v61 = vld [vmem:[#allocation5 + $0x18] sm:$0xf0] }
 0x47c   : > { %v965_v0 = vpop.permute.xlu2 %964 }
 0x484   : > { %v958_v63 = vpop.permute.xlu0 %957 }
 0x485   : > { %v971_v5 = vsel %vm969_vm4, %v968_v62, %v958_v63  ;;  %v2291_v62 = vld [vmem:[#allocation5 + $0x80] sm:$0xf] }
 0x486   : > { %v974_v6 = vsel %vm972_vm5, %v971_v5, %v965_v0  ;;  %v2280_v0 = vor.u32 %v2523_v55, %v2277_v56  ;;  %v2529_v5 = vld [vmem:[#allocation5 + $0x8c] sm:$0xf0]  ;;  %v2256_v56 = vor.u32 %v2516_v48, %v2253_v49 }
 0x487   : > { %1048 = vmatmul.bf16.vlgmr.msrb.gmra.mxu0 %v974_v6  ;;  %v2528_v6 = vld [vmem:[#allocation5 + $0x8c] sm:$0xf]  ;;  %v2292_v16 = vor.u32 %v2529_v5, %v2291_v62  ;;  %v2228_v5 = vor.u32 %v2513_v58, %v2227_v57 }
 0x488   : > { %v2304_v17 = vor.u32 %v2528_v6, %v2301_v7  ;;  %1357 = vmatpush.bf16.msrb.mxu3 %v2280_v0  ;;  %v2240_v7 = vor.u32 %v2512_v60, %v2237_v61 }
 0x489   : > { %1342 = vmatpush.bf16.msrb.mxu1 %v2292_v16 }
 0x48a   : > { %1384 = vmatpush.bf16.msra.mxu0 %v2304_v17 }
 0x504   : > { %v1049_v21 = vpop.f32.mrf.mxu0 }
 0x505   : > { %v3223_v22 = vadd.f32 %v1049_v21, %v3083_v3  ;;  %v2264_v21 = vor.u32 %v2519_v11, %v2261_v13 }
 0x507   : > { %v1056_v25 = vrot.slane %v3223_v22, 7  ;;  %1358 = vmatpush.bf16.msrb.mxu3 %v2264_v21 }
 0x50c   : > { %v1051_v23 = vpop.f32.mrf.mxu0 }
 0x50d   : > { %v3226_v24 = vadd.f32 %v1051_v23, %v3085_v4  ;;  %v2285_v23 = vld [vmem:[#allocation5 + $0x78] sm:$0xf0] }
 0x50f   : > { %v1057_v26 = vrot.slane %v3226_v24, 7 }
 0x511   : > { %v1058_v27 = vsel %vm475_vm1, %v1056_v25, %v1057_v26  ;;  %v1059_v28 = vsel %vm475_vm1, %v1057_v26, %v1056_v25  ;;  %v2268_v25 = vor.u32 %v2522_v15, %v2267_v14  ;;  %v2515_v26 = vld [vmem:[#allocation5 + $0x24] sm:$0xf] }
 0x512   : > { %v3237_v29 = vsel %vm470_vm2, %v3226_v24, %v1058_v27  ;;  %v1060_v3 = vsel %vm471_vm0, 0.0, %v1059_v28  ;;  %v2245_v27 = vld [vmem:[#allocation5 + $0x30] sm:$0xf0]  ;;  %v2276_v28 = vor.u32 %v2525_v19, %v2275_v18 }
 0x513   : > { %v1066_v4 = vmul.f32 %v3237_v29, %v3237_v29  ;;  %v3246_v9 = vsel %vm470_vm2, %v3223_v22, %v1060_v3  ;;  %v2251_v3 = vld [vmem:[#allocation5 + $0x28] sm:$0xf]  ;;  %v2248_v36 = vor.u32 %v2515_v26, %v2245_v27  ;;  %1372 = vmatpush.bf16.msrb.mxu2 %v2268_v25 }
 0x514   : > { %v1065_v30 = vmul.f32 %v3246_v9, %v3246_v9  ;;  %1343 = vmatpush.bf16.msrb.mxu1 %v2276_v28 }
 0x515   : > { %1069 = vadd.xlane.f32.xlu0 %v1066_v4  ;;  %v2288_v4 = vor.u32 %v2524_v20, %v2285_v23  ;;  %1359 = vmatpush.bf16.msrb.mxu3 %v2248_v36  ;;  %v2657_v36 = vld [vmem:[%s3531_s6] ss:$0 sm:$0xff] }
 0x516   : > { %1067 = vadd.xlane.f32.xlu1 %v1065_v30  ;;  %v2518_v30 = vld [vmem:[#allocation5 + $0x34] sm:$0xf0] }
 0x517   : > { %v2252_v38 = vor.u32 %v2518_v30, %v2251_v3  ;;  %1385 = vmatpush.bf16.msra.mxu0 %v2288_v4 }
 0x518   : > { %1344 = vmatpush.bf16.msrb.mxu1 %v2260_v2 }
 0x519   : > { %1373 = vmatpush.bf16.msrb.mxu2 %v2252_v38  ;;  %1360 = vmatpush.bf16.msrb.mxu3 %v2232_v51 }
 0x51b   : > { %1386 = vmatpush.bf16.msra.mxu0 %v2272_v43 }
 0x51c   : > { %1345 = vmatpush.bf16.msrb.mxu1 %v2244_v53 }
 0x51d   : > { %1374 = vmatpush.bf16.msrb.mxu2 %v2236_v54 }
 0x51f   : > { %1387 = vmatpush.bf16.msra.mxu0 %v2256_v56 }
 0x520   : > { %1346 = vmatpush.bf16.msrb.mxu1 %v2228_v5 }
 0x523   : > { %1388 = vmatpush.bf16.msra.mxu0 %v2240_v7 }
 0x588   : > { %v3250_v63 = vpop.xlane.xlu0 %1069 }
 0x589   : > { %2700 = vrsqrt.f32 %v3250_v63  ;;  %v3253_v8 = vpop.xlane.xlu1 %1067  ;;  %vm1090_vm0 = vcmp.eq.f32.partialorder %v3250_v63, inf  ;;  %v1093_v10 = vand.u32 2147483648, %v3250_v63  ;;  %vm1092_vm1 = vcmp.eq.f32.partialorder %v3250_v63, 0.0 }
 0x58a   : > { %2702 = vrsqrt.f32 %v3253_v8  ;;  %vm1078_vm2 = vcmp.eq.f32.partialorder %v3253_v8, inf  ;;  %v1081_v14 = vand.u32 2147483648, %v3253_v8  ;;  %vm1080_vm6 = vcmp.eq.f32.partialorder %v3253_v8, 0.0 }
 0x58f   : > { %v2701_v33 = vpop.eup %2700 }
 0x590   : > { %v2703_v1 = vpop.eup %2702  ;;  %v1084_v35 = vmul.f32 %v2701_v33, %v3250_v63 }
 0x591   : > { %v1072_v37 = vmul.f32 %v2703_v1, %v3253_v8 }
 0x592   : > { %v1085_v42 = vmul.f32 %v2701_v33, %v1084_v35 }
 0x593   : > { %v1073_v47 = vmul.f32 %v2703_v1, %v1072_v37 }
 0x594   : > { %v1086_v50 = vmul.f32 0.5, %v1085_v42 }
 0x595   : > { %v1074_v52 = vmul.f32 0.5, %v1073_v47 }
 0x596   : > { %v1087_v55 = vsub.f32 1.5, %v1086_v50  ;;  %v1172_v50 = vperm.slane %v3276_v44, 1 }
 0x597   : > { %v1075_v59 = vsub.f32 1.5, %v1074_v52  ;;  %v1173_v52 = vperm.slane %v3276_v44, 2  ;;  %v2564_v44 = vld [vmem:[#allocation7 + $0xa8] sm:$0xff] }
 0x598   : > { %v1088_v62 = vmul.f32 %v2701_v33, %v1087_v55 }
 0x599   : > { %v1076_v0 = vmul.f32 %v2703_v1, %v1075_v59 }
 0x59a   : > { %v1089_v6 = vmul.f32 %v1088_v62, %v3250_v63 }
 0x59b   : > { %v1077_v11 = vmul.f32 %v1076_v0, %v3253_v8 }
 0x59c   : > { %v1091_v13 = vsel %vm1090_vm0, %v3250_v63, %v1089_v6 }
 0x59d   : > { %v1094_v15 = vsel %vm1092_vm1, %v1093_v10, %v1091_v13  ;;  %v1079_v16 = vsel %vm1078_vm2, %v3253_v8, %v1077_v11 }
 0x59e   : > { %v1096_v17 = vmul.f32 0.088388346, %v1094_v15  ;;  %v1082_v18 = vsel %vm1080_vm6, %v1081_v14, %v1079_v16 }
 0x59f   : > { %v1095_v19 = vmul.f32 0.088388346, %v1082_v18 }
 0x5a0   : > { %v1098_v20 = vmax.f32 %v1096_v17, 1e-08 }
 0x5a1   : > { %v1097_v21 = vmax.f32 %v1095_v19, 1e-08 }
 0x5a2   : > { %2704 = vrcp.f32 %v1098_v20  ;;  %v1125_v3 = vand.u32 2147483648, %v1098_v20  ;;  %v1123_v8 = vand.u32 2147483647, %v1098_v20  ;;  %vm1119_vm9 = vweird.f32 %v1098_v20 }
 0x5a3   : > { %2706 = vrcp.f32 %v1097_v21  ;;  %v1110_v4 = vand.u32 2147483648, %v1097_v21  ;;  %v1108_v32 = vand.u32 2147483647, %v1097_v21  ;;  %vm1104_vm10 = vweird.f32 %v1097_v21 }
 0x5a4   : > { %v1126_v34 = vor.u32 1.1754944e-38, %v1125_v3  ;;  %vm1124_vm13 = vcmp.eq.f32.partialorder %v1123_v8, 8.507059e+37 }
 0x5a5   : > { %v1111_v1 = vor.u32 1.1754944e-38, %v1110_v4  ;;  %vm1109_vm14 = vcmp.eq.f32.partialorder %v1108_v32, 8.507059e+37 }
 0x5a8   : > { %v2705_v23 = vpop.eup %2704 }
 0x5a9   : > { %v2707_v63 = vpop.eup %2706  ;;  %v1115_v25 = vmul.f32 %v2705_v23, %v1098_v20  ;;  %vm1120_vm7 = vweird.f32 %v2705_v23  ;;  %v2550_v20 = vld [vmem:[#allocation7 + $0x38] sm:$0xff] }
 0x5aa   : > { %v1100_v26 = vmul.f32 %v2707_v63, %v1097_v21  ;;  %vm1105_vm8 = vweird.f32 %v2707_v63  ;;  %vm1121_vm11 = vmor %vm1119_vm9, %vm1120_vm7  ;;  %1867 = vmatpush.bf16.msra.mxu1 %v2550_v20 }
 0x5ab   : > { %v1116_v27 = vsub.f32 1.0, %v1115_v25  ;;  %vm1106_vm12 = vmor %vm1104_vm10, %vm1105_vm8 }
 0x5ac   : > { %v1101_v28 = vsub.f32 1.0, %v1100_v26 }
 0x5ad   : > { %v1117_v30 = vmul.f32 %v2705_v23, %v1116_v27  ;;  %v2574_v27 = vld [vmem:[#allocation7 + $0xf8] sm:$0xff] }
 0x5ae   : > { %v1102_v31 = vmul.f32 %v2707_v63, %v1101_v28  ;;  %1909 = vmatpush.bf16.msrb.mxu0 %v2574_v27 }
 0x5af   : > { %v1118_v33 = vadd.f32 %v2705_v23, %v1117_v30  ;;  %v2549_v30 = vld [vmem:[#allocation7 + $0x30] sm:$0xff] }
 0x5b0   : > { %v1103_v12 = vadd.f32 %v2707_v63, %v1102_v31  ;;  %1868 = vmatpush.bf16.msra.mxu1 %v2549_v30  ;;  %v2556_v30 = vld [vmem:[#allocation7 + $0x68] sm:$0xff] }
 0x5b1   : > { %v1122_v35 = vsel %vm1121_vm11, %v2705_v23, %v1118_v33 }
 0x5b2   : > { %v1107_v37 = vsel %vm1106_vm12, %v2707_v63, %v1103_v12  ;;  %v1127_v38 = vsel %vm1124_vm13, %v1126_v34, %v1122_v35  ;;  %v2573_v34 = vld [vmem:[#allocation7 + $0xf0] sm:$0xff]  ;;  %v2566_v35 = vld [vmem:[#allocation7 + $0xb8] sm:$0xff] }
 0x5b3   : > { %v1112_v2 = vsel %vm1109_vm14, %v1111_v1, %v1107_v37  ;;  %v1130_v39 = vmul.f32 %v1127_v38, %v3237_v29  ;;  %v2558_v1 = vld [vmem:[#allocation7 + $0x78] sm:$0xff]  ;;  %1910 = vmatpush.bf16.msrb.mxu0 %v2573_v34  ;;  %1895 = vmatpush.bf16.msra.mxu2 %v2566_v35 }
 0x5b4   : > { %v1129_v40 = vmul.f32 %v1112_v2, %v3246_v9  ;;  %1881 = vmatpush.bf16.msra.mxu3 %v2558_v1 }
 0x5b5   : > { %v1135_v41 = vmul.f32 %v2657_v36, %v1130_v39 }
 0x5b6   : > { %v1134_v42 = vmul.f32 %v2657_v36, %v1129_v40 }
 0x5b8   : > { %v1136_v43 = vpack.c.bf16 %v1135_v41, %v1134_v42 }
 0x5ba   : > { %1347 = vmatmul.bf16.vlgmr.msrb.gmra.mxu1 %v1136_v43  ;;  %1361 = vmatmul.bf16.vlgmr.msrb.gmra.mxu3 %v1136_v43 }
 0x5bb   : > { %1375 = vmatmul.bf16.vlgmr.msrb.gmra.mxu2 %v1136_v43  ;;  %1389 = vmatmul.bf16.vlgmr.msra.gmra.mxu0 %v1136_v43 }
 0x637   : > { %v1348_v47 = vpop.f32.mrf.mxu1 }
 0x638   : > { %v3280_v29 = vadd.f32 %v1348_v47, %v1171_v45  ;;  %v1390_v9 = vpop.f32.mrf.mxu0 }
 0x639   : > { %v3282_v48 = vadd.f32 %v1390_v9, %v1174_v46 }
 0x63a   : > { %v3285_v49 = vmul.f32 0.70710677, %v3280_v29 }
 0x63b   : > { %v3289_v51 = vmul.f32 0.70710677, %v3282_v48 }
 0x63c   : > { %v3293_v53 = vand.u32 2147483647, %v3285_v49  ;;  %vm1411_vm15 = vcmp.ge.f32.partialorder %v3285_v49, 0.0 }
 0x63d   : > { %v3296_v54 = vand.u32 2147483647, %v3289_v51  ;;  %v1362_v55 = vpop.f32.mrf.mxu3  ;;  %vm1414_vm3 = vcmp.ge.f32.partialorder %v3289_v51, 0.0 }
 0x63e   : > { %v1435_v56 = vmul.f32 0.3275911, %v3293_v53  ;;  %v3299_v57 = vadd.f32 %v1362_v55, %v1172_v50  ;;  %v1376_v58 = vpop.f32.mrf.mxu2  ;;  %v1531_v37 = vsub.f32 0.0, %v3293_v53 }
 0x63f   : > { %v1438_v59 = vmul.f32 0.3275911, %v3296_v54  ;;  %v3304_v60 = vadd.f32 %v1376_v58, %v1173_v52  ;;  %v1350_v7 = vpop.f32.mrf.mxu1  ;;  %v1534_v43 = vsub.f32 0.0, %v3296_v54  ;;  %v2572_v58 = vld [vmem:[#allocation7 + $0xe8] sm:$0xff] }
 0x640   : > { %v1443_v61 = vadd.f32 1.0, %v1435_v56  ;;  %v3307_v62 = vmul.f32 0.70710677, %v3299_v57  ;;  %v1392_v10 = vpop.f32.mrf.mxu0  ;;  %v3319_v14 = vadd.f32 %v1350_v7, %v1171_v45  ;;  %1911 = vmatpush.bf16.msrb.mxu0 %v2572_v58  ;;  %v2563_v58 = vld [vmem:[#allocation7 + $0xa0] sm:$0xff] }
 0x641   : > { %v1446_v0 = vadd.f32 1.0, %v1438_v59  ;;  %v3310_v5 = vmul.f32 0.70710677, %v3304_v60  ;;  %v3321_v15 = vadd.f32 %v1392_v10, %v1174_v46  ;;  %v2548_v46 = vld [vmem:[#allocation7 + $0x28] sm:$0xff]  ;;  %v2557_v59 = vld [vmem:[#allocation7 + $0x70] sm:$0xff] }
 0x642   : > { %2708 = vrcp.f32 %v1443_v61  ;;  %v3313_v6 = vand.u32 2147483647, %v3307_v62  ;;  %v3325_v18 = vmul.f32 0.70710677, %v3319_v14  ;;  %v3360_v61 = vmul.f32 0.5, %v3280_v29  ;;  %1869 = vmatpush.bf16.msra.mxu1 %v2548_v46  ;;  %1882 = vmatpush.bf16.msra.mxu3 %v2557_v59  ;;  %v2571_v29 = vld [vmem:[#allocation7 + $0xe0] sm:$0xff] }
 0x643   : > { %2710 = vrcp.f32 %v1446_v0  ;;  %v3317_v13 = vand.u32 2147483647, %v3310_v5  ;;  %v3333_v25 = vmul.f32 0.70710677, %v3321_v15  ;;  %v1539_v0 = vmul.f32 %v1531_v37, %v3293_v53  ;;  %v2546_v46 = vld [vmem:[#allocation7 + $0x18] sm:$0xff] }
 0x644   : > { %v1436_v11 = vmul.f32 0.3275911, %v3313_v6  ;;  %v3337_v3 = vand.u32 2147483647, %v3325_v18  ;;  %v1542_v53 = vmul.f32 %v1534_v43, %v3296_v54  ;;  %1912 = vmatpush.bf16.msrb.mxu0 %v2571_v29  ;;  %vm1415_vm4 = vcmp.ge.f32.partialorder %v3325_v18, 0.0 }
 0x645   : > { %v1437_v17 = vmul.f32 0.3275911, %v3317_v13  ;;  %v1364_v26 = vpop.f32.mrf.mxu3  ;;  %v3344_v12 = vand.u32 2147483647, %v3333_v25  ;;  %vm1412_vm5 = vcmp.ge.f32.partialorder %v3307_v62, 0.0  ;;  %vm1418_vm0 = vcmp.ge.f32.partialorder %v3333_v25, 0.0 }
 0x646   : > { %v1444_v16 = vadd.f32 1.0, %v1436_v11  ;;  %v1439_v31 = vmul.f32 0.3275911, %v3337_v3  ;;  %v3340_v32 = vadd.f32 %v1364_v26, %v1172_v50  ;;  %v1378_v56 = vpop.f32.mrf.mxu2  ;;  %v2565_v11 = vld [vmem:[#allocation7 + $0xb0] sm:$0xff]  ;;  %v1532_v26 = vsub.f32 0.0, %v3313_v6  ;;  %1883 = vmatpush.bf16.msra.mxu3 %v2556_v30  ;;  %v2562_v30 = vld [vmem:[#allocation7 + $0x98] sm:$0xff] }
 0x647   : > { %v1445_v63 = vadd.f32 1.0, %v1437_v17  ;;  %v1442_v41 = vmul.f32 0.3275911, %v3344_v12  ;;  %v3366_v17 = vmul.f32 0.5, %v3282_v48  ;;  %v3373_v27 = vadd.f32 %v1378_v56, %v1173_v52  ;;  %1896 = vmatpush.bf16.msra.mxu2 %v2565_v11  ;;  %v2555_v56 = vld [vmem:[#allocation7 + $0x60] sm:$0xff] }
 0x648   : > { %v3327_v19 = vpop.eup %2708  ;;  %2712 = vrcp.f32 %v1444_v16  ;;  %v1447_v2 = vadd.f32 1.0, %v1439_v31  ;;  %v3354_v45 = vmul.f32 0.70710677, %v3340_v32  ;;  %v1547_v31 = vmul.f32 1.442695, %v1539_v0 }
 0x649   : > { %v3329_v21 = vpop.eup %2710  ;;  %v1459_v23 = vmul.f32 1.0614054, %v3327_v19  ;;  %2714 = vrcp.f32 %v1445_v63  ;;  %v1450_v55 = vadd.f32 1.0, %v1442_v41  ;;  %v1553_v37 = vmul.f32 1.442695, %v1542_v53 }
 0x64a   : > { %v1462_v28 = vmul.f32 1.0614054, %v3329_v21  ;;  %2716 = vrcp.f32 %v1447_v2  ;;  %v1538_v2 = vsub.f32 0.0, %v3344_v12  ;;  %1884 = vmatpush.bf16.msra.mxu3 %v2555_v56  ;;  %vm1416_vm1 = vcmp.ge.f32.partialorder %v3354_v45, 0.0 }
 0x64b   : > { %v1467_v4 = vadd.f32 -1.4531521, %v1459_v23  ;;  %2718 = vrcp.f32 %v1450_v55  ;;  %v2547_v23 = vld [vmem:[#allocation7 + $0x20] sm:$0xff]  ;;  %1897 = vmatpush.bf16.msra.mxu2 %v2564_v44  ;;  %vm1413_vm2 = vcmp.ge.f32.partialorder %v3310_v5, 0.0 }
 0x64c   : > { %v1470_v8 = vadd.f32 -1.4531521, %v1462_v28  ;;  %1870 = vmatpush.bf16.msra.mxu1 %v2547_v23  ;;  %2720 = vpow2.f32 %v1547_v31  ;;  %v2920_v23 = vmov -1.0  }
 0x64d   : > { %v1475_v33 = vmul.f32 %v3327_v19, %v1467_v4  ;;  %v3378_v4 = vand.u32 2147483647, %v3354_v45  ;;  %v3402_v29 = vsel %vm1411_vm15, 1.0, %v2920_v23  ;;  %v1426_v25 = vsel %vm1418_vm0, 1.0, %v2920_v23 }
 0x64e   : > { %v3346_v36 = vpop.eup %2712  ;;  %v1478_v38 = vmul.f32 %v3329_v21, %v1470_v8  ;;  %v1396_v45 = vmul.f32 0.5, %v3299_v57 }
 0x64f   : > { %v1483_v39 = vadd.f32 1.4214138, %v1475_v33  ;;  %v1460_v40 = vmul.f32 1.0614054, %v3346_v36  ;;  %v3356_v47 = vpop.eup %2714  ;;  %v1535_v33 = vsub.f32 0.0, %v3337_v3  ;;  %1898 = vmatpush.bf16.msra.mxu2 %v2563_v58 }
 0x650   : > { %v1486_v42 = vadd.f32 1.4214138, %v1478_v38  ;;  %v1461_v10 = vmul.f32 1.0614054, %v3356_v47  ;;  %v3380_v8 = vpop.eup %2716  ;;  %v1440_v35 = vmul.f32 0.3275911, %v3378_v4  ;;  %v1540_v38 = vmul.f32 %v1532_v26, %v3313_v6  ;;  %1871 = vmatpush.bf16.msra.mxu1 %v2546_v46 }
 0x651   : > { %v1491_v9 = vmul.f32 %v3327_v19, %v1483_v39  ;;  %v1468_v50 = vadd.f32 -1.4531521, %v1460_v40  ;;  %v1463_v1 = vmul.f32 1.0614054, %v3380_v8  ;;  %v3390_v39 = vmul.f32 0.70710677, %v3373_v27  ;;  %v3392_v40 = vpop.eup %2718 }
 0x652   : > { %v1494_v7 = vmul.f32 %v3329_v21, %v1486_v42  ;;  %v1469_v54 = vadd.f32 -1.4531521, %v1461_v10  ;;  %v1448_v43 = vadd.f32 1.0, %v1440_v35  ;;  %v1466_v55 = vmul.f32 1.0614054, %v3392_v40  ;;  %v2570_v6 = vld [vmem:[#allocation7 + $0xd8] sm:$0xff]  ;;  %v2721_v44 = vpop.eup %2720 }
 0x653   : > { %v1499_v16 = vadd.f32 -0.28449672, %v1491_v9  ;;  %v1476_v20 = vmul.f32 %v3346_v36, %v1468_v50  ;;  %v1471_v42 = vadd.f32 -1.4531521, %v1463_v1  ;;  %v1543_v50 = vmul.f32 %v1535_v33, %v3337_v3  ;;  %v2545_v10 = vld [vmem:[#allocation7 + $0x10] sm:$0xff]  ;;  %1913 = vmatpush.bf16.msrb.mxu0 %v2570_v6  ;;  %v2568_v35 = vld [vmem:[#allocation7 + $0xc8] sm:$0xff]  ;;  %1899 = vmatpush.bf16.msra.mxu2 %v2562_v30 }
 0x654   : > { %v1502_v63 = vadd.f32 -0.28449672, %v1494_v7  ;;  %v1477_v9 = vmul.f32 %v3356_v47, %v1469_v54  ;;  %2722 = vrcp.f32 %v1448_v43  ;;  %v1549_v11 = vmul.f32 1.442695, %v1540_v38  ;;  %v2569_v3 = vld [vmem:[#allocation7 + $0xd0] sm:$0xff]  ;;  %1872 = vmatpush.bf16.msra.mxu1 %v2545_v10 }
 0x655   : > { %v1507_v48 = vmul.f32 %v3327_v19, %v1499_v16  ;;  %v1484_v28 = vadd.f32 1.4214138, %v1476_v20  ;;  %v1479_v7 = vmul.f32 %v3380_v8, %v1471_v42  ;;  %2724 = vpow2.f32 %v1553_v37  ;;  %v2553_v42 = vld [vmem:[#allocation7 + $0x50] sm:$0xff] }
 0x656   : > { %v1510_v52 = vmul.f32 %v3329_v21, %v1502_v63  ;;  %v1474_v16 = vadd.f32 -1.4531521, %v1466_v55  ;;  %v1546_v20 = vmul.f32 %v1538_v2, %v3344_v12  ;;  %v1485_v26 = vadd.f32 1.4214138, %v1477_v9  ;;  %v2554_v12 = vld [vmem:[#allocation7 + $0x58] sm:$0xff]  ;;  %v2561_v55 = vld [vmem:[#allocation7 + $0x90] sm:$0xff] }
 0x657   : > { %v1492_v34 = vmul.f32 %v3346_v36, %v1484_v28  ;;  %v1515_v41 = vadd.f32 0.2548296, %v1507_v48  ;;  %v1487_v53 = vadd.f32 1.4214138, %v1479_v7  ;;  %v1555_v48 = vmul.f32 1.442695, %v1543_v50  ;;  %1914 = vmatpush.bf16.msrb.mxu0 %v2569_v3  ;;  %1885 = vmatpush.bf16.msra.mxu3 %v2554_v12 }
 0x658   : > { %v1518_v59 = vadd.f32 0.2548296, %v1510_v52  ;;  %v1482_v28 = vmul.f32 %v3392_v40, %v1474_v16  ;;  %v3411_v33 = vand.u32 2147483647, %v3390_v39  ;;  %2726 = vpow2.f32 %v1549_v11  ;;  %v2567_v16 = vld [vmem:[#allocation7 + $0xc0] sm:$0xff]  ;;  %1900 = vmatpush.bf16.msra.mxu2 %v2561_v55 }
 0x659   : > { %v1500_v0 = vadd.f32 -0.28449672, %v1492_v34  ;;  %v1523_v63 = vmul.f32 %v3327_v19, %v1515_v41  ;;  %v1495_v49 = vmul.f32 %v3380_v8, %v1487_v53  ;;  %v2544_v19 = vld [vmem:[#allocation7 + $0x8] sm:$0xff]  ;;  %v1533_v52 = vsub.f32 0.0, %v3317_v13 }
 0x65a   : > { %v1526_v31 = vmul.f32 %v3329_v21, %v1518_v59  ;;  %v1490_v34 = vadd.f32 1.4214138, %v1482_v28  ;;  %v1561_v1 = vmul.f32 1.442695, %v1546_v20  ;;  %v3414_v37 = vpop.eup %2722  ;;  %v1536_v2 = vsub.f32 0.0, %v3378_v4  ;;  %1873 = vmatpush.bf16.msra.mxu1 %v2544_v19  ;;  %v2552_v53 = vld [vmem:[#allocation7 + $0x48] sm:$0xff] }
 0x65b   : > { %v1508_v54 = vmul.f32 %v3346_v36, %v1500_v0  ;;  %v1563_v21 = vmul.f32 %v2721_v44, %v1523_v63  ;;  %v1503_v38 = vadd.f32 -0.28449672, %v1495_v49  ;;  %v1441_v41 = vmul.f32 0.3275911, %v3411_v33  ;;  %v2725_v43 = vpop.eup %2724  ;;  %v2543_v0 = vld [vmem:[#allocation7] sm:$0xff]  ;;  %1915 = vmatpush.bf16.msrb.mxu0 %v2568_v35  ;;  %1886 = vmatpush.bf16.msra.mxu3 %v2553_v42 }
 0x65c   : > { %v1493_v46 = vmul.f32 %v3356_v47, %v1485_v26  ;;  %2728 = vpow2.f32 %v1555_v48  ;;  %v1498_v9 = vmul.f32 %v3392_v40, %v1490_v34  ;;  %v1464_v50 = vmul.f32 1.0614054, %v3414_v37  ;;  %v2560_v26 = vld [vmem:[#allocation7 + $0x88] sm:$0xff] }
 0x65d   : > { %v1566_v6 = vmul.f32 %v2725_v43, %v1526_v31  ;;  %v1516_v56 = vadd.f32 0.2548296, %v1508_v54  ;;  %v1511_v58 = vmul.f32 %v3380_v8, %v1503_v38  ;;  %v1449_v59 = vadd.f32 1.0, %v1441_v41  ;;  %1901 = vmatpush.bf16.msra.mxu2 %v2560_v26 }
 0x65e   : > { %v1422_v7 = vsel %vm1414_vm3, 1.0, %v2920_v23  ;;  %v1506_v10 = vadd.f32 -0.28449672, %v1498_v9  ;;  %2730 = vpow2.f32 %v1561_v1  ;;  %v1472_v11 = vadd.f32 -1.4531521, %v1464_v50  ;;  %v2727_v48 = vpop.eup %2726  ;;  %1874 = vmatpush.bf16.msra.mxu1 %v2543_v0  ;;  %v2551_v1 = vld [vmem:[#allocation7 + $0x40] sm:$0xff] }
 0x65f   : > { %v1571_v20 = vsub.f32 1.0, %v1563_v21  ;;  %v1519_v3 = vadd.f32 0.2548296, %v1511_v58  ;;  %v1544_v63 = vmul.f32 %v1536_v2, %v3378_v4  ;;  %2732 = vrcp.f32 %v1449_v59  ;;  %1916 = vmatpush.bf16.msrb.mxu0 %v2567_v16  ;;  %1887 = vmatpush.bf16.msra.mxu3 %v2552_v53 }
 0x660   : > { %v1501_v28 = vadd.f32 -0.28449672, %v1493_v46  ;;  %v1514_v51 = vmul.f32 %v3392_v40, %v1506_v10  ;;  %v1480_v12 = vmul.f32 %v3414_v37, %v1472_v11  ;;  %v1574_v30 = vsub.f32 1.0, %v1566_v6 }
 0x661   : > { %v1541_v31 = vmul.f32 %v1533_v52, %v3317_v13  ;;  %v1527_v54 = vmul.f32 %v3380_v8, %v1519_v3  ;;  %v1524_v49 = vmul.f32 %v3346_v36, %v1516_v56  ;;  %v1399_v19 = vmul.f32 0.5, %v3319_v14  ;;  %v2559_v8 = vld [vmem:[#allocation7 + $0x80] sm:$0xff] }
 0x662   : > { %v2729_v4 = vpop.eup %2728  ;;  %v1522_v44 = vadd.f32 0.2548296, %v1514_v51  ;;  %v1488_v34 = vadd.f32 1.4214138, %v1480_v12  ;;  %v1579_v35 = vmul.f32 %v1571_v20, %v3402_v29  ;;  %v1423_v21 = vsel %vm1415_vm4, 1.0, %v2920_v23  ;;  %1902 = vmatpush.bf16.msra.mxu2 %v2559_v8 }
 0x663   : > { %v1567_v13 = vmul.f32 %v2729_v4, %v1527_v54  ;;  %v1557_v52 = vmul.f32 1.442695, %v1544_v63  ;;  %v1509_v36 = vmul.f32 %v3356_v47, %v1501_v28  ;;  %v1582_v29 = vmul.f32 %v1574_v30, %v1422_v7  ;;  %1888 = vmatpush.bf16.msra.mxu3 %v2551_v1 }
 0x664   : > { %v2731_v38 = vpop.eup %2730  ;;  %v1530_v14 = vmul.f32 %v3392_v40, %v1522_v44  ;;  %v1496_v2 = vmul.f32 %v3414_v37, %v1488_v34  ;;  %v1551_v42 = vmul.f32 1.442695, %v1541_v31  ;;  %v1537_v18 = vsub.f32 0.0, %v3411_v33 }
 0x665   : > { %v3442_v41 = vpop.eup %2732  ;;  %v1575_v43 = vsub.f32 1.0, %v1567_v13  ;;  %v1564_v46 = vmul.f32 %v2727_v48, %v1524_v49  ;;  %v1587_v6 = vadd.f32 1.0, %v1579_v35  ;;  %2734 = vpow2.f32 %v1557_v52 }
 0x666   : > { %v1570_v9 = vmul.f32 %v2731_v38, %v1530_v14  ;;  %v1504_v50 = vadd.f32 -0.28449672, %v1496_v2  ;;  %v1465_v55 = vmul.f32 1.0614054, %v3442_v41  ;;  %v1517_v40 = vadd.f32 0.2548296, %v1509_v36 }
 0x667   : > { %v1583_v56 = vmul.f32 %v1575_v43, %v1423_v21  ;;  %v1590_v7 = vadd.f32 1.0, %v1582_v29  ;;  %2736 = vpow2.f32 %v1551_v42  ;;  %v1545_v11 = vmul.f32 %v1537_v18, %v3411_v33 }
 0x668   : > { %v1578_v58 = vsub.f32 1.0, %v1570_v9  ;;  %v1512_v59 = vmul.f32 %v3414_v37, %v1504_v50  ;;  %v1473_v0 = vadd.f32 -1.4531521, %v1465_v55  ;;  %v1572_v16 = vsub.f32 1.0, %v1564_v46 }
 0x669   : > { %v1591_v10 = vadd.f32 1.0, %v1583_v56  ;;  %v1595_v53 = vmul.f32 %v1587_v6, %v3360_v61  ;;  %v1420_v26 = vsel %vm1412_vm5, 1.0, %v2920_v23  ;;  %v1402_v28 = vmul.f32 0.5, %v3321_v15 }
 0x66a   : > { %v1586_v20 = vmul.f32 %v1578_v58, %v1426_v25  ;;  %v1520_v3 = vadd.f32 0.2548296, %v1512_v59  ;;  %v1481_v63 = vmul.f32 %v3442_v41, %v1473_v0  ;;  %v1525_v51 = vmul.f32 %v3356_v47, %v1517_v40 }
 0x66b   : > { %v1599_v48 = vmul.f32 %v1591_v10, %v1399_v19  ;;  %v2735_v31 = vpop.eup %2734  ;;  %v1598_v54 = vmul.f32 %v1590_v7, %v3366_v17  ;;  %v1559_v61 = vmul.f32 1.442695, %v1545_v11  ;;  %v1580_v49 = vmul.f32 %v1572_v16, %v1420_v26 }
 0x66c   : > { %v1594_v12 = vadd.f32 1.0, %v1586_v20  ;;  %v1528_v30 = vmul.f32 %v3414_v37, %v1520_v3  ;;  %v1489_v33 = vadd.f32 1.4214138, %v1481_v63  ;;  %v1424_v37 = vsel %vm1416_vm1, 1.0, %v2920_v23 }
 0x66d   : > { %v1603_v4 = vpack.c.bf16 %v1599_v48, %v1595_v53  ;;  %v2737_v34 = vpop.eup %2736  ;;  %2738 = vpow2.f32 %v1559_v61  ;;  %v1588_v21 = vadd.f32 1.0, %v1580_v49  ;;  %v1400_v8 = vmul.f32 0.5, %v3340_v32 }
 0x66e   : > { %v1602_v44 = vmul.f32 %v1594_v12, %v1402_v28  ;;  %v1568_v62 = vmul.f32 %v2735_v31, %v1528_v30  ;;  %v1497_v19 = vmul.f32 %v3442_v41, %v1489_v33  ;;  %v1565_v15 = vmul.f32 %v2737_v34, %v1525_v51 }
 0x66f   : > { %1875 = vmatmul.bf16.vlgmr.msra.gmra.mxu1 %v1603_v4  ;;  %v1596_v14 = vmul.f32 %v1588_v21, %v1396_v45  ;;  %v1421_v43 = vsel %vm1413_vm2, 1.0, %v2920_v23  ;;  %vm1417_vm6 = vcmp.ge.f32.partialorder %v3390_v39, 0.0  ;;  %v1397_v55 = vmul.f32 0.5, %v3304_v60  ;;  %v2658_v39 = vld [vmem:[%s3535_s10] ss:$0 sm:$0xff] }
 0x670   : > { %v1606_v47 = vpack.c.bf16 %v1602_v44, %v1598_v54  ;;  %v1576_v1 = vsub.f32 1.0, %v1568_v62  ;;  %v1505_v35 = vadd.f32 -0.28449672, %v1497_v19  ;;  %v1573_v52 = vsub.f32 1.0, %v1565_v15 }
 0x671   : > { %v1425_v5 = vsel %vm1417_vm6, 1.0, %v2920_v23  ;;  %v1401_v6 = vmul.f32 0.5, %v3373_v27 }
 0x672   : > { %v1584_v17 = vmul.f32 %v1576_v1, %v1424_v37  ;;  %v1513_v13 = vmul.f32 %v3442_v41, %v1505_v35  ;;  %1917 = vmatmul.bf16.vlgmr.msrb.gmra.mxu0 %v1606_v47  ;;  %v1581_v18 = vmul.f32 %v1573_v52, %v1421_v43 }
 0x673   : > { %v2739_v42 = vpop.eup %2738 }
 0x674   : > { %v1592_v38 = vadd.f32 1.0, %v1584_v17  ;;  %v1521_v36 = vadd.f32 0.2548296, %v1513_v13  ;;  %v1589_v50 = vadd.f32 1.0, %v1581_v18 }
 0x676   : > { %v1600_v2 = vmul.f32 %v1592_v38, %v1400_v8  ;;  %v1529_v29 = vmul.f32 %v3442_v41, %v1521_v36  ;;  %v1597_v41 = vmul.f32 %v1589_v50, %v1397_v55  ;;  %v2659_v55 = vld [vmem:[%s3536_s11] ss:$0 sm:$0xff] }
 0x678   : > { %v1604_v46 = vpack.c.bf16 %v1600_v2, %v1596_v14  ;;  %v1569_v9 = vmul.f32 %v2739_v42, %v1529_v29 }
 0x67a   : > { %v1577_v57 = vsub.f32 1.0, %v1569_v9  ;;  %1889 = vmatmul.bf16.vlgmr.msra.gmra.mxu3 %v1604_v46 }
 0x67c   : > { %v1585_v32 = vmul.f32 %v1577_v57, %v1425_v5 }
 0x67e   : > { %v1593_v56 = vadd.f32 1.0, %v1585_v32 }
 0x680   : > { %v1601_v25 = vmul.f32 %v1593_v56, %v1401_v6 }
 0x682   : > { %v1605_v40 = vpack.c.bf16 %v1601_v25, %v1597_v41 }
 0x684   : > { %1903 = vmatmul.bf16.vlgmr.msra.gmra.mxu2 %v1605_v40 }
 0x6ec   : > { %v1876_v58 = vpop.f32.mrf.mxu1 }
 0x6ed   : > { %v1877_v0 = vadd.f32 %v2658_v39, %v1876_v58 }
 0x6ef   : > { %v1918_v23 = vpop.f32.mrf.mxu0 }
 0x6f4   : > { %v1878_v10 = vpop.f32.mrf.mxu1 }
 0x6f5   : > { %v1879_v20 = vadd.f32 %v2658_v39, %v1878_v10 }
 0x6f7   : > { %v1920_v28 = vpop.f32.mrf.mxu0 }
 0x6fd   : > { %v1890_v59 = vpop.f32.mrf.mxu3 }
 0x6fe   : > { %v1891_v7 = vadd.f32 %v1890_v59, %v1877_v0 }
 0x705   : > { %v1892_v60 = vpop.f32.mrf.mxu3 }
 0x706   : > { %v1893_v3 = vadd.f32 %v1892_v60, %v1879_v20 }
 0x707   : > { %v1904_v11 = vpop.f32.mrf.mxu2 }
 0x708   : > { %v1905_v16 = vadd.f32 %v1904_v11, %v1891_v7 }
 0x70a   : > { %v1919_v27 = vadd.f32 %v1918_v23, %v1905_v16 }
 0x70c   : > { %v3475_v63 = vadd.f32 %v1919_v27, %v3223_v22 }
 0x70e   : > { %v1926_v53 = vmul.f32 %v3475_v63, %v3475_v63 }
 0x70f   : > { %v1906_v26 = vpop.f32.mrf.mxu2 }
 0x710   : > { %v1907_v48 = vadd.f32 %v1906_v26, %v1893_v3  ;;  %1928 = vadd.xlane.f32.xlu2 %v1926_v53 }
 0x712   : > { %v1921_v51 = vadd.f32 %v1920_v28, %v1907_v48 }
 0x714   : > { %v3480_v12 = vadd.f32 %v1921_v51, %v3226_v24 }
 0x716   : > { %v1927_v30 = vmul.f32 %v3480_v12, %v3480_v12 }
 0x718   : > { %1930 = vadd.xlane.f32.xlu1 %v1927_v30 }
 0x783   : > { %v1929_v33 = vpop.xlane.xlu2 %1928 }
 0x784   : > { %2740 = vrsqrt.f32 %v1929_v33  ;;  %vm1939_vm7 = vcmp.eq.f32.partialorder %v1929_v33, inf  ;;  %v1942_v24 = vand.u32 2147483648, %v1929_v33  ;;  %vm1941_vm8 = vcmp.eq.f32.partialorder %v1929_v33, 0.0 }
 0x78a   : > { %v2741_v31 = vpop.eup %2740 }
 0x78b   : > { %v1933_v22 = vmul.f32 %v2741_v31, %v1929_v33  ;;  %v1931_v54 = vpop.xlane.xlu1 %1930 }
 0x78c   : > { %2742 = vrsqrt.f32 %v1931_v54  ;;  %vm1951_vm9 = vcmp.eq.f32.partialorder %v1931_v54, inf  ;;  %v1954_v52 = vand.u32 2147483648, %v1931_v54  ;;  %vm1953_vm10 = vcmp.eq.f32.partialorder %v1931_v54, 0.0 }
 0x78d   : > { %v1934_v4 = vmul.f32 %v2741_v31, %v1933_v22 }
 0x78f   : > { %v1935_v61 = vmul.f32 0.5, %v1934_v4 }
 0x791   : > { %v1936_v49 = vsub.f32 1.5, %v1935_v61 }
 0x792   : > { %v2743_v44 = vpop.eup %2742 }
 0x793   : > { %v1937_v62 = vmul.f32 %v2741_v31, %v1936_v49  ;;  %v1945_v19 = vmul.f32 %v2743_v44, %v1931_v54 }
 0x795   : > { %v1938_v34 = vmul.f32 %v1937_v62, %v1929_v33  ;;  %v1946_v15 = vmul.f32 %v2743_v44, %v1945_v19 }
 0x797   : > { %v1940_v47 = vsel %vm1939_vm7, %v1929_v33, %v1938_v34  ;;  %v1947_v1 = vmul.f32 0.5, %v1946_v15 }
 0x798   : > { %v1943_v35 = vsel %vm1941_vm8, %v1942_v24, %v1940_v47 }
 0x799   : > { %v1956_v37 = vmul.f32 0.088388346, %v1943_v35  ;;  %v1948_v21 = vsub.f32 1.5, %v1947_v1 }
 0x79b   : > { %v1958_v17 = vmax.f32 %v1956_v37, 1e-08  ;;  %v1949_v13 = vmul.f32 %v2743_v44, %v1948_v21 }
 0x79d   : > { %2744 = vrcp.f32 %v1958_v17  ;;  %v1950_v45 = vmul.f32 %v1949_v13, %v1931_v54  ;;  %v1971_v43 = vand.u32 2147483648, %v1958_v17  ;;  %v1969_v46 = vand.u32 2147483647, %v1958_v17 }
 0x79e   : > { %vm1965_vm12 = vweird.f32 %v1958_v17 }
 0x79f   : > { %v1952_v8 = vsel %vm1951_vm9, %v1931_v54, %v1950_v45  ;;  %v1972_v5 = vor.u32 1.1754944e-38, %v1971_v43  ;;  %vm1970_vm14 = vcmp.eq.f32.partialorder %v1969_v46, 8.507059e+37 }
 0x7a0   : > { %v1955_v38 = vsel %vm1953_vm10, %v1954_v52, %v1952_v8 }
 0x7a1   : > { %v1957_v36 = vmul.f32 0.088388346, %v1955_v38 }
 0x7a3   : > { %v2745_v14 = vpop.eup %2744  ;;  %v1959_v2 = vmax.f32 %v1957_v36, 1e-08 }
 0x7a4   : > { %v1961_v29 = vmul.f32 %v2745_v14, %v1958_v17  ;;  %vm1966_vm11 = vweird.f32 %v2745_v14 }
 0x7a5   : > { %2746 = vrcp.f32 %v1959_v2  ;;  %vm1967_vm13 = vmor %vm1965_vm12, %vm1966_vm11  ;;  %v1986_v25 = vand.u32 2147483648, %v1959_v2  ;;  %v1984_v58 = vand.u32 2147483647, %v1959_v2  ;;  %vm1980_vm3 = vweird.f32 %v1959_v2 }
 0x7a6   : > { %v1962_v42 = vsub.f32 1.0, %v1961_v29 }
 0x7a7   : > { %v1987_v0 = vor.u32 1.1754944e-38, %v1986_v25  ;;  %vm1985_vm5 = vcmp.eq.f32.partialorder %v1984_v58, 8.507059e+37 }
 0x7a8   : > { %v1963_v18 = vmul.f32 %v2745_v14, %v1962_v42 }
 0x7aa   : > { %v1964_v9 = vadd.f32 %v2745_v14, %v1963_v18 }
 0x7ab   : > { %v2747_v57 = vpop.eup %2746 }
 0x7ac   : > { %v1976_v50 = vmul.f32 %v2747_v57, %v1959_v2  ;;  %v1968_v32 = vsel %vm1967_vm13, %v2745_v14, %v1964_v9  ;;  %vm1981_vm15 = vweird.f32 %v2747_v57 }
 0x7ad   : > { %v1973_v6 = vsel %vm1970_vm14, %v1972_v5, %v1968_v32  ;;  %vm1982_vm4 = vmor %vm1980_vm3, %vm1981_vm15 }
 0x7ae   : > { %v1977_v56 = vsub.f32 1.0, %v1976_v50  ;;  %v1990_v41 = vmul.f32 %v1973_v6, %v3475_v63 }
 0x7b0   : > { %v1978_v40 = vmul.f32 %v2747_v57, %v1977_v56  ;;  %v1995_v39 = vmul.f32 %v2659_v55, %v1990_v41 }
 0x7b2   : > { %v1979_v59 = vadd.f32 %v2747_v57, %v1978_v40  ;;  %1997 = vst [vmem:[%s456_s16] sm:$0xff] %v1995_v39 }
 0x7b4   : > { %v1983_v7 = vsel %vm1982_vm4, %v2747_v57, %v1979_v59 }
 0x7b5   : > { %v1988_v23 = vsel %vm1985_vm5, %v1987_v0, %v1983_v7 }
 0x7b6   : > { %v1991_v10 = vmul.f32 %v1988_v23, %v3480_v12 }
 0x7b8   : > { %v1996_v11 = vmul.f32 %v2659_v55, %v1991_v10 }
 0x7ba   : > { %1998 = vst [vmem:[%s456_s16 + $0x8] sm:$0xff] %v1996_v11 }
 0x7bb   : > { %2865 = shalt.err (!%p2862_p8)
}
 0x7bc   : > { %s2921_s5 = smov 128   ;;  %s2922_s23 = smov 8  }
 0x7bd   : > { %2588 = dma.vmem_to_hbm [thread:$0]  (%p3026_p5), %s2013_s25, 256, %s2015_s17, %s2000_s15, %s2921_s5, %s2921_s5, %s2922_s23  }
 0x7be PF: > { %s3556_s27 = sld [smem:[#allocation12_spill]]  ;;  %p2610_p9 = scmp.ge.s32.totalorder %s2908_s24, 2 }
 0x7c0   : > { %p2601_p10 = pnand %p2610_p9, %p3030_p6 }
 0x7c2   : > { %p2602_p11 = pneg %p2601_p10 }
 0x7c4   : > { %s2029_s14 = sand.u32 1, %s3556_s27  }
 0x7c5   : > { %s2030_s26 = scalar_lea.sflag [#allocation4], %s2029_s14 }
 0x7c6   : > { %2891 = dma.done.wait (%p2602_p11), %s2030_s26, 256  }
 0x7c7   : > { %2893 = vsyncadd (%p2602_p11), %s2030_s26, 4294967040  ;;  %s3558_s24 = sld [smem:[#allocation14_spill]]  ;;  %s3561_s21 = smov %s2900_s22 }
 0x7c8   : > { %s3559_s16 = sld [smem:[#allocation13_spill]] }
 0x7c9   : > { %s3560_s23 = sld [smem:[#allocation15_spill]] }
 0x7cd   : > { %p24_p12 = scmp.ge.s32.totalorder %s3558_s24, 4  }
 0x7ce   : > { %s3562_s22 = smov %s3559_s16 }
 0x7cf   :  { %26 = sbr.rel (!%p24_p12) target bundleno = 8 (0x8), region = 116 }
 0x7d4   :  { %2036 = vsyncpa [#allocation3], 1 }
 0x7d5   :  { %2038 = vsyncpa [#allocation3 + $0x1], 1 }
 0x7d6   :  { %2039 = vsyncpa [#allocation6], 1 }
 0x7d7   :  { %2040 = vsyncpa [#allocation4], 1 }
 0x7d8   :  { %2042 = vsyncpa [#allocation4 + $0x1], 1 }

</bundles_post_ra>
